<compile_context>
chip_gen: v7x
topology: tpu7x:2x2x1
jax: 0.10.0
libtpu: 0.0.40
codegen_flags: <defaults>
</compile_context>

<pallas_src>
import jax
import jax.numpy as jnp
import numpy as np
from jax.experimental import pallas as pl
from jax.experimental.pallas import tpu as pltpu

EPS = 1e-5


def _sigmoid(v):                      # host / reference side
    return 1.0 / (1.0 + jnp.exp(-v))


def _sigmoid_k(v):                    # in-kernel: divide goes to the EUP slot
    return pl.reciprocal(1.0 + jnp.exp(-v), approx=True)


# ------------------------------ fused kernel -------------------------------

def fused_bottleneck_kernel(x_ref, bn1s_ref, bn1b_ref, w1_ref, b2_ref,
                            alpha_ref, w2_ref, b3_ref, caw1_ref, caw2_ref,
                            rmat_ref, cmat_ref, scw_ref, scb_ref,
                            o_ref, xpad_ref, ypad_ref):
    # x_ref     : (H, W, Cin)       one sample (batch dim squeezed by BlockSpec)
    # bn1s/bn1b : (1, 1, Cin)       BN1 eval-mode scale / shift
    # w1_ref    : (3, 3, Cin, Cout) conv1 weights with BN2 scale folded in
    # b2_ref    : (1, Cout)         BN2 shift
    # alpha_ref : (1, Cout)         PReLU slopes
    # w2_ref    : (3, 3, Cout, Cout) conv2 weights with BN3 scale folded in
    # b3_ref    : (1, Cout)         BN3 shift
    # caw1/caw2 : (Cout, Cr)/(Cr, Cout) channel-attention MLP
    # rmat_ref  : (3, H, H)         SA row-shift matrices (zero-fill shifts)
    # cmat_ref  : (3, 2, W, W)      SA col-shift matrices, 3x3x2 weights folded
    #                               in and pre-summed over kw
    # scw_ref   : (Cin, Cout)       shortcut 1x1 conv, its BN scale folded in
    # scb_ref   : (1, Cout)         shortcut BN shift
    # o_ref     : (H, W, Cout)
    # xpad/ypad : VMEM scratch (H+2, W+2, Cin/Cout), 3x3 halos
    H, W, Cin = x_ref.shape
    Cout = w1_ref.shape[-1]
    HW = H * W

    x = x_ref[...]                                          # (H, W, Cin)

    # ---- BN1 (eval affine) + conv1 3x3 (BN2 folded) + PReLU -----------------
    x_bn = x * bn1s_ref[...] + bn1b_ref[...]
    xpad_ref[...] = jnp.zeros_like(xpad_ref)
    xpad_ref[1:H + 1, 1:W + 1, :] = x_bn

    acc = jnp.zeros((HW, Cout), jnp.float32)
    for kh in range(3):
        for kw in range(3):
            patch = xpad_ref[kh:kh + H, kw:kw + W, :].reshape(HW, Cin)
            acc = acc + jnp.dot(patch, w1_ref[kh, kw],
                                preferred_element_type=jnp.float32)
    y = acc + b2_ref[...]
    y = jnp.where(y >= 0.0, y, y * alpha_ref[...])          # PReLU

    # ---- conv2 3x3 (BN3 folded) ----------------------------------------------
    ypad_ref[...] = jnp.zeros_like(ypad_ref)
    ypad_ref[1:H + 1, 1:W + 1, :] = y.reshape(H, W, Cout)

    acc2 = jnp.zeros((HW, Cout), jnp.float32)
    for kh in range(3):
        for kw in range(3):
            patch = ypad_ref[kh:kh + H, kw:kw + W, :].reshape(HW, Cout)
            acc2 = acc2 + jnp.dot(patch, w2_ref[kh, kw],
                                  preferred_element_type=jnp.float32)
    z = acc2 + b3_ref[...]                                   # (HW, Cout)

    # ---- channel attention (CAModule) ----------------------------------------
    avg = jnp.mean(z, axis=0, keepdims=True)                 # (1, Cout)
    mx = jnp.max(z, axis=0, keepdims=True)                   # (1, Cout)

    def mlp(v):
        h = jnp.maximum(jnp.dot(v, caw1_ref[...],
                                preferred_element_type=jnp.float32), 0.0)
        return jnp.dot(h, caw2_ref[...], preferred_element_type=jnp.float32)

    z = z * _sigmoid_k(mlp(avg) + mlp(mx))                   # (HW, Cout)
    z3 = z.reshape(H, W, Cout)

    # ---- spatial attention (SAModule): 3x3 conv via shift-matrix matmuls -----
    avg_c = jnp.mean(z3, axis=-1)                            # (H, W)
    max_c = jnp.max(z3, axis=-1)                             # (H, W)
    conv = jnp.zeros((H, W), jnp.float32)
    for kh in range(3):
        ra = jnp.dot(rmat_ref[kh], avg_c, preferred_element_type=jnp.float32)
        rm = jnp.dot(rmat_ref[kh], max_c, preferred_element_type=jnp.float32)
        conv = conv + jnp.dot(ra, cmat_ref[kh, 0],
                              preferred_element_type=jnp.float32)
        conv = conv + jnp.dot(rm, cmat_ref[kh, 1],
                              preferred_element_type=jnp.float32)
    z3 = z3 * _sigmoid_k(conv)[..., None]

    # ---- shortcut (1x1 conv, BN folded) + residual add ------------------------
    sc = jnp.dot(x.reshape(HW, Cin), scw_ref[...],
                 preferred_element_type=jnp.float32) + scb_ref[...]
    o_ref[...] = sc.reshape(H, W, Cout) + z3


# --------------------------------- wrapper ----------------------------------

def bottleneck_ir_cbam_forward(x_nhwc, pp):
    N, H, W, Cin = x_nhwc.shape
    Cout = pp["w1"].shape[-1]
    Cr = pp["ca_w1"].shape[-1]
    f32 = jnp.float32

    def const(nd):
        return lambda n: (0,) * nd

    in_specs = [
        pl.BlockSpec((None, H, W, Cin), lambda n: (n, 0, 0, 0)),   # x (one sample)
        pl.BlockSpec((1, 1, Cin), const(3)),                       # BN1 scale
        pl.BlockSpec((1, 1, Cin), const(3)),                       # BN1 shift
        pl.BlockSpec((3, 3, Cin, Cout), const(4)),                 # conv1 (folded)
        pl.BlockSpec((1, Cout), const(2)),                         # b2
        pl.BlockSpec((1, Cout), const(2)),                         # PReLU alpha
        pl.BlockSpec((3, 3, Cout, Cout), const(4)),                # conv2 (folded)
        pl.BlockSpec((1, Cout), const(2)),                         # b3
        pl.BlockSpec((Cout, Cr), const(2)),                        # ca_w1
        pl.BlockSpec((Cr, Cout), const(2)),                        # ca_w2
        pl.BlockSpec((3, H, H), const(3)),                         # SA row shifts
        pl.BlockSpec((3, 2, W, W), const(4)),                      # SA col shifts (kw-summed)
        pl.BlockSpec((Cin, Cout), const(2)),                       # shortcut w (folded)
        pl.BlockSpec((1, Cout), const(2)),                         # shortcut b
    ]
    # TODO(synk): at production sizes (large H*W), tile over H row-blocks with
    # a 1-row halo per side instead of whole-sample blocks (size for v7x 64 MiB VMEM).
    return pl.pallas_call(
        fused_bottleneck_kernel,
        out_shape=jax.ShapeDtypeStruct((N, H, W, Cout), f32),
        grid=(N,),
        in_specs=in_specs,
        out_specs=pl.BlockSpec((None, H, W, Cout), lambda n: (n, 0, 0, 0)),
        scratch_shapes=[pltpu.VMEM((H + 2, W + 2, Cin), f32),
                        pltpu.VMEM((H + 2, W + 2, Cout), f32)],
        compiler_params=pltpu.CompilerParams(
            dimension_semantics=("parallel",)),
    )(x_nhwc, pp["bn1_s"], pp["bn1_b"], pp["w1"], pp["b2"], pp["alpha"],
      pp["w2"], pp["b3"], pp["ca_w1"], pp["ca_w2"], pp["rmat"], pp["cmat"],
      pp["sc_w"], pp["sc_b"])


# ------------------------ parameters & folding prep --------------------------

def _fold_bn(g, b, m, v):
    s = g / jnp.sqrt(v + EPS)
    return s, b - m * s


def _bn_params(key, c):
    k1, k2, k3, k4 = jax.random.split(key, 4)
    g = 1.0 + 0.1 * jax.random.normal(k1, (c,), jnp.float32)
    b = 0.1 * jax.random.normal(k2, (c,), jnp.float32)
    m = 0.1 * jax.random.normal(k3, (c,), jnp.float32)
    v = jax.random.uniform(k4, (c,), jnp.float32, 0.5, 1.5)
    return _fold_bn(g, b, m, v)


def make_params(key, cin, cout, reduction=16):
    ks = jax.random.split(key, 10)
    cr = max(cout // reduction, 1)
    bn1_s, bn1_b = _bn_params(ks[0], cin)
    bn2_s, bn2_b = _bn_params(ks[1], cout)
    bn3_s, bn3_b = _bn_params(ks[2], cout)
    sc_s, sc_b = _bn_params(ks[3], cout)
    return dict(
        bn1_s=bn1_s, bn1_b=bn1_b,
        conv1_w=0.1 * jax.random.normal(ks[4], (3, 3, cin, cout), jnp.float32),
        bn2_s=bn2_s, bn2_b=bn2_b,
        prelu_a=jnp.full((cout,), 0.25, jnp.float32),
        conv2_w=0.1 * jax.random.normal(ks[5], (3, 3, cout, cout), jnp.float32),
        bn3_s=bn3_s, bn3_b=bn3_b,
        ca_w1=0.2 * jax.random.normal(ks[6], (cout, cr), jnp.float32),
        ca_w2=0.2 * jax.random.normal(ks[7], (cr, cout), jnp.float32),
        sa_w=0.2 * jax.random.normal(ks[8], (18,), jnp.float32),   # (3,3,2) flat
        sc_w=0.2 * jax.random.normal(ks[9], (cin, cout), jnp.float32),
        sc_s=sc_s, sc_b=sc_b,
    )


def _sa_shift_mats(sa_w, H, W):
    """Row / column zero-fill shift matrices for the SA 3x3 'same' conv."""
    rmat = np.zeros((3, H, H), np.float32)
    cbase = np.zeros((3, W, W), np.float32)
    for k in range(3):
        d = k - 1
        for h in range(H):
            if 0 <= h + d < H:
                rmat[k, h, h + d] = 1.0        # (R_k @ m)[h, w] = m[h+d, w]
        for w in range(W):
            if 0 <= w + d < W:
                cbase[k, w + d, w] = 1.0       # (m @ C_k)[h, w] = m[h, w+d]
    saw = np.asarray(sa_w, np.float32).reshape(3, 3, 2)
    cmat = np.zeros((3, 2, W, W), np.float32)   # summed over kw, weights folded
    for kh in range(3):
        for c in range(2):
            for kw in range(3):
                cmat[kh, c] += saw[kh, kw, c] * cbase[kw]
    return jnp.asarray(rmat), jnp.asarray(cmat)


def prep_params(p, H, W):
    """Fold eval-mode BatchNorms into conv weights / per-channel biases."""
    cin, cout = p["conv1_w"].shape[2], p["conv1_w"].shape[3]
    rmat, cmat = _sa_shift_mats(p["sa_w"], H, W)
    return dict(
        bn1_s=p["bn1_s"].reshape(1, 1, cin),
        bn1_b=p["bn1_b"].reshape(1, 1, cin),
        w1=p["conv1_w"] * p["bn2_s"][None, None, None, :],
        b2=p["bn2_b"].reshape(1, cout),
        alpha=p["prelu_a"].reshape(1, cout),
        w2=p["conv2_w"] * p["bn3_s"][None, None, None, :],
        b3=p["bn3_b"].reshape(1, cout),
        ca_w1=p["ca_w1"], ca_w2=p["ca_w2"],
        rmat=rmat, cmat=cmat,
        sc_w=p["sc_w"] * p["sc_s"][None, :],
        sc_b=p["sc_b"].reshape(1, cout),
    )


# --------------------------------- reference ---------------------------------

def reference(x_nhwc, p):
    hi = jax.lax.Precision.HIGHEST

    def conv(x, w):
        return jax.lax.conv_general_dilated(
            x, w, (1, 1), ((1, 1), (1, 1)),
            dimension_numbers=("NHWC", "HWIO", "NHWC"), precision=hi)

    x_bn = x_nhwc * p["bn1_s"] + p["bn1_b"]
    y = conv(x_bn, p["conv1_w"]) * p["bn2_s"] + p["bn2_b"]
    y = jnp.where(y >= 0.0, y, y * p["prelu_a"])
    z = conv(y, p["conv2_w"]) * p["bn3_s"] + p["bn3_b"]
    # channel attention
    avg = jnp.mean(z, axis=(1, 2))
    mx = jnp.max(z, axis=(1, 2))
    mlp = lambda v: jnp.maximum(v @ p["ca_w1"], 0.0) @ p["ca_w2"]
    z = z * _sigmoid(mlp(avg) + mlp(mx))[:, None, None, :]
    # spatial attention
    maps = jnp.concatenate([jnp.mean(z, -1, keepdims=True),
                            jnp.max(z, -1, keepdims=True)], axis=-1)
    sa = jax.lax.conv_general_dilated(
        maps, p["sa_w"].reshape(3, 3, 2, 1), (1, 1), ((1, 1), (1, 1)),
        dimension_numbers=("NHWC", "HWIO", "NHWC"), precision=hi)
    z = z * _sigmoid(sa)
    # shortcut (1x1 conv + BN)
    N, H, W, Cin = x_nhwc.shape
    sc = (x_nhwc.reshape(-1, Cin) @ p["sc_w"]) * p["sc_s"] + p["sc_b"]
    return sc.reshape(z.shape) + z


# ----------------------------------- main ------------------------------------

if __name__ == "__main__":
    N, Cin, Cout, H, W = 2, 16, 32, 16, 16   # reduction=16 -> hidden dim = 2
    key = jax.random.PRNGKey(0)
    kx, kp = jax.random.split(key)
    x_nchw = jax.random.normal(kx, (N, Cin, H, W), jnp.float32)   # PyTorch NCHW
    x_nhwc = jnp.transpose(x_nchw, (0, 2, 3, 1))                  # kernel layout
    raw_params = make_params(kp, Cin, Cout, reduction=16)
    prepped = prep_params(raw_params, H, W)

    out = jax.block_until_ready(bottleneck_ir_cbam_forward(x_nhwc, prepped))

    ref = reference(x_nhwc, raw_params)
    np.testing.assert_allclose(np.asarray(out), np.asarray(ref),
                               rtol=3e-2, atol=3e-2)
    print("KERNEL_OK")
</pallas_src>

<mosaic_0001>
module attributes {stable_mosaic.version = 11 : i64} {
  func.func @fused_bottleneck_kernel(%arg0: i32, %arg1: memref<1x16x16x16xf32, #tpu.memory_space<vmem>>, %arg2: memref<1x1x16xf32, #tpu.memory_space<vmem>>, %arg3: memref<1x1x16xf32, #tpu.memory_space<vmem>>, %arg4: memref<3x3x16x32xf32, #tpu.memory_space<vmem>>, %arg5: memref<1x32xf32, #tpu.memory_space<vmem>>, %arg6: memref<1x32xf32, #tpu.memory_space<vmem>>, %arg7: memref<3x3x32x32xf32, #tpu.memory_space<vmem>>, %arg8: memref<1x32xf32, #tpu.memory_space<vmem>>, %arg9: memref<32x2xf32, #tpu.memory_space<vmem>>, %arg10: memref<2x32xf32, #tpu.memory_space<vmem>>, %arg11: memref<3x16x16xf32, #tpu.memory_space<vmem>>, %arg12: memref<3x2x16x16xf32, #tpu.memory_space<vmem>>, %arg13: memref<16x32xf32, #tpu.memory_space<vmem>>, %arg14: memref<1x32xf32, #tpu.memory_space<vmem>>, %arg15: memref<1x16x16x32xf32, #tpu.memory_space<vmem>>, %arg16: memref<18x18x16xf32, #tpu.memory_space<vmem>>, %arg17: memref<18x18x32xf32, #tpu.memory_space<vmem>>) attributes {dimension_semantics = [#tpu.dimension_semantics<parallel>], iteration_bounds = array<i64: 2>, scalar_prefetch = 0 : i64, scratch_operands = 2 : i64, tpu.core_type = #tpu.core_type<tc>, window_params = [{transform_indices = @transform_0, window_bounds = array<i64: 1, 16, 16, 16>}, {pipeline_mode = #tpu.pipeline_mode<synchronous>, transform_indices = @transform_1, window_bounds = array<i64: 1, 1, 16>}, {pipeline_mode = #tpu.pipeline_mode<synchronous>, transform_indices = @transform_2, window_bounds = array<i64: 1, 1, 16>}, {pipeline_mode = #tpu.pipeline_mode<synchronous>, transform_indices = @transform_3, window_bounds = array<i64: 3, 3, 16, 32>}, {pipeline_mode = #tpu.pipeline_mode<synchronous>, transform_indices = @transform_4, window_bounds = array<i64: 1, 32>}, {pipeline_mode = #tpu.pipeline_mode<synchronous>, transform_indices = @transform_5, window_bounds = array<i64: 1, 32>}, {pipeline_mode = #tpu.pipeline_mode<synchronous>, transform_indices = @transform_6, window_bounds = array<i64: 3, 3, 32, 32>}, {pipeline_mode = #tpu.pipeline_mode<synchronous>, transform_indices = @transform_7, window_bounds = array<i64: 1, 32>}, {pipeline_mode = #tpu.pipeline_mode<synchronous>, transform_indices = @transform_8, window_bounds = array<i64: 32, 2>}, {pipeline_mode = #tpu.pipeline_mode<synchronous>, transform_indices = @transform_9, window_bounds = array<i64: 2, 32>}, {pipeline_mode = #tpu.pipeline_mode<synchronous>, transform_indices = @transform_10, window_bounds = array<i64: 3, 16, 16>}, {pipeline_mode = #tpu.pipeline_mode<synchronous>, transform_indices = @transform_11, window_bounds = array<i64: 3, 2, 16, 16>}, {pipeline_mode = #tpu.pipeline_mode<synchronous>, transform_indices = @transform_12, window_bounds = array<i64: 16, 32>}, {pipeline_mode = #tpu.pipeline_mode<synchronous>, transform_indices = @transform_13, window_bounds = array<i64: 1, 32>}, {transform_indices = @transform_14, window_bounds = array<i64: 1, 16, 16, 32>}]} {
    %c0 = arith.constant 0 : index
    %c0_0 = arith.constant 0 : index
    %c0_1 = arith.constant 0 : index
    %c0_2 = arith.constant 0 : index
    %0 = vector.load %arg1[%c0, %c0_0, %c0_1, %c0_2] : memref<1x16x16x16xf32, #tpu.memory_space<vmem>>, vector<1x16x16x16xf32>
    %1 = vector.shape_cast %0 : vector<1x16x16x16xf32> to vector<16x16x16xf32>
    %c0_3 = arith.constant 0 : index
    %c0_4 = arith.constant 0 : index
    %c0_5 = arith.constant 0 : index
    %2 = vector.load %arg2[%c0_3, %c0_4, %c0_5] : memref<1x1x16xf32, #tpu.memory_space<vmem>>, vector<1x1x16xf32>
    %3 = vector.broadcast %2 : vector<1x1x16xf32> to vector<16x16x16xf32>
    %4 = arith.mulf %1, %3 : vector<16x16x16xf32>
    %c0_6 = arith.constant 0 : index
    %c0_7 = arith.constant 0 : index
    %c0_8 = arith.constant 0 : index
    %5 = vector.load %arg3[%c0_6, %c0_7, %c0_8] : memref<1x1x16xf32, #tpu.memory_space<vmem>>, vector<1x1x16xf32>
    %6 = vector.broadcast %5 : vector<1x1x16xf32> to vector<16x16x16xf32>
    %7 = arith.addf %4, %6 : vector<16x16x16xf32>
    %cst = arith.constant 0.000000e+00 : f32
    %8 = vector.broadcast %cst : f32 to vector<18x18x16xf32>
    %c0_9 = arith.constant 0 : index
    %c0_10 = arith.constant 0 : index
    %c0_11 = arith.constant 0 : index
    %9 = vector.load %arg16[%c0_9, %c0_10, %c0_11] : memref<18x18x16xf32, #tpu.memory_space<vmem>>, vector<18x18x16xf32>
    tpu.vector_store %arg16[%c0_9, %c0_10, %c0_11], %8 {strides = array<i32>} : memref<18x18x16xf32, #tpu.memory_space<vmem>>, vector<18x18x16xf32>,
    %c1 = arith.constant 1 : index
    %c1_12 = arith.constant 1 : index
    %c0_13 = arith.constant 0 : index
    %10 = vector.load %arg16[%c1, %c1_12, %c0_13] : memref<18x18x16xf32, #tpu.memory_space<vmem>>, vector<16x16x16xf32>
    tpu.vector_store %arg16[%c1, %c1_12, %c0_13], %7 {strides = array<i32>} : memref<18x18x16xf32, #tpu.memory_space<vmem>>, vector<16x16x16xf32>,
    %cst_14 = arith.constant 0.000000e+00 : f32
    %11 = vector.broadcast %cst_14 : f32 to vector<256x32xf32>
    %c0_15 = arith.constant 0 : index
    %c0_16 = arith.constant 0 : index
    %c0_17 = arith.constant 0 : index
    %12 = vector.load %arg16[%c0_15, %c0_16, %c0_17] : memref<18x18x16xf32, #tpu.memory_space<vmem>>, vector<16x16x16xf32>
    %13 = vector.shape_cast %12 : vector<16x16x16xf32> to vector<256x16xf32>
    %c0_18 = arith.constant 0 : index
    %c0_19 = arith.constant 0 : index
    %c0_20 = arith.constant 0 : index
    %c0_21 = arith.constant 0 : index
    %14 = vector.load %arg4[%c0_18, %c0_19, %c0_20, %c0_21] : memref<3x3x16x32xf32, #tpu.memory_space<vmem>>, vector<1x1x16x32xf32>
    %15 = vector.shape_cast %14 : vector<1x1x16x32xf32> to vector<16x32xf32>
    %cst_22 = arith.constant dense<0.000000e+00> : vector<256x32xf32>
    %16 = tpu.matmul %13, %15, %cst_22 {dimension_numbers = #tpu.dot_dimension_numbers<[1], [0], [0], [1], [0, 0, 1, 1], [], []>} : vector<256x16xf32>, vector<16x32xf32>, vector<256x32xf32> -> vector<256x32xf32>
    %17 = arith.addf %11, %16 : vector<256x32xf32>
    %c0_23 = arith.constant 0 : index
    %c1_24 = arith.constant 1 : index
    %c0_25 = arith.constant 0 : index
    %18 = vector.load %arg16[%c0_23, %c1_24, %c0_25] : memref<18x18x16xf32, #tpu.memory_space<vmem>>, vector<16x16x16xf32>
    %19 = vector.shape_cast %18 : vector<16x16x16xf32> to vector<256x16xf32>
    %c0_26 = arith.constant 0 : index
    %c1_27 = arith.constant 1 : index
    %c0_28 = arith.constant 0 : index
    %c0_29 = arith.constant 0 : index
    %20 = vector.load %arg4[%c0_26, %c1_27, %c0_28, %c0_29] : memref<3x3x16x32xf32, #tpu.memory_space<vmem>>, vector<1x1x16x32xf32>
    %21 = vector.shape_cast %20 : vector<1x1x16x32xf32> to vector<16x32xf32>
    %cst_30 = arith.constant dense<0.000000e+00> : vector<256x32xf32>
    %22 = tpu.matmul %19, %21, %cst_30 {dimension_numbers = #tpu.dot_dimension_numbers<[1], [0], [0], [1], [0, 0, 1, 1], [], []>} : vector<256x16xf32>, vector<16x32xf32>, vector<256x32xf32> -> vector<256x32xf32>
    %23 = arith.addf %17, %22 : vector<256x32xf32>
    %c0_31 = arith.constant 0 : index
    %c2 = arith.constant 2 : index
    %c0_32 = arith.constant 0 : index
    %24 = vector.load %arg16[%c0_31, %c2, %c0_32] : memref<18x18x16xf32, #tpu.memory_space<vmem>>, vector<16x16x16xf32>
    %25 = vector.shape_cast %24 : vector<16x16x16xf32> to vector<256x16xf32>
    %c0_33 = arith.constant 0 : index
    %c2_34 = arith.constant 2 : index
    %c0_35 = arith.constant 0 : index
    %c0_36 = arith.constant 0 : index
    %26 = vector.load %arg4[%c0_33, %c2_34, %c0_35, %c0_36] : memref<3x3x16x32xf32, #tpu.memory_space<vmem>>, vector<1x1x16x32xf32>
    %27 = vector.shape_cast %26 : vector<1x1x16x32xf32> to vector<16x32xf32>
    %cst_37 = arith.constant dense<0.000000e+00> : vector<256x32xf32>
    %28 = tpu.matmul %25, %27, %cst_37 {dimension_numbers = #tpu.dot_dimension_numbers<[1], [0], [0], [1], [0, 0, 1, 1], [], []>} : vector<256x16xf32>, vector<16x32xf32>, vector<256x32xf32> -> vector<256x32xf32>
    %29 = arith.addf %23, %28 : vector<256x32xf32>
    %c1_38 = arith.constant 1 : index
    %c0_39 = arith.constant 0 : index
    %c0_40 = arith.constant 0 : index
    %30 = vector.load %arg16[%c1_38, %c0_39, %c0_40] : memref<18x18x16xf32, #tpu.memory_space<vmem>>, vector<16x16x16xf32>
    %31 = vector.shape_cast %30 : vector<16x16x16xf32> to vector<256x16xf32>
    %c1_41 = arith.constant 1 : index
    %c0_42 = arith.constant 0 : index
    %c0_43 = arith.constant 0 : index
    %c0_44 = arith.constant 0 : index
    %32 = vector.load %arg4[%c1_41, %c0_42, %c0_43, %c0_44] : memref<3x3x16x32xf32, #tpu.memory_space<vmem>>, vector<1x1x16x32xf32>
    %33 = vector.shape_cast %32 : vector<1x1x16x32xf32> to vector<16x32xf32>
    %cst_45 = arith.constant dense<0.000000e+00> : vector<256x32xf32>
    %34 = tpu.matmul %31, %33, %cst_45 {dimension_numbers = #tpu.dot_dimension_numbers<[1], [0], [0], [1], [0, 0, 1, 1], [], []>} : vector<256x16xf32>, vector<16x32xf32>, vector<256x32xf32> -> vector<256x32xf32>
    %35 = arith.addf %29, %34 : vector<256x32xf32>
    %c1_46 = arith.constant 1 : index
    %c1_47 = arith.constant 1 : index
    %c0_48 = arith.constant 0 : index
    %36 = vector.load %arg16[%c1_46, %c1_47, %c0_48] : memref<18x18x16xf32, #tpu.memory_space<vmem>>, vector<16x16x16xf32>
    %37 = vector.shape_cast %36 : vector<16x16x16xf32> to vector<256x16xf32>
    %c1_49 = arith.constant 1 : index
    %c1_50 = arith.constant 1 : index
    %c0_51 = arith.constant 0 : index
    %c0_52 = arith.constant 0 : index
    %38 = vector.load %arg4[%c1_49, %c1_50, %c0_51, %c0_52] : memref<3x3x16x32xf32, #tpu.memory_space<vmem>>, vector<1x1x16x32xf32>
    %39 = vector.shape_cast %38 : vector<1x1x16x32xf32> to vector<16x32xf32>
    %cst_53 = arith.constant dense<0.000000e+00> : vector<256x32xf32>
    %40 = tpu.matmul %37, %39, %cst_53 {dimension_numbers = #tpu.dot_dimension_numbers<[1], [0], [0], [1], [0, 0, 1, 1], [], []>} : vector<256x16xf32>, vector<16x32xf32>, vector<256x32xf32> -> vector<256x32xf32>
    %41 = arith.addf %35, %40 : vector<256x32xf32>
    %c1_54 = arith.constant 1 : index
    %c2_55 = arith.constant 2 : index
    %c0_56 = arith.constant 0 : index
    %42 = vector.load %arg16[%c1_54, %c2_55, %c0_56] : memref<18x18x16xf32, #tpu.memory_space<vmem>>, vector<16x16x16xf32>
    %43 = vector.shape_cast %42 : vector<16x16x16xf32> to vector<256x16xf32>
    %c1_57 = arith.constant 1 : index
    %c2_58 = arith.constant 2 : index
    %c0_59 = arith.constant 0 : index
    %c0_60 = arith.constant 0 : index
    %44 = vector.load %arg4[%c1_57, %c2_58, %c0_59, %c0_60] : memref<3x3x16x32xf32, #tpu.memory_space<vmem>>, vector<1x1x16x32xf32>
    %45 = vector.shape_cast %44 : vector<1x1x16x32xf32> to vector<16x32xf32>
    %cst_61 = arith.constant dense<0.000000e+00> : vector<256x32xf32>
    %46 = tpu.matmul %43, %45, %cst_61 {dimension_numbers = #tpu.dot_dimension_numbers<[1], [0], [0], [1], [0, 0, 1, 1], [], []>} : vector<256x16xf32>, vector<16x32xf32>, vector<256x32xf32> -> vector<256x32xf32>
    %47 = arith.addf %41, %46 : vector<256x32xf32>
    %c2_62 = arith.constant 2 : index
    %c0_63 = arith.constant 0 : index
    %c0_64 = arith.constant 0 : index
    %48 = vector.load %arg16[%c2_62, %c0_63, %c0_64] : memref<18x18x16xf32, #tpu.memory_space<vmem>>, vector<16x16x16xf32>
    %49 = vector.shape_cast %48 : vector<16x16x16xf32> to vector<256x16xf32>
    %c2_65 = arith.constant 2 : index
    %c0_66 = arith.constant 0 : index
    %c0_67 = arith.constant 0 : index
    %c0_68 = arith.constant 0 : index
    %50 = vector.load %arg4[%c2_65, %c0_66, %c0_67, %c0_68] : memref<3x3x16x32xf32, #tpu.memory_space<vmem>>, vector<1x1x16x32xf32>
    %51 = vector.shape_cast %50 : vector<1x1x16x32xf32> to vector<16x32xf32>
    %cst_69 = arith.constant dense<0.000000e+00> : vector<256x32xf32>
    %52 = tpu.matmul %49, %51, %cst_69 {dimension_numbers = #tpu.dot_dimension_numbers<[1], [0], [0], [1], [0, 0, 1, 1], [], []>} : vector<256x16xf32>, vector<16x32xf32>, vector<256x32xf32> -> vector<256x32xf32>
    %53 = arith.addf %47, %52 : vector<256x32xf32>
    %c2_70 = arith.constant 2 : index
    %c1_71 = arith.constant 1 : index
    %c0_72 = arith.constant 0 : index
    %54 = vector.load %arg16[%c2_70, %c1_71, %c0_72] : memref<18x18x16xf32, #tpu.memory_space<vmem>>, vector<16x16x16xf32>
    %55 = vector.shape_cast %54 : vector<16x16x16xf32> to vector<256x16xf32>
    %c2_73 = arith.constant 2 : index
    %c1_74 = arith.constant 1 : index
    %c0_75 = arith.constant 0 : index
    %c0_76 = arith.constant 0 : index
    %56 = vector.load %arg4[%c2_73, %c1_74, %c0_75, %c0_76] : memref<3x3x16x32xf32, #tpu.memory_space<vmem>>, vector<1x1x16x32xf32>
    %57 = vector.shape_cast %56 : vector<1x1x16x32xf32> to vector<16x32xf32>
    %cst_77 = arith.constant dense<0.000000e+00> : vector<256x32xf32>
    %58 = tpu.matmul %55, %57, %cst_77 {dimension_numbers = #tpu.dot_dimension_numbers<[1], [0], [0], [1], [0, 0, 1, 1], [], []>} : vector<256x16xf32>, vector<16x32xf32>, vector<256x32xf32> -> vector<256x32xf32>
    %59 = arith.addf %53, %58 : vector<256x32xf32>
    %c2_78 = arith.constant 2 : index
    %c2_79 = arith.constant 2 : index
    %c0_80 = arith.constant 0 : index
    %60 = vector.load %arg16[%c2_78, %c2_79, %c0_80] : memref<18x18x16xf32, #tpu.memory_space<vmem>>, vector<16x16x16xf32>
    %61 = vector.shape_cast %60 : vector<16x16x16xf32> to vector<256x16xf32>
    %c2_81 = arith.constant 2 : index
    %c2_82 = arith.constant 2 : index
    %c0_83 = arith.constant 0 : index
    %c0_84 = arith.constant 0 : index
    %62 = vector.load %arg4[%c2_81, %c2_82, %c0_83, %c0_84] : memref<3x3x16x32xf32, #tpu.memory_space<vmem>>, vector<1x1x16x32xf32>
    %63 = vector.shape_cast %62 : vector<1x1x16x32xf32> to vector<16x32xf32>
    %cst_85 = arith.constant dense<0.000000e+00> : vector<256x32xf32>
    %64 = tpu.matmul %61, %63, %cst_85 {dimension_numbers = #tpu.dot_dimension_numbers<[1], [0], [0], [1], [0, 0, 1, 1], [], []>} : vector<256x16xf32>, vector<16x32xf32>, vector<256x32xf32> -> vector<256x32xf32>
    %65 = arith.addf %59, %64 : vector<256x32xf32>
    %c0_86 = arith.constant 0 : index
    %c0_87 = arith.constant 0 : index
    %66 = vector.load %arg5[%c0_86, %c0_87] : memref<1x32xf32, #tpu.memory_space<vmem>>, vector<1x32xf32>
    %67 = vector.broadcast %66 : vector<1x32xf32> to vector<256x32xf32>
    %68 = arith.addf %65, %67 : vector<256x32xf32>
    %cst_88 = arith.constant 0.000000e+00 : f32
    %69 = vector.broadcast %cst_88 : f32 to vector<256x32xf32>
    %70 = arith.cmpf oge, %68, %69 : vector<256x32xf32>
    %c0_89 = arith.constant 0 : index
    %c0_90 = arith.constant 0 : index
    %71 = vector.load %arg6[%c0_89, %c0_90] : memref<1x32xf32, #tpu.memory_space<vmem>>, vector<1x32xf32>
    %72 = vector.broadcast %71 : vector<1x32xf32> to vector<256x32xf32>
    %73 = arith.mulf %68, %72 : vector<256x32xf32>
    %74 = arith.select %70, %68, %73 : vector<256x32xi1>, vector<256x32xf32>
    %cst_91 = arith.constant 0.000000e+00 : f32
    %75 = vector.broadcast %cst_91 : f32 to vector<18x18x32xf32>
    %c0_92 = arith.constant 0 : index
    %c0_93 = arith.constant 0 : index
    %c0_94 = arith.constant 0 : index
    %76 = vector.load %arg17[%c0_92, %c0_93, %c0_94] : memref<18x18x32xf32, #tpu.memory_space<vmem>>, vector<18x18x32xf32>
    tpu.vector_store %arg17[%c0_92, %c0_93, %c0_94], %75 {strides = array<i32>} : memref<18x18x32xf32, #tpu.memory_space<vmem>>, vector<18x18x32xf32>,
    %77 = vector.shape_cast %74 : vector<256x32xf32> to vector<16x16x32xf32>
    %c1_95 = arith.constant 1 : index
    %c1_96 = arith.constant 1 : index
    %c0_97 = arith.constant 0 : index
    %78 = vector.load %arg17[%c1_95, %c1_96, %c0_97] : memref<18x18x32xf32, #tpu.memory_space<vmem>>, vector<16x16x32xf32>
    tpu.vector_store %arg17[%c1_95, %c1_96, %c0_97], %77 {strides = array<i32>} : memref<18x18x32xf32, #tpu.memory_space<vmem>>, vector<16x16x32xf32>,
    %cst_98 = arith.constant 0.000000e+00 : f32
    %79 = vector.broadcast %cst_98 : f32 to vector<256x32xf32>
    %c0_99 = arith.constant 0 : index
    %c0_100 = arith.constant 0 : index
    %c0_101 = arith.constant 0 : index
    %80 = vector.load %arg17[%c0_99, %c0_100, %c0_101] : memref<18x18x32xf32, #tpu.memory_space<vmem>>, vector<16x16x32xf32>
    %81 = vector.shape_cast %80 : vector<16x16x32xf32> to vector<256x32xf32>
    %c0_102 = arith.constant 0 : index
    %c0_103 = arith.constant 0 : index
    %c0_104 = arith.constant 0 : index
    %c0_105 = arith.constant 0 : index
    %82 = vector.load %arg7[%c0_102, %c0_103, %c0_104, %c0_105] : memref<3x3x32x32xf32, #tpu.memory_space<vmem>>, vector<1x1x32x32xf32>
    %83 = vector.shape_cast %82 : vector<1x1x32x32xf32> to vector<32x32xf32>
    %cst_106 = arith.constant dense<0.000000e+00> : vector<256x32xf32>
    %84 = tpu.matmul %81, %83, %cst_106 {dimension_numbers = #tpu.dot_dimension_numbers<[1], [0], [0], [1], [0, 0, 1, 1], [], []>} : vector<256x32xf32>, vector<32x32xf32>, vector<256x32xf32> -> vector<256x32xf32>
    %85 = arith.addf %79, %84 : vector<256x32xf32>
    %c0_107 = arith.constant 0 : index
    %c1_108 = arith.constant 1 : index
    %c0_109 = arith.constant 0 : index
    %86 = vector.load %arg17[%c0_107, %c1_108, %c0_109] : memref<18x18x32xf32, #tpu.memory_space<vmem>>, vector<16x16x32xf32>
    %87 = vector.shape_cast %86 : vector<16x16x32xf32> to vector<256x32xf32>
    %c0_110 = arith.constant 0 : index
    %c1_111 = arith.constant 1 : index
    %c0_112 = arith.constant 0 : index
    %c0_113 = arith.constant 0 : index
    %88 = vector.load %arg7[%c0_110, %c1_111, %c0_112, %c0_113] : memref<3x3x32x32xf32, #tpu.memory_space<vmem>>, vector<1x1x32x32xf32>
    %89 = vector.shape_cast %88 : vector<1x1x32x32xf32> to vector<32x32xf32>
    %cst_114 = arith.constant dense<0.000000e+00> : vector<256x32xf32>
    %90 = tpu.matmul %87, %89, %cst_114 {dimension_numbers = #tpu.dot_dimension_numbers<[1], [0], [0], [1], [0, 0, 1, 1], [], []>} : vector<256x32xf32>, vector<32x32xf32>, vector<256x32xf32> -> vector<256x32xf32>
    %91 = arith.addf %85, %90 : vector<256x32xf32>
    %c0_115 = arith.constant 0 : index
    %c2_116 = arith.constant 2 : index
    %c0_117 = arith.constant 0 : index
    %92 = vector.load %arg17[%c0_115, %c2_116, %c0_117] : memref<18x18x32xf32, #tpu.memory_space<vmem>>, vector<16x16x32xf32>
    %93 = vector.shape_cast %92 : vector<16x16x32xf32> to vector<256x32xf32>
    %c0_118 = arith.constant 0 : index
    %c2_119 = arith.constant 2 : index
    %c0_120 = arith.constant 0 : index
    %c0_121 = arith.constant 0 : index
    %94 = vector.load %arg7[%c0_118, %c2_119, %c0_120, %c0_121] : memref<3x3x32x32xf32, #tpu.memory_space<vmem>>, vector<1x1x32x32xf32>
    %95 = vector.shape_cast %94 : vector<1x1x32x32xf32> to vector<32x32xf32>
    %cst_122 = arith.constant dense<0.000000e+00> : vector<256x32xf32>
    %96 = tpu.matmul %93, %95, %cst_122 {dimension_numbers = #tpu.dot_dimension_numbers<[1], [0], [0], [1], [0, 0, 1, 1], [], []>} : vector<256x32xf32>, vector<32x32xf32>, vector<256x32xf32> -> vector<256x32xf32>
    %97 = arith.addf %91, %96 : vector<256x32xf32>
    %c1_123 = arith.constant 1 : index
    %c0_124 = arith.constant 0 : index
    %c0_125 = arith.constant 0 : index
    %98 = vector.load %arg17[%c1_123, %c0_124, %c0_125] : memref<18x18x32xf32, #tpu.memory_space<vmem>>, vector<16x16x32xf32>
    %99 = vector.shape_cast %98 : vector<16x16x32xf32> to vector<256x32xf32>
    %c1_126 = arith.constant 1 : index
    %c0_127 = arith.constant 0 : index
    %c0_128 = arith.constant 0 : index
    %c0_129 = arith.constant 0 : index
    %100 = vector.load %arg7[%c1_126, %c0_127, %c0_128, %c0_129] : memref<3x3x32x32xf32, #tpu.memory_space<vmem>>, vector<1x1x32x32xf32>
    %101 = vector.shape_cast %100 : vector<1x1x32x32xf32> to vector<32x32xf32>
    %cst_130 = arith.constant dense<0.000000e+00> : vector<256x32xf32>
    %102 = tpu.matmul %99, %101, %cst_130 {dimension_numbers = #tpu.dot_dimension_numbers<[1], [0], [0], [1], [0, 0, 1, 1], [], []>} : vector<256x32xf32>, vector<32x32xf32>, vector<256x32xf32> -> vector<256x32xf32>
    %103 = arith.addf %97, %102 : vector<256x32xf32>
    %c1_131 = arith.constant 1 : index
    %c1_132 = arith.constant 1 : index
    %c0_133 = arith.constant 0 : index
    %104 = vector.load %arg17[%c1_131, %c1_132, %c0_133] : memref<18x18x32xf32, #tpu.memory_space<vmem>>, vector<16x16x32xf32>
    %105 = vector.shape_cast %104 : vector<16x16x32xf32> to vector<256x32xf32>
    %c1_134 = arith.constant 1 : index
    %c1_135 = arith.constant 1 : index
    %c0_136 = arith.constant 0 : index
    %c0_137 = arith.constant 0 : index
    %106 = vector.load %arg7[%c1_134, %c1_135, %c0_136, %c0_137] : memref<3x3x32x32xf32, #tpu.memory_space<vmem>>, vector<1x1x32x32xf32>
    %107 = vector.shape_cast %106 : vector<1x1x32x32xf32> to vector<32x32xf32>
    %cst_138 = arith.constant dense<0.000000e+00> : vector<256x32xf32>
    %108 = tpu.matmul %105, %107, %cst_138 {dimension_numbers = #tpu.dot_dimension_numbers<[1], [0], [0], [1], [0, 0, 1, 1], [], []>} : vector<256x32xf32>, vector<32x32xf32>, vector<256x32xf32> -> vector<256x32xf32>
    %109 = arith.addf %103, %108 : vector<256x32xf32>
    %c1_139 = arith.constant 1 : index
    %c2_140 = arith.constant 2 : index
    %c0_141 = arith.constant 0 : index
    %110 = vector.load %arg17[%c1_139, %c2_140, %c0_141] : memref<18x18x32xf32, #tpu.memory_space<vmem>>, vector<16x16x32xf32>
    %111 = vector.shape_cast %110 : vector<16x16x32xf32> to vector<256x32xf32>
    %c1_142 = arith.constant 1 : index
    %c2_143 = arith.constant 2 : index
    %c0_144 = arith.constant 0 : index
    %c0_145 = arith.constant 0 : index
    %112 = vector.load %arg7[%c1_142, %c2_143, %c0_144, %c0_145] : memref<3x3x32x32xf32, #tpu.memory_space<vmem>>, vector<1x1x32x32xf32>
    %113 = vector.shape_cast %112 : vector<1x1x32x32xf32> to vector<32x32xf32>
    %cst_146 = arith.constant dense<0.000000e+00> : vector<256x32xf32>
    %114 = tpu.matmul %111, %113, %cst_146 {dimension_numbers = #tpu.dot_dimension_numbers<[1], [0], [0], [1], [0, 0, 1, 1], [], []>} : vector<256x32xf32>, vector<32x32xf32>, vector<256x32xf32> -> vector<256x32xf32>
    %115 = arith.addf %109, %114 : vector<256x32xf32>
    %c2_147 = arith.constant 2 : index
    %c0_148 = arith.constant 0 : index
    %c0_149 = arith.constant 0 : index
    %116 = vector.load %arg17[%c2_147, %c0_148, %c0_149] : memref<18x18x32xf32, #tpu.memory_space<vmem>>, vector<16x16x32xf32>
    %117 = vector.shape_cast %116 : vector<16x16x32xf32> to vector<256x32xf32>
    %c2_150 = arith.constant 2 : index
    %c0_151 = arith.constant 0 : index
    %c0_152 = arith.constant 0 : index
    %c0_153 = arith.constant 0 : index
    %118 = vector.load %arg7[%c2_150, %c0_151, %c0_152, %c0_153] : memref<3x3x32x32xf32, #tpu.memory_space<vmem>>, vector<1x1x32x32xf32>
    %119 = vector.shape_cast %118 : vector<1x1x32x32xf32> to vector<32x32xf32>
    %cst_154 = arith.constant dense<0.000000e+00> : vector<256x32xf32>
    %120 = tpu.matmul %117, %119, %cst_154 {dimension_numbers = #tpu.dot_dimension_numbers<[1], [0], [0], [1], [0, 0, 1, 1], [], []>} : vector<256x32xf32>, vector<32x32xf32>, vector<256x32xf32> -> vector<256x32xf32>
    %121 = arith.addf %115, %120 : vector<256x32xf32>
    %c2_155 = arith.constant 2 : index
    %c1_156 = arith.constant 1 : index
    %c0_157 = arith.constant 0 : index
    %122 = vector.load %arg17[%c2_155, %c1_156, %c0_157] : memref<18x18x32xf32, #tpu.memory_space<vmem>>, vector<16x16x32xf32>
    %123 = vector.shape_cast %122 : vector<16x16x32xf32> to vector<256x32xf32>
    %c2_158 = arith.constant 2 : index
    %c1_159 = arith.constant 1 : index
    %c0_160 = arith.constant 0 : index
    %c0_161 = arith.constant 0 : index
    %124 = vector.load %arg7[%c2_158, %c1_159, %c0_160, %c0_161] : memref<3x3x32x32xf32, #tpu.memory_space<vmem>>, vector<1x1x32x32xf32>
    %125 = vector.shape_cast %124 : vector<1x1x32x32xf32> to vector<32x32xf32>
    %cst_162 = arith.constant dense<0.000000e+00> : vector<256x32xf32>
    %126 = tpu.matmul %123, %125, %cst_162 {dimension_numbers = #tpu.dot_dimension_numbers<[1], [0], [0], [1], [0, 0, 1, 1], [], []>} : vector<256x32xf32>, vector<32x32xf32>, vector<256x32xf32> -> vector<256x32xf32>
    %127 = arith.addf %121, %126 : vector<256x32xf32>
    %c2_163 = arith.constant 2 : index
    %c2_164 = arith.constant 2 : index
    %c0_165 = arith.constant 0 : index
    %128 = vector.load %arg17[%c2_163, %c2_164, %c0_165] : memref<18x18x32xf32, #tpu.memory_space<vmem>>, vector<16x16x32xf32>
    %129 = vector.shape_cast %128 : vector<16x16x32xf32> to vector<256x32xf32>
    %c2_166 = arith.constant 2 : index
    %c2_167 = arith.constant 2 : index
    %c0_168 = arith.constant 0 : index
    %c0_169 = arith.constant 0 : index
    %130 = vector.load %arg7[%c2_166, %c2_167, %c0_168, %c0_169] : memref<3x3x32x32xf32, #tpu.memory_space<vmem>>, vector<1x1x32x32xf32>
    %131 = vector.shape_cast %130 : vector<1x1x32x32xf32> to vector<32x32xf32>
    %cst_170 = arith.constant dense<0.000000e+00> : vector<256x32xf32>
    %132 = tpu.matmul %129, %131, %cst_170 {dimension_numbers = #tpu.dot_dimension_numbers<[1], [0], [0], [1], [0, 0, 1, 1], [], []>} : vector<256x32xf32>, vector<32x32xf32>, vector<256x32xf32> -> vector<256x32xf32>
    %133 = arith.addf %127, %132 : vector<256x32xf32>
    %c0_171 = arith.constant 0 : index
    %c0_172 = arith.constant 0 : index
    %134 = vector.load %arg8[%c0_171, %c0_172] : memref<1x32xf32, #tpu.memory_space<vmem>>, vector<1x32xf32>
    %135 = vector.broadcast %134 : vector<1x32xf32> to vector<256x32xf32>
    %136 = arith.addf %133, %135 : vector<256x32xf32>
    %cst_173 = arith.constant dense<0.000000e+00> : vector<32xf32>
    %137 = vector.multi_reduction <add>, %136, %cst_173 [0] : vector<256x32xf32> to vector<32xf32>
    %138 = vector.shape_cast %137 : vector<32xf32> to vector<1x32xf32>
    %cst_174 = arith.constant 2.560000e+02 : f32
    %139 = vector.broadcast %cst_174 : f32 to vector<1x32xf32>
    %140 = arith.divf %138, %139 : vector<1x32xf32>
    %cst_175 = arith.constant dense<0xFF800000> : vector<32xf32>
    %141 = vector.multi_reduction <maximumf>, %136, %cst_175 [0] : vector<256x32xf32> to vector<32xf32>
    %142 = vector.shape_cast %141 : vector<32xf32> to vector<1x32xf32>
    %c0_176 = arith.constant 0 : index
    %c0_177 = arith.constant 0 : index
    %143 = vector.load %arg9[%c0_176, %c0_177] : memref<32x2xf32, #tpu.memory_space<vmem>>, vector<32x2xf32>
    %cst_178 = arith.constant dense<0.000000e+00> : vector<1x2xf32>
    %144 = tpu.matmul %140, %143, %cst_178 {dimension_numbers = #tpu.dot_dimension_numbers<[1], [0], [0], [1], [0, 0, 1, 1], [], []>} : vector<1x32xf32>, vector<32x2xf32>, vector<1x2xf32> -> vector<1x2xf32>
    %cst_179 = arith.constant 0.000000e+00 : f32
    %145 = vector.broadcast %cst_179 : f32 to vector<1x2xf32>
    %146 = arith.maximumf %144, %145 : vector<1x2xf32>
    %c0_180 = arith.constant 0 : index
    %c0_181 = arith.constant 0 : index
    %147 = vector.load %arg10[%c0_180, %c0_181] : memref<2x32xf32, #tpu.memory_space<vmem>>, vector<2x32xf32>
    %cst_182 = arith.constant dense<0.000000e+00> : vector<1x32xf32>
    %148 = tpu.matmul %146, %147, %cst_182 {dimension_numbers = #tpu.dot_dimension_numbers<[1], [0], [0], [1], [0, 0, 1, 1], [], []>} : vector<1x2xf32>, vector<2x32xf32>, vector<1x32xf32> -> vector<1x32xf32>
    %c0_183 = arith.constant 0 : index
    %c0_184 = arith.constant 0 : index
    %149 = vector.load %arg9[%c0_183, %c0_184] : memref<32x2xf32, #tpu.memory_space<vmem>>, vector<32x2xf32>
    %cst_185 = arith.constant dense<0.000000e+00> : vector<1x2xf32>
    %150 = tpu.matmul %142, %149, %cst_185 {dimension_numbers = #tpu.dot_dimension_numbers<[1], [0], [0], [1], [0, 0, 1, 1], [], []>} : vector<1x32xf32>, vector<32x2xf32>, vector<1x2xf32> -> vector<1x2xf32>
    %cst_186 = arith.constant 0.000000e+00 : f32
    %151 = vector.broadcast %cst_186 : f32 to vector<1x2xf32>
    %152 = arith.maximumf %150, %151 : vector<1x2xf32>
    %c0_187 = arith.constant 0 : index
    %c0_188 = arith.constant 0 : index
    %153 = vector.load %arg10[%c0_187, %c0_188] : memref<2x32xf32, #tpu.memory_space<vmem>>, vector<2x32xf32>
    %cst_189 = arith.constant dense<0.000000e+00> : vector<1x32xf32>
    %154 = tpu.matmul %152, %153, %cst_189 {dimension_numbers = #tpu.dot_dimension_numbers<[1], [0], [0], [1], [0, 0, 1, 1], [], []>} : vector<1x2xf32>, vector<2x32xf32>, vector<1x32xf32> -> vector<1x32xf32>
    %155 = arith.addf %148, %154 : vector<1x32xf32>
    %cst_190 = arith.constant 0.000000e+00 : f32
    %156 = vector.broadcast %cst_190 : f32 to vector<1x32xf32>
    %157 = arith.subf %156, %155 : vector<1x32xf32>
    %158 = math.exp %157 : vector<1x32xf32>
    %cst_191 = arith.constant 1.000000e+00 : f32
    %159 = vector.broadcast %cst_191 : f32 to vector<1x32xf32>
    %160 = arith.addf %159, %158 : vector<1x32xf32>
    %161 = tpu.reciprocal %160 {approx = true} : vector<1x32xf32> -> vector<1x32xf32>
    %162 = vector.broadcast %161 : vector<1x32xf32> to vector<256x32xf32>
    %163 = arith.mulf %136, %162 : vector<256x32xf32>
    %164 = vector.shape_cast %163 : vector<256x32xf32> to vector<16x16x32xf32>
    %cst_192 = arith.constant dense<0.000000e+00> : vector<16x16xf32>
    %165 = vector.multi_reduction <add>, %164, %cst_192 [2] : vector<16x16x32xf32> to vector<16x16xf32>
    %cst_193 = arith.constant 3.200000e+01 : f32
    %166 = vector.broadcast %cst_193 : f32 to vector<16x16xf32>
    %167 = arith.divf %165, %166 : vector<16x16xf32>
    %cst_194 = arith.constant dense<0xFF800000> : vector<16x16xf32>
    %168 = vector.multi_reduction <maximumf>, %164, %cst_194 [2] : vector<16x16x32xf32> to vector<16x16xf32>
    %cst_195 = arith.constant 0.000000e+00 : f32
    %169 = vector.broadcast %cst_195 : f32 to vector<16x16xf32>
    %c0_196 = arith.constant 0 : index
    %c0_197 = arith.constant 0 : index
    %c0_198 = arith.constant 0 : index
    %170 = vector.load %arg11[%c0_196, %c0_197, %c0_198] : memref<3x16x16xf32, #tpu.memory_space<vmem>>, vector<1x16x16xf32>
    %171 = vector.shape_cast %170 : vector<1x16x16xf32> to vector<16x16xf32>
    %cst_199 = arith.constant dense<0.000000e+00> : vector<16x16xf32>
    %172 = tpu.matmul %171, %167, %cst_199 {dimension_numbers = #tpu.dot_dimension_numbers<[1], [0], [0], [1], [0, 0, 1, 1], [], []>} : vector<16x16xf32>, vector<16x16xf32>, vector<16x16xf32> -> vector<16x16xf32>
    %c0_200 = arith.constant 0 : index
    %c0_201 = arith.constant 0 : index
    %c0_202 = arith.constant 0 : index
    %173 = vector.load %arg11[%c0_200, %c0_201, %c0_202] : memref<3x16x16xf32, #tpu.memory_space<vmem>>, vector<1x16x16xf32>
    %174 = vector.shape_cast %173 : vector<1x16x16xf32> to vector<16x16xf32>
    %cst_203 = arith.constant dense<0.000000e+00> : vector<16x16xf32>
    %175 = tpu.matmul %174, %168, %cst_203 {dimension_numbers = #tpu.dot_dimension_numbers<[1], [0], [0], [1], [0, 0, 1, 1], [], []>} : vector<16x16xf32>, vector<16x16xf32>, vector<16x16xf32> -> vector<16x16xf32>
    %c0_204 = arith.constant 0 : index
    %c0_205 = arith.constant 0 : index
    %c0_206 = arith.constant 0 : index
    %c0_207 = arith.constant 0 : index
    %176 = vector.load %arg12[%c0_204, %c0_205, %c0_206, %c0_207] : memref<3x2x16x16xf32, #tpu.memory_space<vmem>>, vector<1x1x16x16xf32>
    %177 = vector.shape_cast %176 : vector<1x1x16x16xf32> to vector<16x16xf32>
    %cst_208 = arith.constant dense<0.000000e+00> : vector<16x16xf32>
    %178 = tpu.matmul %172, %177, %cst_208 {dimension_numbers = #tpu.dot_dimension_numbers<[1], [0], [0], [1], [0, 0, 1, 1], [], []>} : vector<16x16xf32>, vector<16x16xf32>, vector<16x16xf32> -> vector<16x16xf32>
    %179 = arith.addf %169, %178 : vector<16x16xf32>
    %c0_209 = arith.constant 0 : index
    %c1_210 = arith.constant 1 : index
    %c0_211 = arith.constant 0 : index
    %c0_212 = arith.constant 0 : index
    %180 = vector.load %arg12[%c0_209, %c1_210, %c0_211, %c0_212] : memref<3x2x16x16xf32, #tpu.memory_space<vmem>>, vector<1x1x16x16xf32>
    %181 = vector.shape_cast %180 : vector<1x1x16x16xf32> to vector<16x16xf32>
    %cst_213 = arith.constant dense<0.000000e+00> : vector<16x16xf32>
    %182 = tpu.matmul %175, %181, %cst_213 {dimension_numbers = #tpu.dot_dimension_numbers<[1], [0], [0], [1], [0, 0, 1, 1], [], []>} : vector<16x16xf32>, vector<16x16xf32>, vector<16x16xf32> -> vector<16x16xf32>
    %183 = arith.addf %179, %182 : vector<16x16xf32>
    %c1_214 = arith.constant 1 : index
    %c0_215 = arith.constant 0 : index
    %c0_216 = arith.constant 0 : index
    %184 = vector.load %arg11[%c1_214, %c0_215, %c0_216] : memref<3x16x16xf32, #tpu.memory_space<vmem>>, vector<1x16x16xf32>
    %185 = vector.shape_cast %184 : vector<1x16x16xf32> to vector<16x16xf32>
    %cst_217 = arith.constant dense<0.000000e+00> : vector<16x16xf32>
    %186 = tpu.matmul %185, %167, %cst_217 {dimension_numbers = #tpu.dot_dimension_numbers<[1], [0], [0], [1], [0, 0, 1, 1], [], []>} : vector<16x16xf32>, vector<16x16xf32>, vector<16x16xf32> -> vector<16x16xf32>
    %c1_218 = arith.constant 1 : index
    %c0_219 = arith.constant 0 : index
    %c0_220 = arith.constant 0 : index
    %187 = vector.load %arg11[%c1_218, %c0_219, %c0_220] : memref<3x16x16xf32, #tpu.memory_space<vmem>>, vector<1x16x16xf32>
    %188 = vector.shape_cast %187 : vector<1x16x16xf32> to vector<16x16xf32>
    %cst_221 = arith.constant dense<0.000000e+00> : vector<16x16xf32>
    %189 = tpu.matmul %188, %168, %cst_221 {dimension_numbers = #tpu.dot_dimension_numbers<[1], [0], [0], [1], [0, 0, 1, 1], [], []>} : vector<16x16xf32>, vector<16x16xf32>, vector<16x16xf32> -> vector<16x16xf32>
    %c1_222 = arith.constant 1 : index
    %c0_223 = arith.constant 0 : index
    %c0_224 = arith.constant 0 : index
    %c0_225 = arith.constant 0 : index
    %190 = vector.load %arg12[%c1_222, %c0_223, %c0_224, %c0_225] : memref<3x2x16x16xf32, #tpu.memory_space<vmem>>, vector<1x1x16x16xf32>
    %191 = vector.shape_cast %190 : vector<1x1x16x16xf32> to vector<16x16xf32>
    %cst_226 = arith.constant dense<0.000000e+00> : vector<16x16xf32>
    %192 = tpu.matmul %186, %191, %cst_226 {dimension_numbers = #tpu.dot_dimension_numbers<[1], [0], [0], [1], [0, 0, 1, 1], [], []>} : vector<16x16xf32>, vector<16x16xf32>, vector<16x16xf32> -> vector<16x16xf32>
    %193 = arith.addf %183, %192 : vector<16x16xf32>
    %c1_227 = arith.constant 1 : index
    %c1_228 = arith.constant 1 : index
    %c0_229 = arith.constant 0 : index
    %c0_230 = arith.constant 0 : index
    %194 = vector.load %arg12[%c1_227, %c1_228, %c0_229, %c0_230] : memref<3x2x16x16xf32, #tpu.memory_space<vmem>>, vector<1x1x16x16xf32>
    %195 = vector.shape_cast %194 : vector<1x1x16x16xf32> to vector<16x16xf32>
    %cst_231 = arith.constant dense<0.000000e+00> : vector<16x16xf32>
    %196 = tpu.matmul %189, %195, %cst_231 {dimension_numbers = #tpu.dot_dimension_numbers<[1], [0], [0], [1], [0, 0, 1, 1], [], []>} : vector<16x16xf32>, vector<16x16xf32>, vector<16x16xf32> -> vector<16x16xf32>
    %197 = arith.addf %193, %196 : vector<16x16xf32>
    %c2_232 = arith.constant 2 : index
    %c0_233 = arith.constant 0 : index
    %c0_234 = arith.constant 0 : index
    %198 = vector.load %arg11[%c2_232, %c0_233, %c0_234] : memref<3x16x16xf32, #tpu.memory_space<vmem>>, vector<1x16x16xf32>
    %199 = vector.shape_cast %198 : vector<1x16x16xf32> to vector<16x16xf32>
    %cst_235 = arith.constant dense<0.000000e+00> : vector<16x16xf32>
    %200 = tpu.matmul %199, %167, %cst_235 {dimension_numbers = #tpu.dot_dimension_numbers<[1], [0], [0], [1], [0, 0, 1, 1], [], []>} : vector<16x16xf32>, vector<16x16xf32>, vector<16x16xf32> -> vector<16x16xf32>
    %c2_236 = arith.constant 2 : index
    %c0_237 = arith.constant 0 : index
    %c0_238 = arith.constant 0 : index
    %201 = vector.load %arg11[%c2_236, %c0_237, %c0_238] : memref<3x16x16xf32, #tpu.memory_space<vmem>>, vector<1x16x16xf32>
    %202 = vector.shape_cast %201 : vector<1x16x16xf32> to vector<16x16xf32>
    %cst_239 = arith.constant dense<0.000000e+00> : vector<16x16xf32>
    %203 = tpu.matmul %202, %168, %cst_239 {dimension_numbers = #tpu.dot_dimension_numbers<[1], [0], [0], [1], [0, 0, 1, 1], [], []>} : vector<16x16xf32>, vector<16x16xf32>, vector<16x16xf32> -> vector<16x16xf32>
    %c2_240 = arith.constant 2 : index
    %c0_241 = arith.constant 0 : index
    %c0_242 = arith.constant 0 : index
    %c0_243 = arith.constant 0 : index
    %204 = vector.load %arg12[%c2_240, %c0_241, %c0_242, %c0_243] : memref<3x2x16x16xf32, #tpu.memory_space<vmem>>, vector<1x1x16x16xf32>
    %205 = vector.shape_cast %204 : vector<1x1x16x16xf32> to vector<16x16xf32>
    %cst_244 = arith.constant dense<0.000000e+00> : vector<16x16xf32>
    %206 = tpu.matmul %200, %205, %cst_244 {dimension_numbers = #tpu.dot_dimension_numbers<[1], [0], [0], [1], [0, 0, 1, 1], [], []>} : vector<16x16xf32>, vector<16x16xf32>, vector<16x16xf32> -> vector<16x16xf32>
    %207 = arith.addf %197, %206 : vector<16x16xf32>
    %c2_245 = arith.constant 2 : index
    %c1_246 = arith.constant 1 : index
    %c0_247 = arith.constant 0 : index
    %c0_248 = arith.constant 0 : index
    %208 = vector.load %arg12[%c2_245, %c1_246, %c0_247, %c0_248] : memref<3x2x16x16xf32, #tpu.memory_space<vmem>>, vector<1x1x16x16xf32>
    %209 = vector.shape_cast %208 : vector<1x1x16x16xf32> to vector<16x16xf32>
    %cst_249 = arith.constant dense<0.000000e+00> : vector<16x16xf32>
    %210 = tpu.matmul %203, %209, %cst_249 {dimension_numbers = #tpu.dot_dimension_numbers<[1], [0], [0], [1], [0, 0, 1, 1], [], []>} : vector<16x16xf32>, vector<16x16xf32>, vector<16x16xf32> -> vector<16x16xf32>
    %211 = arith.addf %207, %210 : vector<16x16xf32>
    %cst_250 = arith.constant 0.000000e+00 : f32
    %212 = vector.broadcast %cst_250 : f32 to vector<16x16xf32>
    %213 = arith.subf %212, %211 : vector<16x16xf32>
    %214 = math.exp %213 : vector<16x16xf32>
    %cst_251 = arith.constant 1.000000e+00 : f32
    %215 = vector.broadcast %cst_251 : f32 to vector<16x16xf32>
    %216 = arith.addf %215, %214 : vector<16x16xf32>
    %217 = tpu.reciprocal %216 {approx = true} : vector<16x16xf32> -> vector<16x16xf32>
    %218 = vector.shape_cast %217 : vector<16x16xf32> to vector<16x16x1xf32>
    %219 = vector.broadcast %218 : vector<16x16x1xf32> to vector<16x16x32xf32>
    %220 = arith.mulf %164, %219 : vector<16x16x32xf32>
    %221 = vector.shape_cast %1 : vector<16x16x16xf32> to vector<256x16xf32>
    %c0_252 = arith.constant 0 : index
    %c0_253 = arith.constant 0 : index
    %222 = vector.load %arg13[%c0_252, %c0_253] : memref<16x32xf32, #tpu.memory_space<vmem>>, vector<16x32xf32>
    %cst_254 = arith.constant dense<0.000000e+00> : vector<256x32xf32>
    %223 = tpu.matmul %221, %222, %cst_254 {dimension_numbers = #tpu.dot_dimension_numbers<[1], [0], [0], [1], [0, 0, 1, 1], [], []>} : vector<256x16xf32>, vector<16x32xf32>, vector<256x32xf32> -> vector<256x32xf32>
    %c0_255 = arith.constant 0 : index
    %c0_256 = arith.constant 0 : index
    %224 = vector.load %arg14[%c0_255, %c0_256] : memref<1x32xf32, #tpu.memory_space<vmem>>, vector<1x32xf32>
    %225 = vector.broadcast %224 : vector<1x32xf32> to vector<256x32xf32>
    %226 = arith.addf %223, %225 : vector<256x32xf32>
    %227 = vector.shape_cast %226 : vector<256x32xf32> to vector<16x16x32xf32>
    %228 = arith.addf %227, %220 : vector<16x16x32xf32>
    %c0_257 = arith.constant 0 : index
    %c0_258 = arith.constant 0 : index
    %c0_259 = arith.constant 0 : index
    %c0_260 = arith.constant 0 : index
    %229 = vector.load %arg15[%c0_257, %c0_258, %c0_259, %c0_260] : memref<1x16x16x32xf32, #tpu.memory_space<vmem>>, vector<1x16x16x32xf32>
    %230 = vector.shape_cast %229 : vector<1x16x16x32xf32> to vector<16x16x32xf32>
    %231 = vector.shape_cast %228 : vector<16x16x32xf32> to vector<1x16x16x32xf32>
    tpu.vector_store %arg15[%c0_257, %c0_258, %c0_259, %c0_260], %231 {strides = array<i32>} : memref<1x16x16x32xf32, #tpu.memory_space<vmem>>, vector<1x16x16x32xf32>,
    return
  }
  func.func @transform_0(%arg0: i32) -> (i32, i32, i32, i32) {
    %c0_i32 = arith.constant 0 : i32
    %c0_i32_0 = arith.constant 0 : i32
    %c0_i32_1 = arith.constant 0 : i32
    %c0_i32_2 = arith.constant 0 : i32
    return %arg0, %c0_i32, %c0_i32_0, %c0_i32_1 : i32, i32, i32, i32
  }
  func.func @transform_1(%arg0: i32) -> (i32, i32, i32) {
    %c0_i32 = arith.constant 0 : i32
    %c0_i32_0 = arith.constant 0 : i32
    %c0_i32_1 = arith.constant 0 : i32
    %c0_i32_2 = arith.constant 0 : i32
    return %c0_i32, %c0_i32_0, %c0_i32_1 : i32, i32, i32
  }
  func.func @transform_2(%arg0: i32) -> (i32, i32, i32) {
    %c0_i32 = arith.constant 0 : i32
    %c0_i32_0 = arith.constant 0 : i32
    %c0_i32_1 = arith.constant 0 : i32
    %c0_i32_2 = arith.constant 0 : i32
    return %c0_i32, %c0_i32_0, %c0_i32_1 : i32, i32, i32
  }
  func.func @transform_3(%arg0: i32) -> (i32, i32, i32, i32) {
    %c0_i32 = arith.constant 0 : i32
    %c0_i32_0 = arith.constant 0 : i32
    %c0_i32_1 = arith.constant 0 : i32
    %c0_i32_2 = arith.constant 0 : i32
    %c0_i32_3 = arith.constant 0 : i32
    return %c0_i32, %c0_i32_0, %c0_i32_1, %c0_i32_2 : i32, i32, i32, i32
  }
  func.func @transform_4(%arg0: i32) -> (i32, i32) {
    %c0_i32 = arith.constant 0 : i32
    %c0_i32_0 = arith.constant 0 : i32
    %c0_i32_1 = arith.constant 0 : i32
    return %c0_i32, %c0_i32_0 : i32, i32
  }
  func.func @transform_5(%arg0: i32) -> (i32, i32) {
    %c0_i32 = arith.constant 0 : i32
    %c0_i32_0 = arith.constant 0 : i32
    %c0_i32_1 = arith.constant 0 : i32
    return %c0_i32, %c0_i32_0 : i32, i32
  }
  func.func @transform_6(%arg0: i32) -> (i32, i32, i32, i32) {
    %c0_i32 = arith.constant 0 : i32
    %c0_i32_0 = arith.constant 0 : i32
    %c0_i32_1 = arith.constant 0 : i32
    %c0_i32_2 = arith.constant 0 : i32
    %c0_i32_3 = arith.constant 0 : i32
    return %c0_i32, %c0_i32_0, %c0_i32_1, %c0_i32_2 : i32, i32, i32, i32
  }
  func.func @transform_7(%arg0: i32) -> (i32, i32) {
    %c0_i32 = arith.constant 0 : i32
    %c0_i32_0 = arith.constant 0 : i32
    %c0_i32_1 = arith.constant 0 : i32
    return %c0_i32, %c0_i32_0 : i32, i32
  }
  func.func @transform_8(%arg0: i32) -> (i32, i32) {
    %c0_i32 = arith.constant 0 : i32
    %c0_i32_0 = arith.constant 0 : i32
    %c0_i32_1 = arith.constant 0 : i32
    return %c0_i32, %c0_i32_0 : i32, i32
  }
  func.func @transform_9(%arg0: i32) -> (i32, i32) {
    %c0_i32 = arith.constant 0 : i32
    %c0_i32_0 = arith.constant 0 : i32
    %c0_i32_1 = arith.constant 0 : i32
    return %c0_i32, %c0_i32_0 : i32, i32
  }
  func.func @transform_10(%arg0: i32) -> (i32, i32, i32) {
    %c0_i32 = arith.constant 0 : i32
    %c0_i32_0 = arith.constant 0 : i32
    %c0_i32_1 = arith.constant 0 : i32
    %c0_i32_2 = arith.constant 0 : i32
    return %c0_i32, %c0_i32_0, %c0_i32_1 : i32, i32, i32
  }
  func.func @transform_11(%arg0: i32) -> (i32, i32, i32, i32) {
    %c0_i32 = arith.constant 0 : i32
    %c0_i32_0 = arith.constant 0 : i32
    %c0_i32_1 = arith.constant 0 : i32
    %c0_i32_2 = arith.constant 0 : i32
    %c0_i32_3 = arith.constant 0 : i32
    return %c0_i32, %c0_i32_0, %c0_i32_1, %c0_i32_2 : i32, i32, i32, i32
  }
  func.func @transform_12(%arg0: i32) -> (i32, i32) {
    %c0_i32 = arith.constant 0 : i32
    %c0_i32_0 = arith.constant 0 : i32
    %c0_i32_1 = arith.constant 0 : i32
    return %c0_i32, %c0_i32_0 : i32, i32
  }
  func.func @transform_13(%arg0: i32) -> (i32, i32) {
    %c0_i32 = arith.constant 0 : i32
    %c0_i32_0 = arith.constant 0 : i32
    %c0_i32_1 = arith.constant 0 : i32
    return %c0_i32, %c0_i32_0 : i32, i32
  }
  func.func @transform_14(%arg0: i32) -> (i32, i32, i32, i32) {
    %c0_i32 = arith.constant 0 : i32
    %c0_i32_0 = arith.constant 0 : i32
    %c0_i32_1 = arith.constant 0 : i32
    %c0_i32_2 = arith.constant 0 : i32
    return %arg0, %c0_i32, %c0_i32_0, %c0_i32_1 : i32, i32, i32, i32
  }
}

</mosaic_0001>

<bundles_post_ra>
// kernel: tpu_custom_call.1
= control target key start
LH: loop header
LB: loop body
LE: loop exit
PB: predicated region body
PF: predicated region fallthrough
CT: control target
= control target key end

     0   :  { %s17697_s0 = inlined_call_operand.hbm [shape: f32[2,16,16,16], index: 0, kind: input, shape index: {}]   ;;  %s17698_s1 = inlined_call_operand.vmem [shape: f32[1,1,16], index: 1, kind: input, shape index: {}]   ;;  %s17699_s2 = inlined_call_operand.vmem [shape: f32[1,1,16], index: 2, kind: input, shape index: {}]   ;;  %s17700_s3 = inlined_call_operand.hbm [shape: f32[3,3,16,32], index: 3, kind: input, shape index: {}]   ;;  %s17701_s4 = inlined_call_operand.vmem [shape: f32[1,32], index: 4, kind: input, shape index: {}]   ;;  %s17702_s5 = inlined_call_operand.vmem [shape: f32[1,32], index: 5, kind: input, shape index: {}]   ;;  %s17703_s6 = inlined_call_operand.hbm [shape: f32[3,3,32,32], index: 6, kind: input, shape index: {}]   ;;  %s17704_s7 = inlined_call_operand.vmem [shape: f32[1,32], index: 7, kind: input, shape index: {}]   ;;  %s17705_s8 = inlined_call_operand.vmem [shape: f32[32,2], index: 8, kind: input, shape index: {}]   ;;  %s17706_s9 = inlined_call_operand.vmem [shape: f32[2,32], index: 9, kind: input, shape index: {}]   ;;  %s17707_s10 = inlined_call_operand.vmem [shape: f32[3,16,16], index: 10, kind: input, shape index: {}]   ;;  %s17708_s11 = inlined_call_operand.hbm [shape: f32[3,2,16,16], index: 11, kind: input, shape index: {}]   ;;  %s17709_s12 = inlined_call_operand.vmem [shape: f32[16,32], index: 12, kind: input, shape index: {}]   ;;  %s17710_s13 = inlined_call_operand.vmem [shape: f32[1,32], index: 13, kind: input, shape index: {}]   ;;  %s17711_s14 = inlined_call_operand.hbm [shape: f32[2,16,16,32], index: 14, kind: output, shape index: {}]  }
   0x1   :  { %17863 = sst [smem:[#allocation53_spill]] %s17704_s7 }
   0x2   :  { %17864 = sst [smem:[#allocation54_spill]] %s17706_s9 }
   0x3   :  { %17865 = sst [smem:[#allocation55_spill]] %s17707_s10 }
   0x4   :  { %17866 = sst [smem:[#allocation56_spill]] %s17709_s12 }
   0x5   :  { %17867 = sst [smem:[#allocation57_spill]] %s17710_s13 }
   0x6   :  { %17868 = sst [smem:[#allocation58_spill]] %s17711_s14 }
   0x7   :  { %19 = vsyncpa [#allocation5], 0 }
   0x8   :  { %21 = vsyncpa [#allocation5 + $0x1], 0 }
   0x9   :  { %22 = vsyncpa [#allocation8], 0 }
   0xa   :  { %23 = vsyncpa [#allocation11], 0 }
   0xb   :  { %24 = vsyncpa [#allocation6], 0 }
   0xc   :  { %26 = vsyncpa [#allocation6 + $0x1], 0  ;;  %s14332_s29 = smov 0   ;;  %s14334_s30 = smov 0  }
   0xd   :  { %s14336_s15 = smov 0   ;;  %s14338_s16 = smov 0  }
   0xe LB: > { %17869 = sst [smem:[#allocation17_spill]] %s14231_s29  ;;  %s14353_s17 = sadd.s32 4294967295, %s14243_s16   ;;  %s14243_s16 = sphi %s14338_s16, %s18093_s16   ;;  %s14239_s15 = sphi %s14336_s15, %s18092_s15   ;;  %s14235_s30 = sphi %s14334_s30, %s18091_s30   ;;  %s14231_s29 = sphi %s14332_s29, %s18090_s29  }
   0xf   : > { %s10693_s18 = sadd.s32 4294967294, %s14243_s16   ;;  %p52_p0 = scmp.ne.s32.totalorder %s14235_s30, %s14231_s29 }
  0x10   : > { %p17715_p1 = scmp.eq.s32.totalorder %s14353_s17, 0  ;;  %p355_p3 = scmp.eq.s32.totalorder %s10693_s18, 1 }
  0x11   : > { %p10694_p5 = scmp.ge.s32.totalorder %s14243_s16, 1  ;;  %p362_p7 = scmp.lt.s32.totalorder %s14243_s16, 3 }
  0x12   : > { %p14362_p4 = por %p17715_p1, %p52_p0  ;;  %p14367_p6 = por %p355_p3, %p52_p0 }
  0x13   : > { %p14372_p8 = pnand %p10694_p5, %p362_p7  ;;  %s14245_s22 = smov [#allocation7]  }
  0x14   : > { %s17870_s19 = scalar_select %p14362_p4, 1, 0 }
  0x15   : > { %s17871_s20 = scalar_select %p14367_p6, 1, 0 }
  0x16   : > { %s17873_s21 = scalar_select %p14372_p8, 1, 0 }
  0x17   : > { %17872 = sst [smem:[#allocation18_spill]] %s17871_s20  ;;  %s380_s23 = sshll.u32 %s14245_s22, 4  ;;  %s14376_s23 = int_to_ptr.vmem [resolvable:$true] %s380_s23 }
  0x18   : > { %p13943_p9 = pneg %p14372_p8  ;;  %s14246_s25 = smov [#allocation9]  }
  0x19   : > { %s399_s26 = sshll.u32 %s14246_s25, 4  ;;  %s14247_s27 = smov [#allocation10]   ;;  %s14387_s26 = int_to_ptr.vmem [resolvable:$true] %s399_s26 }
  0x1a   : > { %p14383_p11 = pnand %p13943_p9, %p17715_p1  ;;  %s14389_s28 = sshll.u32 %s14247_s27, 4  ;;  %s425_s28 = int_to_ptr.vmem [resolvable:$true] %s14389_s28 }
  0x1b   : > { %s14055_s20 = scalar_lea.hbm %s17700_s3, 2304 }
  0x1c   : > { %p14056_p12 = scmp.ne.s32.totalorder %s17700_s3, %s14055_s20  ;;  %p14399_p13 = pneg %p14383_p11 }
  0x1d   : > { %p14062_p5 = scmp.lt.u32.totalorder %s14055_s20, %s17700_s3 }
  0x1e   : > { %p14058_p0 = pnand %p14399_p13, %p14056_p12 }
  0x20   : > { %p14059_p3 = pneg %p14058_p0 }
  0x22   : > { %p14064_p7 = pnand %p14062_p5, %p14059_p3 }
  0x24   : > { %14067 = shalt.err (!%p14064_p7)
}
  0x25   : > { %s14068_s14 = scalar_lea.vmem %s14376_s23, 2304  ;;  %p14076_p2 = scmp.lt.s32.totalorder %s14376_s23, %s14376_s23 }
  0x26   : > { %p14069_p9 = scmp.ne.s32.totalorder %s14376_s23, %s14068_s14  ;;  %p14077_p6 = scmp.lt.s32.totalorder %s14068_s14, %s14068_s14 }
  0x28   : > { %p14071_p10 = pnand %p14069_p9, %p14399_p13  ;;  %p14078_p12 = por %p14077_p6, %p14076_p2 }
  0x2a   : > { %p14072_p1 = pneg %p14071_p10 }
  0x2c   : > { %p14079_p0 = pnand %p14078_p12, %p14072_p1 }
  0x2e   : > { %14082 = shalt.err (!%p14079_p0)
}
  0x2f   : > { %s14248_s29 = smov 128   ;;  %s14249_s20 = smov 8  }
  0x30   : > { %13946 = dma.hbm_to_vmem [thread:$0]  (!%p14383_p11), %s17700_s3, 2304, %s14376_s23, [#allocation8], %s14248_s29, %s14248_s29, %s14249_s20  }
  0x31   : > { %s14083_s14 = scalar_lea.hbm %s17703_s6, 4608 }
  0x32   : > { %p14084_p1 = scmp.ne.s32.totalorder %s17703_s6, %s14083_s14  ;;  %p14090_p10 = scmp.lt.u32.totalorder %s14083_s14, %s17703_s6 }
  0x34   : > { %p14086_p2 = pnand %p14084_p1, %p14399_p13 }
  0x36   : > { %p14087_p6 = pneg %p14086_p2 }
  0x38   : > { %p14092_p3 = pnand %p14090_p10, %p14087_p6 }
  0x3a   : > { %14095 = shalt.err (!%p14092_p3)
}
  0x3b   : > { %s14096_s23 = scalar_lea.vmem %s14387_s26, 4608  ;;  %p14104_p12 = scmp.lt.s32.totalorder %s14387_s26, %s14387_s26 }
  0x3c   : > { %p14097_p5 = scmp.ne.s32.totalorder %s14387_s26, %s14096_s23  ;;  %p14105_p0 = scmp.lt.s32.totalorder %s14096_s23, %s14096_s23 }
  0x3e   : > { %p14099_p7 = pnand %p14097_p5, %p14399_p13  ;;  %p14106_p1 = por %p14105_p0, %p14104_p12 }
  0x40   : > { %p14100_p9 = pneg %p14099_p7 }
  0x42   : > { %p14107_p2 = pnand %p14106_p1, %p14100_p9 }
  0x44   : > { %14110 = shalt.err (!%p14107_p2)
}
  0x45   : > { %13949 = dma.hbm_to_vmem [thread:$0]  (!%p14383_p11), %s17703_s6, 4608, %s14387_s26, [#allocation8], %s14248_s29, %s14248_s29, %s14249_s20  }
  0x46   : > { %s14111_s18 = scalar_lea.hbm %s17708_s11, 1536 }
  0x47   : > { %p14112_p6 = scmp.ne.s32.totalorder %s17708_s11, %s14111_s18  ;;  %p14118_p5 = scmp.lt.u32.totalorder %s14111_s18, %s17708_s11 }
  0x49   : > { %p14114_p10 = pnand %p14112_p6, %p14399_p13 }
  0x4b   : > { %p14115_p3 = pneg %p14114_p10 }
  0x4d   : > { %p14120_p7 = pnand %p14118_p5, %p14115_p3 }
  0x4f   : > { %14123 = shalt.err (!%p14120_p7)
}
  0x50   : > { %s14124_s23 = scalar_lea.vmem %s425_s28, 1536  ;;  %p14132_p1 = scmp.lt.s32.totalorder %s425_s28, %s425_s28 }
  0x51   : > { %p14125_p9 = scmp.ne.s32.totalorder %s425_s28, %s14124_s23  ;;  %p14133_p2 = scmp.lt.s32.totalorder %s14124_s23, %s14124_s23 }
  0x53   : > { %p14127_p12 = pnand %p14125_p9, %p14399_p13  ;;  %p14134_p4 = por %p14133_p2, %p14132_p1 }
  0x55   : > { %p14128_p0 = pneg %p14127_p12 }
  0x57   : > { %p14135_p8 = pnand %p14134_p4, %p14128_p0 }
  0x59   : > { %14138 = shalt.err (!%p14135_p8)
}
  0x5a   : > { %13952 = dma.hbm_to_vmem [thread:$0]  (!%p14383_p11), %s17708_s11, 1536, %s425_s28, [#allocation11], %s14248_s29, %s14248_s29, %s14249_s20  }
  0x5b   : > { %s14472_s13 = sadd.s32 1, %s14243_s16   ;;  %s39_s9 = sadd.s32 1, %s14239_s15 }
  0x5c   : > { %s36_s24 = ssub.s32 %s14243_s16, %s14472_s13  ;;  %p46_p8 = scmp.ne.s32.totalorder %s14239_s15, %s14235_s30 }
  0x5d   : > { %p37_p4 = scmp.eq.s32.totalorder %s36_s24, 0  ;;  %p47_p13 = scmp.eq.s32.totalorder %s14243_s16, 0 }
  0x5e   : > { %p13964_p6 = scmp.lt.s32.totalorder %s14243_s16, 2  ;;  %p17876_p3 = scmp.eq.s32.totalorder %s14353_s17, 1 }
  0x5f   : > { %s14482_s10 = scalar_select %p37_p4, %s14239_s15, %s39_s9  }
  0x60   : > { %p48_p10 = por %p47_p13, %p46_p8  ;;  %p14486_p5 = por %p17876_p3, %p46_p8 }
  0x61   : > { %s444_s18 = sand.u32 1, %s14239_s15   ;;  %s11361_s22 = sshll.u32 %s14243_s16, 12 }
  0x62   : > { %s10699_s28 = sshll.u32 %s444_s18, 8  ;;  %s14495_s14 = scalar_lea.hbm %s17697_s0, %s11361_s22 }
  0x63   : > { %s448_s23 = scalar_lea.vmem [#allocation4], %s10699_s28  ;;  %p14497_p11 = pnand %p13964_p6, %p48_p10 }
  0x64   : > { %s455_s26 = sshll.u32 %s448_s23, 4  ;;  %s14503_s24 = scalar_lea.sflag [#allocation5], %s444_s18  ;;  %s14501_s26 = int_to_ptr.vmem [resolvable:$true] %s455_s26 }
  0x65   : > { %s14139_s9 = scalar_lea.hbm %s14495_s14, 4096  ;;  %p14141_p9 = pneg %p14497_p11 }
  0x66   : > { %p14140_p7 = scmp.ne.s32.totalorder %s14495_s14, %s14139_s9  ;;  %s14144_s25 = scalar_lea.hbm %s17697_s0, 8192 }
  0x67   : > { %p14145_p1 = scmp.lt.u32.totalorder %s14495_s14, %s17697_s0  ;;  %p14146_p2 = scmp.lt.u32.totalorder %s14144_s25, %s14139_s9 }
  0x68   : > { %p14142_p12 = pnand %p14141_p9, %p14140_p7  ;;  %p14148_p8 = scmp.lt.u32.totalorder %s14139_s9, %s14495_s14 }
  0x69   : > { %p14147_p4 = por %p14146_p2, %p14145_p1 }
  0x6a   : > { %p14143_p0 = pneg %p14142_p12 }
  0x6b   : > { %p14149_p13 = por %p14148_p8, %p14147_p4 }
  0x6d   : > { %p14150_p6 = pnand %p14149_p13, %p14143_p0 }
  0x6f   : > { %14153 = shalt.err (!%p14150_p6)
}
  0x70   : > { %s14154_s18 = scalar_lea.vmem %s14501_s26, 4096  ;;  %s14250_s22 = smov [#allocation4]  }
  0x71   : > { %p14155_p10 = scmp.ne.s32.totalorder %s14501_s26, %s14154_s18  ;;  %s14159_s28 = sshll.u32 %s14250_s22, 4  ;;  %s14160_s28 = int_to_ptr.vmem [resolvable:$false] %s14159_s28 }
  0x72   : > { %s14161_s27 = scalar_lea.vmem %s14160_s28, 8192  ;;  %p14162_p12 = scmp.lt.s32.totalorder %s14501_s26, %s14160_s28 }
  0x73   : > { %p14157_p3 = pnand %p14155_p10, %p14141_p9  ;;  %p14163_p1 = scmp.lt.s32.totalorder %s14161_s27, %s14154_s18 }
  0x75   : > { %p14158_p7 = pneg %p14157_p3  ;;  %p14164_p2 = por %p14163_p1, %p14162_p12 }
  0x77   : > { %p14165_p4 = pnand %p14164_p2, %p14158_p7 }
  0x79   : > { %14168 = shalt.err (!%p14165_p4)
}
  0x7a   : > { %13956 = dma.hbm_to_vmem [thread:$0]  (!%p14497_p11), %s14495_s14, 4096, %s14501_s26, %s14503_s24, %s14248_s29, %s14248_s29, %s14249_s20  }
  0x7b   : > { %p17879_p9 = scmp.ne.s32.totalorder %s17873_s21, 0 }
  0x7d   : > { %467 = sbr.rel (%p17879_p9) target bundleno = 3118 (0xc2e), region = 76 }
  0x84   : > { %s14537_s9 = sand.u32 1, %s14235_s30   ;;  %p17880_p0 = scmp.ne.s32.totalorder %s17870_s19, 0 }
  0x85   : > { %s10703_s25 = sshll.u32 %s14537_s9, 8  ;;  %s470_s23 = scalar_lea.sflag [#allocation5], %s14537_s9 }
  0x86   : > { %s14543_s7 = scalar_lea.vmem [#allocation4], %s10703_s25 }
  0x87   : > { %14214 = dma.done.wait (%p17880_p0), %s470_s23, 4096  }
  0x88   : > { %14216 = vsyncadd (%p17880_p0), %s470_s23, 4294963200  ;;  %p17881_p11 = scmp.eq.s32.totalorder %s14353_s17, 0 }
  0x8a   : > { %14218 = dma.done.wait (%p17881_p11), [#allocation8], 6912   ;;  %p17882_p8 = pmov %p17881_p11 }
  0x8c   : > { %14220 = vsyncadd (%p17882_p8), [#allocation8], 4294960384  ;;  %p17883_p13 = pmov %p17882_p8 }
  0x8d   : > { %p17884_p6 = pmov %p17882_p8 }
  0x8e   : > { %14222 = dma.done.wait (%p17883_p13), [#allocation11], 1536  }
  0x8f   : > { %14224 = vsyncadd (%p17884_p6), [#allocation11], 4294965760  ;;  %vm640_vm0 = vcmask 130048   ;;  %vm643_vm1 = vcmask 123904   ;;  %v17720_v0 = vmov 0.0   ;;  %v796_v1 = vld [vmem:[#allocation7 + $0x10] sm:$0xff] }
  0x90   : > { %641 = vst.msk [vmem:[#allocation2] sm:$0xff] %vm640_vm0, %v17720_v0  ;;  %642 = vst.msk [vmem:[#allocation2 + $0x8] sm:$0xff] %vm640_vm0, %v17720_v0  ;;  %v797_v2 = vld [vmem:[#allocation7 + $0x18] sm:$0xff]  ;;  %v761_v3 = vld [vmem:[#allocation7] sm:$0xff]  ;;  %vm4299_vm2 = vcmask 261120   ;;  %vm4302_vm3 = vcmask 254976  }
  0x91   : > { %645 = vst.msk [vmem:[#allocation2 + $0x18] sm:$0xff] %vm640_vm0, %v17720_v0  ;;  %646 = vst.msk [vmem:[#allocation2 + $0x20] sm:$0xff] %vm640_vm0, %v17720_v0  ;;  %v13229_v4 = vpack.c.bf16 %v797_v2, %v796_v1  ;;  %v762_v6 = vld [vmem:[#allocation7 + $0x8] sm:$0xff]  ;;  %v530_v9 = vld [vmem:[%s14543_s7] sm:$0xff]  ;;  %s18047_s24 = sld [smem:[#allocation53_spill]]  ;;  %s18048_s28 = sld [smem:[#allocation54_spill]] }
  0x92   : > { %648 = vst.msk [vmem:[#allocation2 + $0x30] sm:$0xff] %vm640_vm0, %v17720_v0  ;;  %649 = vst.msk [vmem:[#allocation2 + $0x38] sm:$0xff] %vm640_vm0, %v17720_v0  ;;  %v13233_v8 = vpack.c.bf16 %v762_v6, %v761_v3  ;;  %v14670_v10 = vld [vmem:[%s17698_s1] ss:$0 sm:$0xff]  ;;  %v531_v13 = vld [vmem:[%s14543_s7 + $0x8] sm:$0xff]  ;;  %s18062_s19 = sld [smem:[#allocation55_spill]] }
  0x93   : > { %651 = vst.msk [vmem:[#allocation2 + $0x48] sm:$0xff] %vm640_vm0, %v17720_v0  ;;  %652 = vst.msk [vmem:[#allocation2 + $0x50] sm:$0xff] %vm640_vm0, %v17720_v0  ;;  %v14675_v11 = vld [vmem:[%s17699_s2] ss:$0 sm:$0xff]  ;;  %13230 = vmatprep.subr.bf16.mxu0 %v13229_v4  ;;  %v569_v12 = vmul.f32 %v14670_v10, %v530_v9  ;;  %v532_v14 = vld [vmem:[%s14543_s7 + $0x10] sm:$0xff]  ;;  %13401 = vmatprep.subr.bf16.mxu1 %v13229_v4  ;;  %v570_v16 = vmul.f32 %v14670_v10, %v531_v13  ;;  %s18063_s29 = sld [smem:[#allocation56_spill]] }
  0x94   : > { %654 = vst.msk [vmem:[#allocation2 + $0x60] sm:$0xff] %vm640_vm0, %v17720_v0  ;;  %655 = vst.msk [vmem:[#allocation2 + $0x68] sm:$0xff] %vm640_vm0, %v17720_v0  ;;  %v533_v15 = vld [vmem:[%s14543_s7 + $0x18] sm:$0xff]  ;;  %13232 = vmatpush3.bf16.msra.mxu0 %v13229_v4  ;;  %v571_v17 = vmul.f32 %v14670_v10, %v532_v14  ;;  %v534_v19 = vld [vmem:[%s14543_s7 + $0x20] sm:$0xff]  ;;  %13402 = vmatpush3.bf16.msra.mxu1 %v13229_v4  ;;  %s18068_s18 = sld [smem:[#allocation57_spill]]  ;;  %s17495_s22 = scalar_lea.vmem [#allocation12], %s10703_s25 }
  0x95   : > { %657 = vst.msk [vmem:[#allocation2 + $0x78] sm:$0xff] %vm640_vm0, %v17720_v0  ;;  %658 = vst.msk [vmem:[#allocation2 + $0x80] sm:$0xff] %vm640_vm0, %v17720_v0  ;;  %v572_v18 = vmul.f32 %v14670_v10, %v533_v15  ;;  %v535_v20 = vld [vmem:[%s14543_s7 + $0x28] sm:$0xff]  ;;  %v536_v21 = vld [vmem:[%s14543_s7 + $0x30] sm:$0xff]  ;;  %13234 = vmatprep.subr.bf16.mxu0 %v13233_v8  ;;  %v608_v22 = vadd.f32 %v14675_v11, %v569_v12  ;;  %v573_v23 = vmul.f32 %v14670_v10, %v534_v19  ;;  %s11362_s25 = sshll.u32 %s14353_s17, 12  ;;  %s18085_s21 = sld [smem:[#allocation58_spill]] }
  0x96   : > { %660 = vst.msk [vmem:[#allocation2 + $0x90] sm:$0xff] %vm640_vm0, %v17720_v0  ;;  %661 = vst.msk [vmem:[#allocation2 + $0x98] sm:$0xff] %vm640_vm0, %v17720_v0  ;;  %v574_v24 = vmul.f32 %v14670_v10, %v535_v20  ;;  %v575_v25 = vmul.f32 %v14670_v10, %v536_v21  ;;  %v537_v26 = vld [vmem:[%s14543_s7 + $0x38] sm:$0xff]  ;;  %v538_v27 = vld [vmem:[%s14543_s7 + $0x40] sm:$0xff]  ;;  %v609_v29 = vadd.f32 %v14675_v11, %v570_v16  ;;  %s10578_s17 = scalar_lea.sflag [#allocation6], %s14537_s9  ;;  %s14254_s26 = smov [#allocation12]  }
  0x97   : > { %663 = vst.msk [vmem:[#allocation2 + $0xa8] sm:$0xff] %vm640_vm0, %v17720_v0  ;;  %664 = vst.msk [vmem:[#allocation2 + $0xb0] sm:$0xff] %vm640_vm0, %v17720_v0  ;;  %v763_v5 = vld [vmem:[#allocation2 + $0x1] sm:$0xff]  ;;  %v610_v30 = vadd.f32 %v14675_v11, %v571_v17  ;;  %v611_v31 = vadd.f32 %v14675_v11, %v572_v18  ;;  %v576_v32 = vmul.f32 %v14670_v10, %v537_v26  ;;  %v540_v33 = vld [vmem:[%s14543_s7 + $0x50] sm:$0xff] }
  0x98   : > { %666 = vst.msk [vmem:[#allocation2 + $0xc0] sm:$0xff] %vm640_vm0, %v17720_v0  ;;  %667 = vst.msk [vmem:[#allocation2 + $0xc8] sm:$0xff] %vm640_vm0, %v17720_v0  ;;  %12093 = vmatprep.mubr.msk.f32.mxu0 %vm640_vm0, %v763_v5  ;;  %v539_v28 = vld [vmem:[%s14543_s7 + $0x48] sm:$0xff]  ;;  %v541_v34 = vld [vmem:[%s14543_s7 + $0x58] sm:$0xff]  ;;  %v612_v36 = vadd.f32 %v14675_v11, %v573_v23  ;;  %v613_v37 = vadd.f32 %v14675_v11, %v574_v24  ;;  %v614_v38 = vadd.f32 %v14675_v11, %v575_v25 }
  0x99   : > { %669 = vst.msk [vmem:[#allocation2 + $0xd8] sm:$0xff] %vm640_vm0, %v17720_v0  ;;  %670 = vst.msk [vmem:[#allocation2 + $0xe0] sm:$0xff] %vm640_vm0, %v17720_v0  ;;  %v542_v35 = vld [vmem:[%s14543_s7 + $0x60] sm:$0xff]  ;;  %v577_v39 = vmul.f32 %v14670_v10, %v538_v27  ;;  %v543_v40 = vld [vmem:[%s14543_s7 + $0x68] sm:$0xff]  ;;  %v615_v41 = vadd.f32 %v14675_v11, %v576_v32  ;;  %v578_v42 = vmul.f32 %v14670_v10, %v539_v28  ;;  %s18064_s20 = smov %s18063_s29 }
  0x9a   : > { %672 = vst.msk [vmem:[#allocation2 + $0xf0] sm:$0xff] %vm640_vm0, %v17720_v0  ;;  %673 = vst.msk [vmem:[#allocation2 + $0xf8] sm:$0xff] %vm640_vm0, %v17720_v0  ;;  %v579_v43 = vmul.f32 %v14670_v10, %v540_v33  ;;  %v580_v44 = vmul.f32 %v14670_v10, %v541_v34  ;;  %v1473_v45 = vld [vmem:[#allocation7 + $0x20] sm:$0xff]  ;;  %v1474_v46 = vld [vmem:[#allocation7 + $0x28] sm:$0xff]  ;;  %v581_v49 = vmul.f32 %v14670_v10, %v542_v35 }
  0x9b   : > { %675 = vst.msk [vmem:[#allocation2 + $0x108] sm:$0xff] %vm640_vm0, %v17720_v0  ;;  %676 = vst.msk [vmem:[#allocation2 + $0x110] sm:$0xff] %vm640_vm0, %v17720_v0  ;;  %v544_v47 = vld [vmem:[%s14543_s7 + $0x70] sm:$0xff]  ;;  %v616_v48 = vadd.f32 %v14675_v11, %v577_v39  ;;  %v582_v50 = vmul.f32 %v14670_v10, %v543_v40  ;;  %v14722_v51 = vpack.c.bf16 %v1474_v46, %v1473_v45  ;;  %v545_v52 = vld [vmem:[%s14543_s7 + $0x78] sm:$0xff] }
  0x9c   : > { %678 = vst.msk [vmem:[#allocation2 + $0x120] sm:$0xff] %vm640_vm0, %v17720_v0  ;;  %679 = vst.msk [vmem:[#allocation2 + $0x128] sm:$0xff] %vm640_vm0, %v17720_v0  ;;  %v546_v53 = vld [vmem:[%s14543_s7 + $0x80] sm:$0xff]  ;;  %v547_v54 = vld [vmem:[%s14543_s7 + $0x88] sm:$0xff]  ;;  %v617_v55 = vadd.f32 %v14675_v11, %v578_v42  ;;  %v618_v56 = vadd.f32 %v14675_v11, %v579_v43  ;;  %v619_v57 = vadd.f32 %v14675_v11, %v580_v44 }
  0x9d   : > { %681 = vst.msk [vmem:[#allocation2 + $0x138] sm:$0xff] %vm640_vm0, %v17720_v0  ;;  %682 = vst.msk [vmem:[#allocation2 + $0x140] sm:$0xff] %vm640_vm0, %v17720_v0  ;;  %v583_v58 = vmul.f32 %v14670_v10, %v544_v47  ;;  %v548_v59 = vld [vmem:[%s14543_s7 + $0x90] sm:$0xff]  ;;  %v549_v60 = vld [vmem:[%s14543_s7 + $0x98] sm:$0xff]  ;;  %v620_v62 = vadd.f32 %v14675_v11, %v581_v49  ;;  %v621_v63 = vadd.f32 %v14675_v11, %v582_v50 }
  0x9e   : > { %684 = vst.msk [vmem:[#allocation2 + $0x150] sm:$0xff] %vm640_vm0, %v17720_v0  ;;  %685 = vst.msk [vmem:[#allocation2 + $0x158] sm:$0xff] %vm640_vm0, %v17720_v0  ;;  %v550_v61 = vld [vmem:[%s14543_s7 + $0xa0] sm:$0xff]  ;;  %v584_v1 = vmul.f32 %v14670_v10, %v545_v52  ;;  %v585_v2 = vmul.f32 %v14670_v10, %v546_v53  ;;  %v551_v3 = vld [vmem:[%s14543_s7 + $0xa8] sm:$0xff]  ;;  %v586_v6 = vmul.f32 %v14670_v10, %v547_v54 }
  0x9f   : > { %687 = vst.msk [vmem:[#allocation2 + $0x168] sm:$0xff] %vm640_vm0, %v17720_v0  ;;  %688 = vst.msk [vmem:[#allocation2 + $0x170] sm:$0xff] %vm640_vm0, %v17720_v0  ;;  %v552_v4 = vld [vmem:[%s14543_s7 + $0xb0] sm:$0xff]  ;;  %v622_v5 = vadd.f32 %v14675_v11, %v583_v58  ;;  %v553_v9 = vld [vmem:[%s14543_s7 + $0xb8] sm:$0xff]  ;;  %v589_v15 = vmul.f32 %v14670_v10, %v550_v61  ;;  %v590_v16 = vmul.f32 %v14670_v10, %v551_v3 }
  0xa0   : > { %690 = vst.msk [vmem:[#allocation2 + $0x180] sm:$0xff] %vm640_vm0, %v17720_v0  ;;  %691 = vst.msk [vmem:[#allocation2 + $0x188] sm:$0xff] %vm640_vm0, %v17720_v0  ;;  %v554_v12 = vld [vmem:[%s14543_s7 + $0xc0] sm:$0xff]  ;;  %v623_v13 = vadd.f32 %v14675_v11, %v584_v1  ;;  %v624_v14 = vadd.f32 %v14675_v11, %v585_v2  ;;  %v555_v17 = vld [vmem:[%s14543_s7 + $0xc8] sm:$0xff]  ;;  %v625_v21 = vadd.f32 %v14675_v11, %v586_v6 }
  0xa1   : > { %693 = vst.msk [vmem:[#allocation2 + $0x198] sm:$0xff] %vm640_vm0, %v17720_v0  ;;  %694 = vst.msk [vmem:[#allocation2 + $0x1a0] sm:$0xff] %vm640_vm0, %v17720_v0  ;;  %v556_v18 = vld [vmem:[%s14543_s7 + $0xd0] sm:$0xff]  ;;  %v557_v19 = vld [vmem:[%s14543_s7 + $0xd8] sm:$0xff]  ;;  %v591_v24 = vmul.f32 %v14670_v10, %v552_v4  ;;  %v593_v32 = vmul.f32 %v14670_v10, %v554_v12  ;;  %v594_v34 = vmul.f32 %v14670_v10, %v555_v17 }
  0xa2   : > { %644 = vst.msk [vmem:[#allocation2 + $0x10] sm:$0x3] %vm643_vm1, %v17720_v0  ;;  %647 = vst.msk [vmem:[#allocation2 + $0x28] sm:$0x3] %vm643_vm1, %v17720_v0  ;;  %v558_v25 = vld [vmem:[%s14543_s7 + $0xe0] sm:$0xff]  ;;  %v559_v26 = vld [vmem:[%s14543_s7 + $0xe8] sm:$0xff]  ;;  %v595_v35 = vmul.f32 %v14670_v10, %v556_v18 }
  0xa3   : > { %650 = vst.msk [vmem:[#allocation2 + $0x40] sm:$0x3] %vm643_vm1, %v17720_v0  ;;  %653 = vst.msk [vmem:[#allocation2 + $0x58] sm:$0x3] %vm643_vm1, %v17720_v0  ;;  %v630_v33 = vadd.f32 %v14675_v11, %v591_v24  ;;  %v632_v39 = vadd.f32 %v14675_v11, %v593_v32  ;;  %v597_v40 = vmul.f32 %v14670_v10, %v558_v25  ;;  %v729_v58 = vld [vmem:[#allocation2] sm:$0xff]  ;;  %v730_v61 = vld [vmem:[#allocation2 + $0x8] sm:$0xff] }
  0xa4   : > { %656 = vst.msk [vmem:[#allocation2 + $0x70] sm:$0x3] %vm643_vm1, %v17720_v0  ;;  %659 = vst.msk [vmem:[#allocation2 + $0x88] sm:$0x3] %vm643_vm1, %v17720_v0  ;;  %v633_v43 = vadd.f32 %v14675_v11, %v594_v34  ;;  %v634_v44 = vadd.f32 %v14675_v11, %v595_v35 }
  0xa5   : > { %662 = vst.msk [vmem:[#allocation2 + $0xa0] sm:$0x3] %vm643_vm1, %v17720_v0  ;;  %665 = vst.msk [vmem:[#allocation2 + $0xb8] sm:$0x3] %vm643_vm1, %v17720_v0  ;;  %v636_v46 = vadd.f32 %v14675_v11, %v597_v40  ;;  %v2249_v40 = vld [vmem:[#allocation7 + $0x40] sm:$0xff] }
  0xa6   : > { %668 = vst.msk [vmem:[#allocation2 + $0xd0] sm:$0x3] %vm643_vm1, %v17720_v0  ;;  %671 = vst.msk [vmem:[#allocation2 + $0xe8] sm:$0x3] %vm643_vm1, %v17720_v0 }
  0xa7   : > { %674 = vst.msk [vmem:[#allocation2 + $0x100] sm:$0x3] %vm643_vm1, %v17720_v0  ;;  %677 = vst.msk [vmem:[#allocation2 + $0x118] sm:$0x3] %vm643_vm1, %v17720_v0 }
  0xa8   : > { %680 = vst.msk [vmem:[#allocation2 + $0x130] sm:$0x3] %vm643_vm1, %v17720_v0  ;;  %683 = vst.msk [vmem:[#allocation2 + $0x148] sm:$0x3] %vm643_vm1, %v17720_v0 }
  0xa9   : > { %686 = vst.msk [vmem:[#allocation2 + $0x160] sm:$0x3] %vm643_vm1, %v17720_v0  ;;  %689 = vst.msk [vmem:[#allocation2 + $0x178] sm:$0x3] %vm643_vm1, %v17720_v0  ;;  %v764_v7 = vld [vmem:[#allocation2 + $0x9] sm:$0xff] }
  0xaa   : > { %692 = vst.msk [vmem:[#allocation2 + $0x190] sm:$0x3] %vm643_vm1, %v17720_v0  ;;  %695 = vst.msk [vmem:[#allocation2 + $0x1a8] sm:$0x3] %vm643_vm1, %v17720_v0  ;;  %12094 = vmatmul.mubr.msk.f32.vlgmr.msra.gmra.mrb[0].mxu0 %vm640_vm0, %v764_v7  ;;  %v587_v7 = vmul.f32 %v14670_v10, %v548_v59  ;;  %v1861_v59 = vld [vmem:[#allocation7 + $0x30] sm:$0xff] }
  0xab   : > { %697 = vst.msk [vmem:[#allocation2 + $0x19] sm:$0xff] %vm640_vm0, %v608_v22  ;;  %13236 = vmatpush3.bf16.msra.mxu0 %v13233_v8  ;;  %698 = vst.msk [vmem:[#allocation2 + $0x21] sm:$0xff] %vm640_vm0, %v609_v29  ;;  %v588_v8 = vmul.f32 %v14670_v10, %v549_v60  ;;  %v628_v29 = vadd.f32 %v14675_v11, %v589_v15  ;;  %v1862_v60 = vld [vmem:[#allocation7 + $0x38] sm:$0xff] }
  0xac   : > { %699 = vst.msk [vmem:[#allocation2 + $0x31] sm:$0xff] %vm640_vm0, %v610_v30  ;;  %700 = vst.msk [vmem:[#allocation2 + $0x39] sm:$0xff] %vm640_vm0, %v611_v31  ;;  %13238 = vmatprep.subr.bf16.mxu0 %v14722_v51  ;;  %v626_v22 = vadd.f32 %v14675_v11, %v587_v7  ;;  %v629_v30 = vadd.f32 %v14675_v11, %v590_v16  ;;  %v592_v31 = vmul.f32 %v14670_v10, %v553_v9 }
  0xad   : > { %701 = vst.msk [vmem:[#allocation2 + $0x49] sm:$0xff] %vm640_vm0, %v612_v36  ;;  %702 = vst.msk [vmem:[#allocation2 + $0x51] sm:$0xff] %vm640_vm0, %v613_v37  ;;  %v627_v23 = vadd.f32 %v14675_v11, %v588_v8  ;;  %v596_v36 = vmul.f32 %v14670_v10, %v557_v19 }
  0xae   : > { %703 = vst.msk [vmem:[#allocation2 + $0x61] sm:$0xff] %vm640_vm0, %v614_v38  ;;  %704 = vst.msk [vmem:[#allocation2 + $0x69] sm:$0xff] %vm640_vm0, %v615_v41  ;;  %v631_v38 = vadd.f32 %v14675_v11, %v592_v31  ;;  %v598_v41 = vmul.f32 %v14670_v10, %v559_v26  ;;  %v561_v31 = vld [vmem:[%s14543_s7 + $0xf8] sm:$0xff] }
  0xaf   : > { %705 = vst.msk [vmem:[#allocation2 + $0x79] sm:$0xff] %vm640_vm0, %v616_v48  ;;  %706 = vst.msk [vmem:[#allocation2 + $0x81] sm:$0xff] %vm640_vm0, %v617_v55  ;;  %v635_v45 = vadd.f32 %v14675_v11, %v596_v36  ;;  %v600_v32 = vmul.f32 %v14670_v10, %v561_v31 }
  0xb0   : > { %707 = vst.msk [vmem:[#allocation2 + $0x91] sm:$0xff] %vm640_vm0, %v618_v56  ;;  %708 = vst.msk [vmem:[#allocation2 + $0x99] sm:$0xff] %vm640_vm0, %v619_v57  ;;  %v637_v47 = vadd.f32 %v14675_v11, %v598_v41  ;;  %v2250_v41 = vld [vmem:[#allocation7 + $0x48] sm:$0xff] }
  0xb1   : > { %709 = vst.msk [vmem:[#allocation2 + $0xa9] sm:$0xff] %vm640_vm0, %v620_v62  ;;  %710 = vst.msk [vmem:[#allocation2 + $0xb1] sm:$0xff] %vm640_vm0, %v621_v63  ;;  %v14859_v63 = vpack.c.bf16 %v1862_v60, %v1861_v59  ;;  %v639_v36 = vadd.f32 %v14675_v11, %v600_v32 }
  0xb2   : > { %v14761_v20 = vld [vmem:[#allocation2 + $0x19] sm:$0xff]  ;;  %711 = vst.msk [vmem:[#allocation2 + $0xc1] sm:$0xff] %vm640_vm0, %v622_v5  ;;  %v14772_v27 = vld [vmem:[#allocation2 + $0x21] sm:$0xff]  ;;  %712 = vst.msk [vmem:[#allocation2 + $0xc9] sm:$0xff] %vm640_vm0, %v623_v13 }
  0xb3   : > { %12096 = vmatprep.mubr.msk.f32.mxu0 %vm640_vm0, %v14761_v20  ;;  %v14774_v28 = vld [vmem:[#allocation2 + $0x31] sm:$0xff]  ;;  %713 = vst.msk [vmem:[#allocation2 + $0xd9] sm:$0xff] %vm640_vm0, %v624_v14  ;;  %714 = vst.msk [vmem:[#allocation2 + $0xe1] sm:$0xff] %vm640_vm0, %v625_v21  ;;  %v14793_v37 = vld [vmem:[#allocation2 + $0x39] sm:$0xff] }
  0xb4   : > { %12097 = vmatmul.mubr.msk.f32.gmra.mrb[2].mxu0 %vm640_vm0, %v14772_v27  ;;  %715 = vst.msk [vmem:[#allocation2 + $0xf1] sm:$0xff] %vm640_vm0, %v626_v22  ;;  %716 = vst.msk [vmem:[#allocation2 + $0xf9] sm:$0xff] %vm640_vm0, %v627_v23  ;;  %v14801_v42 = vld [vmem:[#allocation2 + $0x49] sm:$0xff]  ;;  %v14818_v48 = vld [vmem:[#allocation2 + $0x51] sm:$0xff] }
  0xb5   : > { %12099 = vmatprep.mubr.msk.f32.mxu0 %vm640_vm0, %v14774_v28  ;;  %717 = vst.msk [vmem:[#allocation2 + $0x109] sm:$0xff] %vm640_vm0, %v628_v29  ;;  %718 = vst.msk [vmem:[#allocation2 + $0x111] sm:$0xff] %vm640_vm0, %v629_v30  ;;  %v14822_v49 = vld [vmem:[#allocation2 + $0x61] sm:$0xff]  ;;  %v14828_v50 = vld [vmem:[#allocation2 + $0x69] sm:$0xff] }
  0xb6   : > { %719 = vst.msk [vmem:[#allocation2 + $0x121] sm:$0xff] %vm640_vm0, %v630_v33  ;;  %720 = vst.msk [vmem:[#allocation2 + $0x129] sm:$0xff] %vm640_vm0, %v631_v38  ;;  %v14830_v52 = vld [vmem:[#allocation2 + $0x79] sm:$0xff]  ;;  %v14836_v53 = vld [vmem:[#allocation2 + $0x81] sm:$0xff] }
  0xb7   : > { %721 = vst.msk [vmem:[#allocation2 + $0x139] sm:$0xff] %vm640_vm0, %v632_v39  ;;  %722 = vst.msk [vmem:[#allocation2 + $0x141] sm:$0xff] %vm640_vm0, %v633_v43  ;;  %v14838_v54 = vld [vmem:[#allocation2 + $0x91] sm:$0xff]  ;;  %v14844_v55 = vld [vmem:[#allocation2 + $0x99] sm:$0xff] }
  0xb8   : > { %12100 = vmatmul.mubr.msk.f32.gmra.mrb[4].mxu0 %vm640_vm0, %v14793_v37  ;;  %723 = vst.msk [vmem:[#allocation2 + $0x151] sm:$0xff] %vm640_vm0, %v634_v44  ;;  %724 = vst.msk [vmem:[#allocation2 + $0x159] sm:$0xff] %vm640_vm0, %v635_v45  ;;  %v14846_v56 = vld [vmem:[#allocation2 + $0xa9] sm:$0xff]  ;;  %v14852_v57 = vld [vmem:[#allocation2 + $0xb1] sm:$0xff]  ;;  %v14993_v45 = vpack.c.bf16 %v2250_v41, %v2249_v40 }
  0xb9   : > { %12102 = vmatprep.mubr.msk.f32.mxu0 %vm640_vm0, %v14801_v42  ;;  %725 = vst.msk [vmem:[#allocation2 + $0x169] sm:$0xff] %vm640_vm0, %v636_v46  ;;  %726 = vst.msk [vmem:[#allocation2 + $0x171] sm:$0xff] %vm640_vm0, %v637_v47  ;;  %v14857_v62 = vld [vmem:[#allocation2 + $0x18] sm:$0xff]  ;;  %v14865_v1 = vld [vmem:[#allocation2 + $0x20] sm:$0xff] }
  0xba   : > { %v14867_v2 = vld [vmem:[#allocation2 + $0x30] sm:$0xff]  ;;  %v14874_v3 = vld [vmem:[#allocation2 + $0x38] sm:$0xff]  ;;  %v14876_v4 = vld [vmem:[#allocation2 + $0x48] sm:$0xff]  ;;  %728 = vst.msk [vmem:[#allocation2 + $0x189] sm:$0xff] %vm640_vm0, %v639_v36 }
  0xbb   : > { %v14884_v5 = vld [vmem:[#allocation2 + $0x60] sm:$0xff]  ;;  %v14890_v6 = vld [vmem:[#allocation2 + $0x68] sm:$0xff]  ;;  %v14892_v7 = vld [vmem:[#allocation2 + $0x78] sm:$0xff] }
  0xbc   : > { %12103 = vmatmul.mubr.msk.f32.gmra.mrb[6].mxu0 %vm640_vm0, %v14818_v48  ;;  %v14898_v8 = vld [vmem:[#allocation2 + $0x80] sm:$0xff]  ;;  %v14900_v9 = vld [vmem:[#allocation2 + $0x90] sm:$0xff]  ;;  %v14906_v12 = vld [vmem:[#allocation2 + $0x98] sm:$0xff] }
  0xbd   : > { %12105 = vmatprep.mubr.msk.f32.mxu0 %vm640_vm0, %v14822_v49  ;;  %v14908_v13 = vld [vmem:[#allocation2 + $0xa8] sm:$0xff]  ;;  %v14914_v14 = vld [vmem:[#allocation2 + $0xb0] sm:$0xff]  ;;  %v14916_v15 = vld [vmem:[#allocation2 + $0xc0] sm:$0xff] }
  0xbe   : > { %v14922_v16 = vld [vmem:[#allocation2 + $0xc8] sm:$0xff]  ;;  %v14924_v17 = vld [vmem:[#allocation2 + $0xd8] sm:$0xff]  ;;  %v14930_v18 = vld [vmem:[#allocation2 + $0xe0] sm:$0xff] }
  0xbf   : > { %v14932_v19 = vld [vmem:[#allocation2 + $0xf0] sm:$0xff]  ;;  %v14938_v21 = vld [vmem:[#allocation2 + $0xf8] sm:$0xff]  ;;  %v14940_v22 = vld [vmem:[#allocation2 + $0x108] sm:$0xff] }
  0xc0   : > { %12106 = vmatmul.mubr.msk.f32.gmra.mrb[8].mxu0 %vm640_vm0, %v14828_v50  ;;  %v14946_v23 = vld [vmem:[#allocation2 + $0x110] sm:$0xff]  ;;  %v14948_v24 = vld [vmem:[#allocation2 + $0x120] sm:$0xff]  ;;  %v14954_v25 = vld [vmem:[#allocation2 + $0x128] sm:$0xff] }
  0xc1   : > { %12108 = vmatprep.mubr.msk.f32.mxu0 %vm640_vm0, %v14830_v52  ;;  %v14956_v26 = vld [vmem:[#allocation2 + $0x138] sm:$0xff]  ;;  %v560_v29 = vld [vmem:[%s14543_s7 + $0xf0] sm:$0xff]  ;;  %v14966_v33 = vld [vmem:[#allocation2 + $0x140] sm:$0xff] }
  0xc2   : > { %v599_v30 = vmul.f32 %v14670_v10, %v560_v29  ;;  %v14969_v35 = vld [vmem:[#allocation2 + $0x150] sm:$0xff]  ;;  %v14978_v10 = vld [vmem:[#allocation2 + $0x158] sm:$0xff]  ;;  %v14980_v38 = vld [vmem:[#allocation2 + $0x168] sm:$0xff] }
  0xc3   : > { %v1440_v39 = vld [vmem:[#allocation2 + $0x2] sm:$0xff]  ;;  %v1441_v43 = vld [vmem:[#allocation2 + $0xa] sm:$0xff]  ;;  %v14991_v44 = vld [vmem:[#allocation2 + $0x1a] sm:$0xff] }
  0xc4   : > { %12109 = vmatmul.mubr.msk.f32.gmra.mrb[10].mxu0 %vm640_vm0, %v14836_v53  ;;  %v638_v34 = vadd.f32 %v14675_v11, %v599_v30  ;;  %v14986_v11 = vld [vmem:[#allocation2 + $0x170] sm:$0xff]  ;;  %17885 = vst [vmem:[#allocation19_spill] sm:$0xff] %v14991_v44  ;;  %v14999_v46 = vld [vmem:[#allocation2 + $0x22] sm:$0xff]  ;;  %v15026_v29 = vld [vmem:[#allocation2 + $0x7a] sm:$0xff] }
  0xc5   : > { %12111 = vmatprep.mubr.msk.f32.mxu0 %vm640_vm0, %v14838_v54  ;;  %17886 = vst [vmem:[#allocation20_spill] sm:$0xff] %v14999_v46  ;;  %v15001_v47 = vld [vmem:[#allocation2 + $0x32] sm:$0xff]  ;;  %v15010_v59 = vld [vmem:[#allocation2 + $0x4a] sm:$0xff]  ;;  %17893 = vst [vmem:[#allocation27_spill] sm:$0xff] %v15026_v29 }
  0xc6   : > { %727 = vst.msk [vmem:[#allocation2 + $0x181] sm:$0xff] %vm640_vm0, %v638_v34  ;;  %17887 = vst [vmem:[#allocation21_spill] sm:$0xff] %v15001_v47  ;;  %v15016_v60 = vld [vmem:[#allocation2 + $0x52] sm:$0xff]  ;;  %v15032_v30 = vld [vmem:[#allocation2 + $0x82] sm:$0xff] }
  0xc7   : > { %17889 = vst [vmem:[#allocation23_spill] sm:$0xff] %v15010_v59  ;;  %17890 = vst [vmem:[#allocation24_spill] sm:$0xff] %v15016_v60  ;;  %v15034_v31 = vld [vmem:[#allocation2 + $0x92] sm:$0xff]  ;;  %v15040_v32 = vld [vmem:[#allocation2 + $0x9a] sm:$0xff] }
  0xc8   : > { %12112 = vmatmul.mubr.msk.f32.gmra.mrb[12].mxu0 %vm640_vm0, %v14844_v55  ;;  %17894 = vst [vmem:[#allocation28_spill] sm:$0xff] %v15032_v30  ;;  %17895 = vst [vmem:[#allocation29_spill] sm:$0xff] %v15034_v31  ;;  %v15042_v34 = vld [vmem:[#allocation2 + $0xaa] sm:$0xff]  ;;  %v15046_v36 = vld [vmem:[#allocation2 + $0xc1] sm:$0xff] }
  0xc9   : > { %12114 = vmatprep.mubr.msk.f32.mxu0 %vm640_vm0, %v14846_v56  ;;  %17896 = vst [vmem:[#allocation30_spill] sm:$0xff] %v15040_v32  ;;  %17897 = vst [vmem:[#allocation31_spill] sm:$0xff] %v15042_v34  ;;  %v15052_v40 = vld [vmem:[#allocation2 + $0xc9] sm:$0xff]  ;;  %12117 = vmatprep.mubr.msk.f32.mxu1 %vm640_vm0, %v15046_v36 }
  0xca   : > { %v15056_v41 = vld [vmem:[#allocation2 + $0xc2] sm:$0xff]  ;;  %12118 = vmatmul.mubr.msk.f32.vlgmr.msra.gmra.mrb[0].mxu1 %vm640_vm0, %v15052_v40  ;;  %v15066_v0 = vld [vmem:[#allocation2 + $0xca] sm:$0xff] }
  0xcb   : > { %17899 = vst [vmem:[#allocation33_spill] sm:$0xff] %v15056_v41  ;;  %17900 = vst [vmem:[#allocation34_spill] sm:$0xff] %v15066_v0 }
  0xcc   : > { %12115 = vmatmul.mubr.msk.f32.gmra.mrb[14].mxu0 %vm640_vm0, %v14852_v57 }
  0xcd   : > { %12145 = vmatprep.mubr.msk.f32.mxu0 %vm640_vm0, %v729_v58  ;;  %v15008_v58 = vld [vmem:[#allocation2 + $0x3a] sm:$0xff] }
  0xce   : > { %17888 = vst [vmem:[#allocation22_spill] sm:$0xff] %v15008_v58 }
  0xd0   : > { %12146 = vmatmul.mubr.msk.f32.vlgmr.msra.gmra.mrb[0].mxu0 %vm640_vm0, %v730_v61  ;;  %v15018_v61 = vld [vmem:[#allocation2 + $0x62] sm:$0xff] }
  0xd1   : > { %13240 = vmatpush3.bf16.msra.mxu0 %v14722_v51  ;;  %12148 = vmatprep.mubr.msk.f32.mxu0 %vm640_vm0, %v14857_v62  ;;  %v14882_v51 = vld [vmem:[#allocation2 + $0x50] sm:$0xff]  ;;  %17891 = vst [vmem:[#allocation25_spill] sm:$0xff] %v15018_v61 }
  0xd2   : > { %13242 = vmatprep.subr.bf16.mxu0 %v14859_v63 }
  0xd4   : > { %12149 = vmatmul.mubr.msk.f32.gmra.mrb[2].mxu0 %vm640_vm0, %v14865_v1 }
  0xd5   : > { %12151 = vmatprep.mubr.msk.f32.mxu0 %vm640_vm0, %v14867_v2 }
  0xd8   : > { %12152 = vmatmul.mubr.msk.f32.gmra.mrb[4].mxu0 %vm640_vm0, %v14874_v3 }
  0xd9   : > { %12154 = vmatprep.mubr.msk.f32.mxu0 %vm640_vm0, %v14876_v4 }
  0xdc   : > { %12155 = vmatmul.mubr.msk.f32.gmra.mrb[6].mxu0 %vm640_vm0, %v14882_v51 }
  0xdd   : > { %12157 = vmatprep.mubr.msk.f32.mxu0 %vm640_vm0, %v14884_v5 }
  0xe0   : > { %12158 = vmatmul.mubr.msk.f32.gmra.mrb[8].mxu0 %vm640_vm0, %v14890_v6 }
  0xe1   : > { %12160 = vmatprep.mubr.msk.f32.mxu0 %vm640_vm0, %v14892_v7 }
  0xe4   : > { %12161 = vmatmul.mubr.msk.f32.gmra.mrb[10].mxu0 %vm640_vm0, %v14898_v8 }
  0xe5   : > { %12163 = vmatprep.mubr.msk.f32.mxu0 %vm640_vm0, %v14900_v9 }
  0xe8   : > { %12164 = vmatmul.mubr.msk.f32.gmra.mrb[12].mxu0 %vm640_vm0, %v14906_v12 }
  0xe9   : > { %12166 = vmatprep.mubr.msk.f32.mxu0 %vm640_vm0, %v14908_v13 }
  0xec   : > { %12167 = vmatmul.mubr.msk.f32.gmra.mrb[14].mxu0 %vm640_vm0, %v14914_v14 }
  0xed   : > { %12169 = vmatprep.mubr.msk.f32.mxu0 %vm640_vm0, %v14916_v15 }
  0xf0   : > { %12170 = vmatmul.mubr.msk.f32.gmra.mrb[16].mxu0 %vm640_vm0, %v14922_v16 }
  0xf1   : > { %12172 = vmatprep.mubr.msk.f32.mxu0 %vm640_vm0, %v14924_v17 }
  0xf4   : > { %12173 = vmatmul.mubr.msk.f32.gmra.mrb[18].mxu0 %vm640_vm0, %v14930_v18 }
  0xf5   : > { %12175 = vmatprep.mubr.msk.f32.mxu0 %vm640_vm0, %v14932_v19 }
  0xf8   : > { %12176 = vmatmul.mubr.msk.f32.gmra.mrb[20].mxu0 %vm640_vm0, %v14938_v21 }
  0xf9   : > { %12178 = vmatprep.mubr.msk.f32.mxu0 %vm640_vm0, %v14940_v22 }
  0xfc   : > { %12179 = vmatmul.mubr.msk.f32.gmra.mrb[22].mxu0 %vm640_vm0, %v14946_v23 }
  0xfd   : > { %12181 = vmatprep.mubr.msk.f32.mxu0 %vm640_vm0, %v14948_v24 }
 0x100   : > { %12182 = vmatmul.mubr.msk.f32.gmra.mrb[24].mxu0 %vm640_vm0, %v14954_v25 }
 0x101   : > { %12184 = vmatprep.mubr.msk.f32.mxu0 %vm640_vm0, %v14956_v26 }
 0x104   : > { %12185 = vmatmul.mubr.msk.f32.gmra.mrb[26].mxu0 %vm640_vm0, %v14966_v33 }
 0x105   : > { %12187 = vmatprep.mubr.msk.f32.mxu0 %vm640_vm0, %v14969_v35 }
 0x108   : > { %12188 = vmatmul.mubr.msk.f32.gmra.mrb[28].mxu0 %vm640_vm0, %v14978_v10 }
 0x109   : > { %12190 = vmatprep.mubr.msk.f32.mxu0 %vm640_vm0, %v14980_v38 }
 0x10c   : > { %12191 = vmatmul.mubr.msk.f32.gmra.mrb[30].mxu0 %vm640_vm0, %v14986_v11 }
 0x10d   : > { %12197 = vmatprep.mubr.msk.f32.mxu0 %vm640_vm0, %v1440_v39  ;;  %v15050_v39 = vld [vmem:[#allocation2 + $0xb2] sm:$0xff] }
 0x10e   : > { %17898 = vst [vmem:[#allocation32_spill] sm:$0xff] %v15050_v39 }
 0x110   : > { %12198 = vmatmul.mubr.msk.f32.vlgmr.msra.gmra.mrb[0].mxu0 %vm640_vm0, %v1441_v43  ;;  %v15062_v43 = vld [vmem:[#allocation2 + $0xd9] sm:$0xff] }
 0x111   : > { %13244 = vmatpush3.bf16.msra.mxu0 %v14859_v63  ;;  %12200 = vmatprep.mubr.msk.f32.mxu0 %vm640_vm0, %v14991_v44  ;;  %v15024_v63 = vld [vmem:[#allocation2 + $0x6a] sm:$0xff] }
 0x112   : > { %13246 = vmatprep.subr.bf16.mxu0 %v14993_v45  ;;  %17892 = vst [vmem:[#allocation26_spill] sm:$0xff] %v15024_v63  ;;  %12120 = vmatprep.mubr.msk.f32.mxu1 %vm640_vm0, %v15062_v43  ;;  %v15164_v44 = vld [vmem:[#allocation2 + $0x171] sm:$0xff] }
 0x114   : > { %12201 = vmatmul.mubr.msk.f32.gmra.mrb[2].mxu0 %vm640_vm0, %v14999_v46  ;;  %v15152_v46 = vld [vmem:[#allocation2 + $0x152] sm:$0xff] }
 0x115   : > { %12203 = vmatprep.mubr.msk.f32.mxu0 %vm640_vm0, %v15001_v47  ;;  %v15148_v47 = vld [vmem:[#allocation2 + $0x159] sm:$0xff]  ;;  %17913 = vst [vmem:[#allocation47_spill] sm:$0xff] %v15152_v46 }
 0x116   : > { %17912 = vst [vmem:[#allocation46_spill] sm:$0xff] %v15148_v47 }
 0x118   : > { %12204 = vmatmul.mubr.msk.f32.gmra.mrb[4].mxu0 %vm640_vm0, %v15008_v58  ;;  %v15136_v58 = vld [vmem:[#allocation2 + $0x13a] sm:$0xff] }
 0x119   : > { %12206 = vmatprep.mubr.msk.f32.mxu0 %vm640_vm0, %v15010_v59  ;;  %v15132_v59 = vld [vmem:[#allocation2 + $0x141] sm:$0xff]  ;;  %17909 = vst [vmem:[#allocation43_spill] sm:$0xff] %v15136_v58 }
 0x11c   : > { %12207 = vmatmul.mubr.msk.f32.gmra.mrb[6].mxu0 %vm640_vm0, %v15016_v60  ;;  %v15120_v60 = vld [vmem:[#allocation2 + $0x122] sm:$0xff] }
 0x11d   : > { %12209 = vmatprep.mubr.msk.f32.mxu0 %vm640_vm0, %v15018_v61  ;;  %v15116_v61 = vld [vmem:[#allocation2 + $0x129] sm:$0xff]  ;;  %17907 = vst [vmem:[#allocation41_spill] sm:$0xff] %v15120_v60 }
 0x120   : > { %12210 = vmatmul.mubr.msk.f32.gmra.mrb[8].mxu0 %vm640_vm0, %v15024_v63  ;;  %v15104_v63 = vld [vmem:[#allocation2 + $0x10a] sm:$0xff] }
 0x121   : > { %12212 = vmatprep.mubr.msk.f32.mxu0 %vm640_vm0, %v15026_v29  ;;  %v15100_v29 = vld [vmem:[#allocation2 + $0x111] sm:$0xff]  ;;  %17905 = vst [vmem:[#allocation39_spill] sm:$0xff] %v15104_v63 }
 0x124   : > { %12213 = vmatmul.mubr.msk.f32.gmra.mrb[10].mxu0 %vm640_vm0, %v15032_v30  ;;  %v15088_v30 = vld [vmem:[#allocation2 + $0xf2] sm:$0xff] }
 0x125   : > { %12215 = vmatprep.mubr.msk.f32.mxu0 %vm640_vm0, %v15034_v31  ;;  %v15084_v31 = vld [vmem:[#allocation2 + $0xf9] sm:$0xff]  ;;  %17903 = vst [vmem:[#allocation37_spill] sm:$0xff] %v15088_v30 }
 0x128   : > { %12216 = vmatmul.mubr.msk.f32.gmra.mrb[12].mxu0 %vm640_vm0, %v15040_v32  ;;  %v15072_v32 = vld [vmem:[#allocation2 + $0xda] sm:$0xff] }
 0x129   : > { %12218 = vmatprep.mubr.msk.f32.mxu0 %vm640_vm0, %v15042_v34  ;;  %v15068_v34 = vld [vmem:[#allocation2 + $0xe1] sm:$0xff]  ;;  %17901 = vst [vmem:[#allocation35_spill] sm:$0xff] %v15072_v32 }
 0x12a   : > { %12121 = vmatmul.mubr.msk.f32.gmra.mrb[2].mxu1 %vm640_vm0, %v15068_v34 }
 0x12c   : > { %12219 = vmatmul.mubr.msk.f32.gmra.mrb[14].mxu0 %vm640_vm0, %v15050_v39  ;;  %v15078_v39 = vld [vmem:[#allocation2 + $0xf1] sm:$0xff] }
 0x12d   : > { %12221 = vmatprep.mubr.msk.f32.mxu0 %vm640_vm0, %v15056_v41  ;;  %v15082_v41 = vld [vmem:[#allocation2 + $0xe2] sm:$0xff]  ;;  %12123 = vmatprep.mubr.msk.f32.mxu1 %vm640_vm0, %v15078_v39 }
 0x12e   : > { %17902 = vst [vmem:[#allocation36_spill] sm:$0xff] %v15082_v41  ;;  %12124 = vmatmul.mubr.msk.f32.gmra.mrb[4].mxu1 %vm640_vm0, %v15084_v31 }
 0x130   : > { %12222 = vmatmul.mubr.msk.f32.gmra.mrb[16].mxu0 %vm640_vm0, %v15066_v0  ;;  %v15094_v0 = vld [vmem:[#allocation2 + $0x109] sm:$0xff] }
 0x131   : > { %12224 = vmatprep.mubr.msk.f32.mxu0 %vm640_vm0, %v15072_v32  ;;  %v15098_v32 = vld [vmem:[#allocation2 + $0xfa] sm:$0xff]  ;;  %12126 = vmatprep.mubr.msk.f32.mxu1 %vm640_vm0, %v15094_v0 }
 0x132   : > { %17904 = vst [vmem:[#allocation38_spill] sm:$0xff] %v15098_v32  ;;  %12127 = vmatmul.mubr.msk.f32.gmra.mrb[6].mxu1 %vm640_vm0, %v15100_v29 }
 0x134   : > { %12225 = vmatmul.mubr.msk.f32.gmra.mrb[18].mxu0 %vm640_vm0, %v15082_v41  ;;  %v15110_v41 = vld [vmem:[#allocation2 + $0x121] sm:$0xff] }
 0x135   : > { %12227 = vmatprep.mubr.msk.f32.mxu0 %vm640_vm0, %v15088_v30  ;;  %v15114_v30 = vld [vmem:[#allocation2 + $0x112] sm:$0xff]  ;;  %12129 = vmatprep.mubr.msk.f32.mxu1 %vm640_vm0, %v15110_v41 }
 0x136   : > { %17906 = vst [vmem:[#allocation40_spill] sm:$0xff] %v15114_v30  ;;  %12130 = vmatmul.mubr.msk.f32.gmra.mrb[8].mxu1 %vm640_vm0, %v15116_v61 }
 0x138   : > { %12228 = vmatmul.mubr.msk.f32.gmra.mrb[20].mxu0 %vm640_vm0, %v15098_v32  ;;  %v15126_v32 = vld [vmem:[#allocation2 + $0x139] sm:$0xff] }
 0x139   : > { %12230 = vmatprep.mubr.msk.f32.mxu0 %vm640_vm0, %v15104_v63  ;;  %v15130_v63 = vld [vmem:[#allocation2 + $0x12a] sm:$0xff]  ;;  %12132 = vmatprep.mubr.msk.f32.mxu1 %vm640_vm0, %v15126_v32 }
 0x13a   : > { %17908 = vst [vmem:[#allocation42_spill] sm:$0xff] %v15130_v63  ;;  %12133 = vmatmul.mubr.msk.f32.gmra.mrb[10].mxu1 %vm640_vm0, %v15132_v59 }
 0x13c   : > { %12231 = vmatmul.mubr.msk.f32.gmra.mrb[22].mxu0 %vm640_vm0, %v15114_v30  ;;  %v15142_v30 = vld [vmem:[#allocation2 + $0x151] sm:$0xff] }
 0x13d   : > { %12233 = vmatprep.mubr.msk.f32.mxu0 %vm640_vm0, %v15120_v60  ;;  %17910 = vst [vmem:[#allocation44_spill] sm:$0xff] %v15142_v30  ;;  %v15146_v60 = vld [vmem:[#allocation2 + $0x142] sm:$0xff]  ;;  %12135 = vmatprep.mubr.msk.f32.mxu1 %vm640_vm0, %v15142_v30  ;;  %v15168_v30 = vld [vmem:[#allocation2 + $0x16a] sm:$0xff] }
 0x13e   : > { %17911 = vst [vmem:[#allocation45_spill] sm:$0xff] %v15146_v60  ;;  %12136 = vmatmul.mubr.msk.f32.gmra.mrb[12].mxu1 %vm640_vm0, %v15148_v47  ;;  %v2638_v47 = vld [vmem:[#allocation7 + $0x58] sm:$0xff] }
 0x140   : > { %12234 = vmatmul.mubr.msk.f32.gmra.mrb[24].mxu0 %vm640_vm0, %v15130_v63  ;;  %v15158_v63 = vld [vmem:[#allocation2 + $0x169] sm:$0xff] }
 0x141   : > { %12236 = vmatprep.mubr.msk.f32.mxu0 %vm640_vm0, %v15136_v58  ;;  %17914 = vst [vmem:[#allocation48_spill] sm:$0xff] %v15158_v63  ;;  %v15162_v58 = vld [vmem:[#allocation2 + $0x15a] sm:$0xff]  ;;  %12138 = vmatprep.mubr.msk.f32.mxu1 %vm640_vm0, %v15158_v63 }
 0x142   : > { %17915 = vst [vmem:[#allocation49_spill] sm:$0xff] %v15162_v58  ;;  %12139 = vmatmul.mubr.msk.f32.gmra.mrb[14].mxu1 %vm640_vm0, %v15164_v44 }
 0x144   : > { %12237 = vmatmul.mubr.msk.f32.gmra.mrb[26].mxu0 %vm640_vm0, %v15146_v60  ;;  %v15176_v60 = vld [vmem:[#allocation2 + $0x172] sm:$0xff] }
 0x145   : > { %12239 = vmatprep.mubr.msk.f32.mxu0 %vm640_vm0, %v15152_v46  ;;  %v2637_v46 = vld [vmem:[#allocation7 + $0x50] sm:$0xff] }
 0x146   : > { %v13249_v63 = vpack.c.bf16 %v2638_v47, %v2637_v46  ;;  %v3027_v46 = vld [vmem:[#allocation7 + $0x68] sm:$0xff] }
 0x148   : > { %12240 = vmatmul.mubr.msk.f32.gmra.mrb[28].mxu0 %vm640_vm0, %v15162_v58 }
 0x149   : > { %12242 = vmatprep.mubr.msk.f32.mxu0 %vm640_vm0, %v15168_v30 }
 0x14c   : > { %12243 = vmatmul.mubr.msk.f32.gmra.mrb[30].mxu0 %vm640_vm0, %v15176_v60 }
 0x14d   : > { %12249 = vmatprep.mubr.msk.f32.mxu0 %vm640_vm0, %v14857_v62  ;;  %v15239_v62 = vld [vmem:[#allocation2 + $0x180] sm:$0xff] }
 0x150   : > { %12250 = vmatmul.mubr.msk.f32.vlgmr.msra.gmra.mrb[0].mxu0 %vm640_vm0, %v14865_v1  ;;  %v15245_v1 = vld [vmem:[#allocation2 + $0x188] sm:$0xff] }
 0x151   : > { %13248 = vmatpush3.bf16.msra.mxu0 %v14993_v45  ;;  %12252 = vmatprep.mubr.msk.f32.mxu0 %vm640_vm0, %v14867_v2  ;;  %v3026_v45 = vld [vmem:[#allocation7 + $0x60] sm:$0xff] }
 0x152   : > { %13250 = vmatprep.subr.bf16.mxu0 %v13249_v63  ;;  %v13253_v47 = vpack.c.bf16 %v3027_v46, %v3026_v45  ;;  %v17926_v45 = vld [vmem:[#allocation26_spill] sm:$0xff]  ;;  %v17927_v46 = vld [vmem:[#allocation27_spill] sm:$0xff] }
 0x154   : > { %12253 = vmatmul.mubr.msk.f32.gmra.mrb[2].mxu0 %vm640_vm0, %v14874_v3 }
 0x155   : > { %12255 = vmatprep.mubr.msk.f32.mxu0 %vm640_vm0, %v14876_v4 }
 0x158   : > { %12256 = vmatmul.mubr.msk.f32.gmra.mrb[4].mxu0 %vm640_vm0, %v14882_v51 }
 0x159   : > { %12258 = vmatprep.mubr.msk.f32.mxu0 %vm640_vm0, %v14884_v5 }
 0x15c   : > { %12259 = vmatmul.mubr.msk.f32.gmra.mrb[6].mxu0 %vm640_vm0, %v14890_v6 }
 0x15d   : > { %12261 = vmatprep.mubr.msk.f32.mxu0 %vm640_vm0, %v14892_v7 }
 0x160   : > { %12262 = vmatmul.mubr.msk.f32.gmra.mrb[8].mxu0 %vm640_vm0, %v14898_v8 }
 0x161   : > { %12264 = vmatprep.mubr.msk.f32.mxu0 %vm640_vm0, %v14900_v9 }
 0x164   : > { %12265 = vmatmul.mubr.msk.f32.gmra.mrb[10].mxu0 %vm640_vm0, %v14906_v12 }
 0x165   : > { %12267 = vmatprep.mubr.msk.f32.mxu0 %vm640_vm0, %v14908_v13 }
 0x168   : > { %12268 = vmatmul.mubr.msk.f32.gmra.mrb[12].mxu0 %vm640_vm0, %v14914_v14 }
 0x169   : > { %12270 = vmatprep.mubr.msk.f32.mxu0 %vm640_vm0, %v14916_v15 }
 0x16c   : > { %12271 = vmatmul.mubr.msk.f32.gmra.mrb[14].mxu0 %vm640_vm0, %v14922_v16 }
 0x16d   : > { %12273 = vmatprep.mubr.msk.f32.mxu0 %vm640_vm0, %v14924_v17 }
 0x170   : > { %12274 = vmatmul.mubr.msk.f32.gmra.mrb[16].mxu0 %vm640_vm0, %v14930_v18 }
 0x171   : > { %12276 = vmatprep.mubr.msk.f32.mxu0 %vm640_vm0, %v14932_v19 }
 0x174   : > { %12277 = vmatmul.mubr.msk.f32.gmra.mrb[18].mxu0 %vm640_vm0, %v14938_v21 }
 0x175   : > { %12279 = vmatprep.mubr.msk.f32.mxu0 %vm640_vm0, %v14940_v22 }
 0x178   : > { %12280 = vmatmul.mubr.msk.f32.gmra.mrb[20].mxu0 %vm640_vm0, %v14946_v23 }
 0x179   : > { %12282 = vmatprep.mubr.msk.f32.mxu0 %vm640_vm0, %v14948_v24 }
 0x17c   : > { %12283 = vmatmul.mubr.msk.f32.gmra.mrb[22].mxu0 %vm640_vm0, %v14954_v25 }
 0x17d   : > { %12285 = vmatprep.mubr.msk.f32.mxu0 %vm640_vm0, %v14956_v26 }
 0x180   : > { %12286 = vmatmul.mubr.msk.f32.gmra.mrb[24].mxu0 %vm640_vm0, %v14966_v33 }
 0x181   : > { %12288 = vmatprep.mubr.msk.f32.mxu0 %vm640_vm0, %v14969_v35 }
 0x184   : > { %12289 = vmatmul.mubr.msk.f32.gmra.mrb[26].mxu0 %vm640_vm0, %v14978_v10 }
 0x185   : > { %12291 = vmatprep.mubr.msk.f32.mxu0 %vm640_vm0, %v14980_v38 }
 0x188   : > { %12292 = vmatmul.mubr.msk.f32.gmra.mrb[28].mxu0 %vm640_vm0, %v14986_v11 }
 0x189   : > { %12294 = vmatprep.mubr.msk.f32.mxu0 %vm640_vm0, %v15239_v62 }
 0x18c   : > { %12295 = vmatmul.mubr.msk.f32.gmra.mrb[30].mxu0 %vm640_vm0, %v15245_v1 }
 0x18d   : > { %12301 = vmatprep.mubr.msk.f32.mxu0 %vm640_vm0, %v14761_v20  ;;  %v17916_v20 = vld [vmem:[#allocation44_spill] sm:$0xff] }
 0x190   : > { %12302 = vmatmul.mubr.msk.f32.vlgmr.msra.gmra.mrb[0].mxu0 %vm640_vm0, %v14772_v27  ;;  %v17917_v27 = vld [vmem:[#allocation46_spill] sm:$0xff] }
 0x191   : > { %13252 = vmatpush3.bf16.msra.mxu0 %v13249_v63  ;;  %12304 = vmatprep.mubr.msk.f32.mxu0 %vm640_vm0, %v14774_v28  ;;  %v17918_v28 = vld [vmem:[#allocation48_spill] sm:$0xff]  ;;  %v17925_v63 = vld [vmem:[#allocation25_spill] sm:$0xff] }
 0x192   : > { %13254 = vmatprep.subr.bf16.mxu0 %v13253_v47 }
 0x194   : > { %12305 = vmatmul.mubr.msk.f32.gmra.mrb[2].mxu0 %vm640_vm0, %v14793_v37  ;;  %v15307_v37 = vld [vmem:[#allocation2 + $0x181] sm:$0xff] }
 0x195   : > { %12307 = vmatprep.mubr.msk.f32.mxu0 %vm640_vm0, %v14801_v42  ;;  %v15313_v42 = vld [vmem:[#allocation2 + $0x189] sm:$0xff] }
 0x198   : > { %12308 = vmatmul.mubr.msk.f32.gmra.mrb[4].mxu0 %vm640_vm0, %v14818_v48  ;;  %v3414_v48 = vld [vmem:[#allocation7 + $0x70] sm:$0xff] }
 0x199   : > { %12310 = vmatprep.mubr.msk.f32.mxu0 %vm640_vm0, %v14822_v49  ;;  %v3415_v49 = vld [vmem:[#allocation7 + $0x78] sm:$0xff] }
 0x19c   : > { %12311 = vmatmul.mubr.msk.f32.gmra.mrb[6].mxu0 %vm640_vm0, %v14828_v50  ;;  %v17919_v50 = vld [vmem:[#allocation19_spill] sm:$0xff] }
 0x19d   : > { %12313 = vmatprep.mubr.msk.f32.mxu0 %vm640_vm0, %v14830_v52  ;;  %v13257_v52 = vpack.c.bf16 %v3415_v49, %v3414_v48  ;;  %v17929_v48 = vld [vmem:[#allocation29_spill] sm:$0xff]  ;;  %v17930_v49 = vld [vmem:[#allocation30_spill] sm:$0xff] }
 0x1a0   : > { %12314 = vmatmul.mubr.msk.f32.gmra.mrb[8].mxu0 %vm640_vm0, %v14836_v53  ;;  %v17920_v53 = vld [vmem:[#allocation20_spill] sm:$0xff] }
 0x1a1   : > { %12316 = vmatprep.mubr.msk.f32.mxu0 %vm640_vm0, %v14838_v54  ;;  %v17921_v54 = vld [vmem:[#allocation21_spill] sm:$0xff] }
 0x1a4   : > { %12317 = vmatmul.mubr.msk.f32.gmra.mrb[10].mxu0 %vm640_vm0, %v14844_v55  ;;  %v17922_v55 = vld [vmem:[#allocation22_spill] sm:$0xff] }
 0x1a5   : > { %12319 = vmatprep.mubr.msk.f32.mxu0 %vm640_vm0, %v14846_v56  ;;  %v17923_v56 = vld [vmem:[#allocation23_spill] sm:$0xff] }
 0x1a8   : > { %12320 = vmatmul.mubr.msk.f32.gmra.mrb[12].mxu0 %vm640_vm0, %v14852_v57  ;;  %v17924_v57 = vld [vmem:[#allocation24_spill] sm:$0xff] }
 0x1a9   : > { %12322 = vmatprep.mubr.msk.f32.mxu0 %vm640_vm0, %v15046_v36 }
 0x1ac   : > { %12323 = vmatmul.mubr.msk.f32.gmra.mrb[14].mxu0 %vm640_vm0, %v15052_v40 }
 0x1ad   : > { %12325 = vmatprep.mubr.msk.f32.mxu0 %vm640_vm0, %v15062_v43 }
 0x1b0   : > { %12326 = vmatmul.mubr.msk.f32.gmra.mrb[16].mxu0 %vm640_vm0, %v15068_v34 }
 0x1b1   : > { %12328 = vmatprep.mubr.msk.f32.mxu0 %vm640_vm0, %v15078_v39 }
 0x1b4   : > { %12329 = vmatmul.mubr.msk.f32.gmra.mrb[18].mxu0 %vm640_vm0, %v15084_v31 }
 0x1b5   : > { %12331 = vmatprep.mubr.msk.f32.mxu0 %vm640_vm0, %v15094_v0 }
 0x1b8   : > { %12332 = vmatmul.mubr.msk.f32.gmra.mrb[20].mxu0 %vm640_vm0, %v15100_v29 }
 0x1b9   : > { %12334 = vmatprep.mubr.msk.f32.mxu0 %vm640_vm0, %v15110_v41 }
 0x1bc   : > { %12335 = vmatmul.mubr.msk.f32.gmra.mrb[22].mxu0 %vm640_vm0, %v15116_v61 }
 0x1bd   : > { %12337 = vmatprep.mubr.msk.f32.mxu0 %vm640_vm0, %v15126_v32 }
 0x1c0   : > { %12338 = vmatmul.mubr.msk.f32.gmra.mrb[24].mxu0 %vm640_vm0, %v15132_v59 }
 0x1c1   : > { %12340 = vmatprep.mubr.msk.f32.mxu0 %vm640_vm0, %v17916_v20 }
 0x1c4   : > { %12341 = vmatmul.mubr.msk.f32.gmra.mrb[26].mxu0 %vm640_vm0, %v17917_v27 }
 0x1c5   : > { %12343 = vmatprep.mubr.msk.f32.mxu0 %vm640_vm0, %v17918_v28 }
 0x1c8   : > { %12344 = vmatmul.mubr.msk.f32.gmra.mrb[28].mxu0 %vm640_vm0, %v15164_v44 }
 0x1c9   : > { %12346 = vmatprep.mubr.msk.f32.mxu0 %vm640_vm0, %v15307_v37 }
 0x1cc   : > { %12347 = vmatmul.mubr.msk.f32.gmra.mrb[30].mxu0 %vm640_vm0, %v15313_v42 }
 0x1cd   : > { %12353 = vmatprep.mubr.msk.f32.mxu0 %vm640_vm0, %v17919_v50  ;;  %v17931_v50 = vld [vmem:[#allocation31_spill] sm:$0xff] }
 0x1d0   : > { %12354 = vmatmul.mubr.msk.f32.vlgmr.msra.gmra.mrb[0].mxu0 %vm640_vm0, %v17920_v53  ;;  %v17932_v53 = vld [vmem:[#allocation32_spill] sm:$0xff] }
 0x1d1   : > { %13256 = vmatpush3.bf16.msra.mxu0 %v13253_v47  ;;  %12356 = vmatprep.mubr.msk.f32.mxu0 %vm640_vm0, %v17921_v54  ;;  %v17928_v47 = vld [vmem:[#allocation28_spill] sm:$0xff] }
 0x1d2   : > { %13258 = vmatprep.subr.bf16.mxu0 %v13257_v52 }
 0x1d4   : > { %12357 = vmatmul.mubr.msk.f32.gmra.mrb[2].mxu0 %vm640_vm0, %v17922_v55 }
 0x1d5   : > { %12359 = vmatprep.mubr.msk.f32.mxu0 %vm640_vm0, %v17923_v56 }
 0x1d8   : > { %12360 = vmatmul.mubr.msk.f32.gmra.mrb[4].mxu0 %vm640_vm0, %v17924_v57 }
 0x1d9   : > { %12362 = vmatprep.mubr.msk.f32.mxu0 %vm640_vm0, %v17925_v63  ;;  %v17933_v63 = vld [vmem:[#allocation33_spill] sm:$0xff] }
 0x1dc   : > { %12363 = vmatmul.mubr.msk.f32.gmra.mrb[6].mxu0 %vm640_vm0, %v17926_v45  ;;  %v17934_v45 = vld [vmem:[#allocation34_spill] sm:$0xff] }
 0x1dd   : > { %12365 = vmatprep.mubr.msk.f32.mxu0 %vm640_vm0, %v17927_v46  ;;  %v17935_v46 = vld [vmem:[#allocation35_spill] sm:$0xff] }
 0x1e0   : > { %12366 = vmatmul.mubr.msk.f32.gmra.mrb[8].mxu0 %vm640_vm0, %v17928_v47  ;;  %v17936_v47 = vld [vmem:[#allocation36_spill] sm:$0xff] }
 0x1e1   : > { %12368 = vmatprep.mubr.msk.f32.mxu0 %vm640_vm0, %v17929_v48  ;;  %v17937_v48 = vld [vmem:[#allocation37_spill] sm:$0xff] }
 0x1e4   : > { %12369 = vmatmul.mubr.msk.f32.gmra.mrb[10].mxu0 %vm640_vm0, %v17930_v49  ;;  %v17938_v49 = vld [vmem:[#allocation38_spill] sm:$0xff] }
 0x1e5   : > { %12371 = vmatprep.mubr.msk.f32.mxu0 %vm640_vm0, %v17931_v50  ;;  %v17939_v50 = vld [vmem:[#allocation39_spill] sm:$0xff] }
 0x1e8   : > { %12372 = vmatmul.mubr.msk.f32.gmra.mrb[12].mxu0 %vm640_vm0, %v17932_v53  ;;  %v17940_v53 = vld [vmem:[#allocation40_spill] sm:$0xff] }
 0x1e9   : > { %12374 = vmatprep.mubr.msk.f32.mxu0 %vm640_vm0, %v17933_v63  ;;  %v17941_v63 = vld [vmem:[#allocation41_spill] sm:$0xff] }
 0x1ec   : > { %12375 = vmatmul.mubr.msk.f32.gmra.mrb[14].mxu0 %vm640_vm0, %v17934_v45  ;;  %v17942_v45 = vld [vmem:[#allocation42_spill] sm:$0xff] }
 0x1ed   : > { %12377 = vmatprep.mubr.msk.f32.mxu0 %vm640_vm0, %v17935_v46  ;;  %v17943_v46 = vld [vmem:[#allocation43_spill] sm:$0xff] }
 0x1f0   : > { %12378 = vmatmul.mubr.msk.f32.gmra.mrb[16].mxu0 %vm640_vm0, %v17936_v47  ;;  %v17944_v47 = vld [vmem:[#allocation45_spill] sm:$0xff] }
 0x1f1   : > { %12380 = vmatprep.mubr.msk.f32.mxu0 %vm640_vm0, %v17937_v48  ;;  %v17945_v48 = vld [vmem:[#allocation47_spill] sm:$0xff] }
 0x1f4   : > { %12381 = vmatmul.mubr.msk.f32.gmra.mrb[18].mxu0 %vm640_vm0, %v17938_v49 }
 0x1f5   : > { %12383 = vmatprep.mubr.msk.f32.mxu0 %vm640_vm0, %v17939_v50 }
 0x1f8   : > { %12384 = vmatmul.mubr.msk.f32.gmra.mrb[20].mxu0 %vm640_vm0, %v17940_v53  ;;  %v15375_v53 = vld [vmem:[#allocation2 + $0x182] sm:$0xff] }
 0x1f9   : > { %12386 = vmatprep.mubr.msk.f32.mxu0 %vm640_vm0, %v17941_v63 }
 0x1fc   : > { %12387 = vmatmul.mubr.msk.f32.gmra.mrb[22].mxu0 %vm640_vm0, %v17942_v45  ;;  %v3803_v45 = vld [vmem:[#allocation7 + $0x88] sm:$0xff] }
 0x1fd   : > { %12389 = vmatprep.mubr.msk.f32.mxu0 %vm640_vm0, %v17943_v46  ;;  %v15381_v46 = vld [vmem:[#allocation2 + $0x18a] sm:$0xff] }
 0x200   : > { %12390 = vmatmul.mubr.msk.f32.gmra.mrb[24].mxu0 %vm640_vm0, %v17944_v47  ;;  %v3802_v47 = vld [vmem:[#allocation7 + $0x80] sm:$0xff] }
 0x201   : > { %12392 = vmatprep.mubr.msk.f32.mxu0 %vm640_vm0, %v17945_v48 }
 0x204   : > { %12393 = vmatmul.mubr.msk.f32.gmra.mrb[26].mxu0 %vm640_vm0, %v15162_v58  ;;  %v13261_v58 = vpack.c.bf16 %v3803_v45, %v3802_v47 }
 0x205   : > { %12395 = vmatprep.mubr.msk.f32.mxu0 %vm640_vm0, %v15168_v30 }
 0x208   : > { %12396 = vmatmul.mubr.msk.f32.gmra.mrb[28].mxu0 %vm640_vm0, %v15176_v60 }
 0x209   : > { %12398 = vmatprep.mubr.msk.f32.mxu0 %vm640_vm0, %v15375_v53 }
 0x20c   : > { %12399 = vmatmul.mubr.msk.f32.gmra.mrb[30].mxu0 %vm640_vm0, %v15381_v46 }
 0x20d   : > { %12405 = vmatprep.mubr.msk.f32.mxu0 %vm640_vm0, %v14867_v2  ;;  %v3023_v2 = vld [vmem:[#allocation2 + $0x198] sm:$0xff] }
 0x210   : > { %12406 = vmatmul.mubr.msk.f32.vlgmr.msra.gmra.mrb[0].mxu0 %vm640_vm0, %v14874_v3  ;;  %v3024_v3 = vld [vmem:[#allocation2 + $0x1a0] sm:$0xff] }
 0x211   : > { %13260 = vmatpush3.bf16.msra.mxu0 %v13257_v52  ;;  %12408 = vmatprep.mubr.msk.f32.mxu0 %vm640_vm0, %v14876_v4  ;;  %v3381_v4 = vld [vmem:[#allocation2 + $0x31] sm:$0xff] }
 0x212   : > { %13262 = vmatprep.subr.bf16.mxu0 %v13261_v58 }
 0x214   : > { %12409 = vmatmul.mubr.msk.f32.gmra.mrb[2].mxu0 %vm640_vm0, %v14882_v51  ;;  %v4457_v51 = vld [vmem:[#allocation9 + $0x20] sm:$0xff] }
 0x215   : > { %12411 = vmatprep.mubr.msk.f32.mxu0 %vm640_vm0, %v14884_v5  ;;  %v4458_v5 = vld [vmem:[#allocation9 + $0x28] sm:$0xff] }
 0x218   : > { %12412 = vmatmul.mubr.msk.f32.gmra.mrb[4].mxu0 %vm640_vm0, %v14890_v6  ;;  %v4459_v6 = vld [vmem:[#allocation9 + $0x30] sm:$0xff] }
 0x219   : > { %12414 = vmatprep.mubr.msk.f32.mxu0 %vm640_vm0, %v14892_v7  ;;  %v3382_v7 = vld [vmem:[#allocation2 + $0x39] sm:$0xff] }
 0x21c   : > { %12415 = vmatmul.mubr.msk.f32.gmra.mrb[6].mxu0 %vm640_vm0, %v14898_v8  ;;  %v13265_v8 = vpack.c.bf16 %v4458_v5, %v4457_v51  ;;  %v5136_v51 = vld [vmem:[#allocation9 + $0x40] sm:$0xff]  ;;  %v5137_v5 = vld [vmem:[#allocation9 + $0x48] sm:$0xff] }
 0x21d   : > { %12417 = vmatprep.mubr.msk.f32.mxu0 %vm640_vm0, %v14900_v9  ;;  %v4460_v9 = vld [vmem:[#allocation9 + $0x38] sm:$0xff] }
 0x21e   : > { %13266 = vmatprep.subr.bf16.mxu1 %v13265_v8 }
 0x21f   : > { %13268 = vmatpush3.bf16.msra.mxu1 %v13265_v8 }
 0x220   : > { %12418 = vmatmul.mubr.msk.f32.gmra.mrb[8].mxu0 %vm640_vm0, %v14906_v12  ;;  %v3383_v12 = vld [vmem:[#allocation2 + $0x49] sm:$0xff] }
 0x221   : > { %12420 = vmatprep.mubr.msk.f32.mxu0 %vm640_vm0, %v14908_v13  ;;  %v13269_v13 = vpack.c.bf16 %v4460_v9, %v4459_v6  ;;  %v15701_v6 = vpack.c.bf16 %v5137_v5, %v5136_v51  ;;  %v15712_v9 = vld [vmem:[%s17702_s5] ss:$0 sm:$0xff] }
 0x223   : > { %13270 = vmatprep.subr.bf16.mxu1 %v13269_v13 }
 0x224   : > { %12421 = vmatmul.mubr.msk.f32.gmra.mrb[10].mxu0 %vm640_vm0, %v14914_v14  ;;  %v3384_v14 = vld [vmem:[#allocation2 + $0x51] sm:$0xff]  ;;  %13272 = vmatpush3.bf16.msra.mxu1 %v13269_v13 }
 0x225   : > { %12423 = vmatprep.mubr.msk.f32.mxu0 %vm640_vm0, %v14916_v15  ;;  %v3385_v15 = vld [vmem:[#allocation2 + $0x61] sm:$0xff] }
 0x228   : > { %12424 = vmatmul.mubr.msk.f32.gmra.mrb[12].mxu0 %vm640_vm0, %v14922_v16  ;;  %v3386_v16 = vld [vmem:[#allocation2 + $0x69] sm:$0xff] }
 0x229   : > { %12426 = vmatprep.mubr.msk.f32.mxu0 %vm640_vm0, %v14924_v17  ;;  %v3387_v17 = vld [vmem:[#allocation2 + $0x79] sm:$0xff] }
 0x22c   : > { %12427 = vmatmul.mubr.msk.f32.gmra.mrb[14].mxu0 %vm640_vm0, %v14930_v18  ;;  %v3388_v18 = vld [vmem:[#allocation2 + $0x81] sm:$0xff] }
 0x22d   : > { %12429 = vmatprep.mubr.msk.f32.mxu0 %vm640_vm0, %v14932_v19  ;;  %v3389_v19 = vld [vmem:[#allocation2 + $0x91] sm:$0xff] }
 0x230   : > { %12430 = vmatmul.mubr.msk.f32.gmra.mrb[16].mxu0 %vm640_vm0, %v14938_v21  ;;  %v3390_v21 = vld [vmem:[#allocation2 + $0x99] sm:$0xff] }
 0x231   : > { %12432 = vmatprep.mubr.msk.f32.mxu0 %vm640_vm0, %v14940_v22  ;;  %v3391_v22 = vld [vmem:[#allocation2 + $0xa9] sm:$0xff] }
 0x234   : > { %12433 = vmatmul.mubr.msk.f32.gmra.mrb[18].mxu0 %vm640_vm0, %v14946_v23  ;;  %v3392_v23 = vld [vmem:[#allocation2 + $0xb1] sm:$0xff] }
 0x235   : > { %12435 = vmatprep.mubr.msk.f32.mxu0 %vm640_vm0, %v14948_v24  ;;  %v3412_v24 = vld [vmem:[#allocation2 + $0x1a1] sm:$0xff] }
 0x238   : > { %12436 = vmatmul.mubr.msk.f32.gmra.mrb[20].mxu0 %vm640_vm0, %v14954_v25  ;;  %v17946_v25 = vld [vmem:[#allocation25_spill] sm:$0xff] }
 0x239   : > { %12438 = vmatprep.mubr.msk.f32.mxu0 %vm640_vm0, %v14956_v26  ;;  %v17947_v26 = vld [vmem:[#allocation26_spill] sm:$0xff] }
 0x23c   : > { %12439 = vmatmul.mubr.msk.f32.gmra.mrb[22].mxu0 %vm640_vm0, %v14966_v33  ;;  %v17948_v33 = vld [vmem:[#allocation27_spill] sm:$0xff] }
 0x23d   : > { %12441 = vmatprep.mubr.msk.f32.mxu0 %vm640_vm0, %v14969_v35  ;;  %v17949_v35 = vld [vmem:[#allocation28_spill] sm:$0xff] }
 0x240   : > { %12442 = vmatmul.mubr.msk.f32.gmra.mrb[24].mxu0 %vm640_vm0, %v14978_v10  ;;  %v17950_v10 = vld [vmem:[#allocation29_spill] sm:$0xff] }
 0x241   : > { %12444 = vmatprep.mubr.msk.f32.mxu0 %vm640_vm0, %v14980_v38  ;;  %v17951_v38 = vld [vmem:[#allocation30_spill] sm:$0xff] }
 0x244   : > { %12445 = vmatmul.mubr.msk.f32.gmra.mrb[26].mxu0 %vm640_vm0, %v14986_v11  ;;  %v17952_v11 = vld [vmem:[#allocation31_spill] sm:$0xff] }
 0x245   : > { %12447 = vmatprep.mubr.msk.f32.mxu0 %vm640_vm0, %v15239_v62  ;;  %v17964_v62 = vmov 0.0  }
 0x246   : > { %4305 = vst.msk [vmem:[#allocation3 + $0x20] sm:$0xff] %vm4299_vm2, %v17964_v62  ;;  %4300 = vst.msk [vmem:[#allocation3] sm:$0xff] %vm4299_vm2, %v17964_v62 }
 0x247   : > { %4301 = vst.msk [vmem:[#allocation3 + $0x8] sm:$0xff] %vm4299_vm2, %v17964_v62  ;;  %4304 = vst.msk [vmem:[#allocation3 + $0x18] sm:$0xff] %vm4299_vm2, %v17964_v62 }
 0x248   : > { %12448 = vmatmul.mubr.msk.f32.gmra.mrb[28].mxu0 %vm640_vm0, %v15245_v1  ;;  %4307 = vst.msk [vmem:[#allocation3 + $0x30] sm:$0xff] %vm4299_vm2, %v17964_v62  ;;  %4308 = vst.msk [vmem:[#allocation3 + $0x38] sm:$0xff] %vm4299_vm2, %v17964_v62  ;;  %v4420_v1 = vld [vmem:[#allocation9] sm:$0xff] }
 0x249   : > { %12450 = vmatprep.mubr.msk.f32.mxu0 %vm640_vm0, %v3023_v2  ;;  %4310 = vst.msk [vmem:[#allocation3 + $0x48] sm:$0xff] %vm4299_vm2, %v17964_v62  ;;  %4311 = vst.msk [vmem:[#allocation3 + $0x50] sm:$0xff] %vm4299_vm2, %v17964_v62 }
 0x24a   : > { %4313 = vst.msk [vmem:[#allocation3 + $0x60] sm:$0xff] %vm4299_vm2, %v17964_v62  ;;  %4314 = vst.msk [vmem:[#allocation3 + $0x68] sm:$0xff] %vm4299_vm2, %v17964_v62 }
 0x24b   : > { %4316 = vst.msk [vmem:[#allocation3 + $0x78] sm:$0xff] %vm4299_vm2, %v17964_v62  ;;  %4317 = vst.msk [vmem:[#allocation3 + $0x80] sm:$0xff] %vm4299_vm2, %v17964_v62 }
 0x24c   : > { %12451 = vmatmul.mubr.msk.f32.gmra.mrb[30].mxu0 %vm640_vm0, %v3024_v3  ;;  %4319 = vst.msk [vmem:[#allocation3 + $0x90] sm:$0xff] %vm4299_vm2, %v17964_v62  ;;  %4320 = vst.msk [vmem:[#allocation3 + $0x98] sm:$0xff] %vm4299_vm2, %v17964_v62 }
 0x24d   : > { %12457 = vmatprep.mubr.msk.f32.mxu0 %vm640_vm0, %v3381_v4  ;;  %4322 = vst.msk [vmem:[#allocation3 + $0xa8] sm:$0xff] %vm4299_vm2, %v17964_v62  ;;  %4323 = vst.msk [vmem:[#allocation3 + $0xb0] sm:$0xff] %vm4299_vm2, %v17964_v62 }
 0x24e   : > { %4325 = vst.msk [vmem:[#allocation3 + $0xc0] sm:$0xff] %vm4299_vm2, %v17964_v62  ;;  %4326 = vst.msk [vmem:[#allocation3 + $0xc8] sm:$0xff] %vm4299_vm2, %v17964_v62 }
 0x24f   : > { %4328 = vst.msk [vmem:[#allocation3 + $0xd8] sm:$0xff] %vm4299_vm2, %v17964_v62  ;;  %4329 = vst.msk [vmem:[#allocation3 + $0xe0] sm:$0xff] %vm4299_vm2, %v17964_v62 }
 0x250   : > { %12458 = vmatmul.mubr.msk.f32.vlgmr.msra.gmra.mrb[0].mxu0 %vm640_vm0, %v3382_v7  ;;  %4331 = vst.msk [vmem:[#allocation3 + $0xf0] sm:$0xff] %vm4299_vm2, %v17964_v62  ;;  %4332 = vst.msk [vmem:[#allocation3 + $0xf8] sm:$0xff] %vm4299_vm2, %v17964_v62  ;;  %v15707_v7 = vld [vmem:[%s17701_s4] ss:$0 sm:$0xff] }
 0x251   : > { %13264 = vmatpush3.bf16.msra.mxu0 %v13261_v58  ;;  %12460 = vmatprep.mubr.msk.f32.mxu0 %vm640_vm0, %v3383_v12  ;;  %v17954_v58 = vld [vmem:[#allocation33_spill] sm:$0xff]  ;;  %4334 = vst.msk [vmem:[#allocation3 + $0x108] sm:$0xff] %vm4299_vm2, %v17964_v62  ;;  %4335 = vst.msk [vmem:[#allocation3 + $0x110] sm:$0xff] %vm4299_vm2, %v17964_v62 }
 0x252   : > { %4337 = vst.msk [vmem:[#allocation3 + $0x120] sm:$0xff] %vm4299_vm2, %v17964_v62  ;;  %4338 = vst.msk [vmem:[#allocation3 + $0x128] sm:$0xff] %vm4299_vm2, %v17964_v62 }
 0x253   : > { %4340 = vst.msk [vmem:[#allocation3 + $0x138] sm:$0xff] %vm4299_vm2, %v17964_v62  ;;  %4341 = vst.msk [vmem:[#allocation3 + $0x140] sm:$0xff] %vm4299_vm2, %v17964_v62 }
 0x254   : > { %12461 = vmatmul.mubr.msk.f32.gmra.mrb[2].mxu0 %vm640_vm0, %v3384_v14  ;;  %4343 = vst.msk [vmem:[#allocation3 + $0x150] sm:$0xff] %vm4299_vm2, %v17964_v62  ;;  %4344 = vst.msk [vmem:[#allocation3 + $0x158] sm:$0xff] %vm4299_vm2, %v17964_v62 }
 0x255   : > { %12463 = vmatprep.mubr.msk.f32.mxu0 %vm640_vm0, %v3385_v15  ;;  %4346 = vst.msk [vmem:[#allocation3 + $0x168] sm:$0xff] %vm4299_vm2, %v17964_v62  ;;  %4347 = vst.msk [vmem:[#allocation3 + $0x170] sm:$0xff] %vm4299_vm2, %v17964_v62 }
 0x256   : > { %4349 = vst.msk [vmem:[#allocation3 + $0x180] sm:$0xff] %vm4299_vm2, %v17964_v62  ;;  %4350 = vst.msk [vmem:[#allocation3 + $0x188] sm:$0xff] %vm4299_vm2, %v17964_v62 }
 0x257   : > { %4352 = vst.msk [vmem:[#allocation3 + $0x198] sm:$0xff] %vm4299_vm2, %v17964_v62  ;;  %4353 = vst.msk [vmem:[#allocation3 + $0x1a0] sm:$0xff] %vm4299_vm2, %v17964_v62 }
 0x258   : > { %12464 = vmatmul.mubr.msk.f32.gmra.mrb[4].mxu0 %vm640_vm0, %v3386_v16  ;;  %4306 = vst.msk [vmem:[#allocation3 + $0x28] sm:$0x3] %vm4302_vm3, %v17964_v62  ;;  %4303 = vst.msk [vmem:[#allocation3 + $0x10] sm:$0x3] %vm4302_vm3, %v17964_v62 }
 0x259   : > { %12466 = vmatprep.mubr.msk.f32.mxu0 %vm640_vm0, %v3387_v17  ;;  %4309 = vst.msk [vmem:[#allocation3 + $0x40] sm:$0x3] %vm4302_vm3, %v17964_v62  ;;  %4312 = vst.msk [vmem:[#allocation3 + $0x58] sm:$0x3] %vm4302_vm3, %v17964_v62 }
 0x25a   : > { %4315 = vst.msk [vmem:[#allocation3 + $0x70] sm:$0x3] %vm4302_vm3, %v17964_v62  ;;  %4318 = vst.msk [vmem:[#allocation3 + $0x88] sm:$0x3] %vm4302_vm3, %v17964_v62 }
 0x25b   : > { %4321 = vst.msk [vmem:[#allocation3 + $0xa0] sm:$0x3] %vm4302_vm3, %v17964_v62  ;;  %4324 = vst.msk [vmem:[#allocation3 + $0xb8] sm:$0x3] %vm4302_vm3, %v17964_v62 }
 0x25c   : > { %12467 = vmatmul.mubr.msk.f32.gmra.mrb[6].mxu0 %vm640_vm0, %v3388_v18  ;;  %4327 = vst.msk [vmem:[#allocation3 + $0xd0] sm:$0x3] %vm4302_vm3, %v17964_v62  ;;  %4330 = vst.msk [vmem:[#allocation3 + $0xe8] sm:$0x3] %vm4302_vm3, %v17964_v62 }
 0x25d   : > { %12469 = vmatprep.mubr.msk.f32.mxu0 %vm640_vm0, %v3389_v19  ;;  %4333 = vst.msk [vmem:[#allocation3 + $0x100] sm:$0x3] %vm4302_vm3, %v17964_v62  ;;  %4336 = vst.msk [vmem:[#allocation3 + $0x118] sm:$0x3] %vm4302_vm3, %v17964_v62 }
 0x25e   : > { %4339 = vst.msk [vmem:[#allocation3 + $0x130] sm:$0x3] %vm4302_vm3, %v17964_v62  ;;  %4342 = vst.msk [vmem:[#allocation3 + $0x148] sm:$0x3] %vm4302_vm3, %v17964_v62 }
 0x25f   : > { %4345 = vst.msk [vmem:[#allocation3 + $0x160] sm:$0x3] %vm4302_vm3, %v17964_v62  ;;  %4348 = vst.msk [vmem:[#allocation3 + $0x178] sm:$0x3] %vm4302_vm3, %v17964_v62 }
 0x260   : > { %12470 = vmatmul.mubr.msk.f32.gmra.mrb[8].mxu0 %vm640_vm0, %v3390_v21  ;;  %4351 = vst.msk [vmem:[#allocation3 + $0x190] sm:$0x3] %vm4302_vm3, %v17964_v62  ;;  %4354 = vst.msk [vmem:[#allocation3 + $0x1a8] sm:$0x3] %vm4302_vm3, %v17964_v62  ;;  %v5529_v62 = vld [vmem:[#allocation9 + $0x78] sm:$0xff] }
 0x261   : > { %12472 = vmatprep.mubr.msk.f32.mxu0 %vm640_vm0, %v3391_v22 }
 0x264   : > { %12473 = vmatmul.mubr.msk.f32.gmra.mrb[10].mxu0 %vm640_vm0, %v3392_v23 }
 0x265   : > { %12475 = vmatprep.mubr.msk.f32.mxu0 %vm640_vm0, %v15046_v36  ;;  %v17961_v36 = vld [vmem:[#allocation43_spill] sm:$0xff] }
 0x268   : > { %12476 = vmatmul.mubr.msk.f32.gmra.mrb[12].mxu0 %vm640_vm0, %v15052_v40  ;;  %v17963_v40 = vld [vmem:[#allocation49_spill] sm:$0xff] }
 0x269   : > { %12478 = vmatprep.mubr.msk.f32.mxu0 %vm640_vm0, %v15062_v43  ;;  %v3800_v43 = vld [vmem:[#allocation2 + $0x1a2] sm:$0xff] }
 0x26c   : > { %12479 = vmatmul.mubr.msk.f32.gmra.mrb[14].mxu0 %vm640_vm0, %v15068_v34  ;;  %v17960_v34 = vld [vmem:[#allocation42_spill] sm:$0xff] }
 0x26d   : > { %12481 = vmatprep.mubr.msk.f32.mxu0 %vm640_vm0, %v15078_v39  ;;  %v17962_v39 = vld [vmem:[#allocation45_spill] sm:$0xff] }
 0x270   : > { %12482 = vmatmul.mubr.msk.f32.gmra.mrb[16].mxu0 %vm640_vm0, %v15084_v31  ;;  %v17958_v31 = vld [vmem:[#allocation37_spill] sm:$0xff] }
 0x271   : > { %12484 = vmatprep.mubr.msk.f32.mxu0 %vm640_vm0, %v15094_v0  ;;  %v3411_v0 = vld [vmem:[#allocation2 + $0x199] sm:$0xff] }
 0x274   : > { %12485 = vmatmul.mubr.msk.f32.gmra.mrb[18].mxu0 %vm640_vm0, %v15100_v29  ;;  %v17957_v29 = vld [vmem:[#allocation36_spill] sm:$0xff] }
 0x275   : > { %12487 = vmatprep.mubr.msk.f32.mxu0 %vm640_vm0, %v15110_v41  ;;  %v3799_v41 = vld [vmem:[#allocation2 + $0x19a] sm:$0xff] }
 0x278   : > { %12488 = vmatmul.mubr.msk.f32.gmra.mrb[20].mxu0 %vm640_vm0, %v15116_v61  ;;  %v17956_v61 = vld [vmem:[#allocation35_spill] sm:$0xff] }
 0x279   : > { %12490 = vmatprep.mubr.msk.f32.mxu0 %vm640_vm0, %v15126_v32  ;;  %v17959_v32 = vld [vmem:[#allocation40_spill] sm:$0xff] }
 0x27c   : > { %12491 = vmatmul.mubr.msk.f32.gmra.mrb[22].mxu0 %vm640_vm0, %v15132_v59  ;;  %v17955_v59 = vld [vmem:[#allocation34_spill] sm:$0xff] }
 0x27d   : > { %12493 = vmatprep.mubr.msk.f32.mxu0 %vm640_vm0, %v17916_v20  ;;  %v4421_v20 = vld [vmem:[#allocation9 + $0x8] sm:$0xff] }
 0x280   : > { %12494 = vmatmul.mubr.msk.f32.gmra.mrb[24].mxu0 %vm640_vm0, %v17917_v27  ;;  %v13273_v27 = vpack.c.bf16 %v4421_v20, %v4420_v1 }
 0x281   : > { %12496 = vmatprep.mubr.msk.f32.mxu0 %vm640_vm0, %v17918_v28  ;;  %v15669_v28 = vpop.f32.mrb[0].mxu1 }
 0x282   : > { %13274 = vmatprep.subr.bf16.mxu1 %v13273_v27 }
 0x284   : > { %12497 = vmatmul.mubr.msk.f32.gmra.mrb[26].mxu0 %vm640_vm0, %v15164_v44  ;;  %v17953_v44 = vld [vmem:[#allocation32_spill] sm:$0xff] }
 0x285   : > { %12499 = vmatprep.mubr.msk.f32.mxu0 %vm640_vm0, %v15307_v37  ;;  %v15671_v37 = vpop.f32.mrb[1].mxu1 }
 0x288   : > { %12500 = vmatmul.mubr.msk.f32.gmra.mrb[28].mxu0 %vm640_vm0, %v15313_v42  ;;  %v15673_v42 = vpop.f32.mrb[2].mxu1 }
 0x289   : > { %12502 = vmatprep.mubr.msk.f32.mxu0 %vm640_vm0, %v3411_v0  ;;  %v15675_v52 = vpop.f32.mrb[3].mxu1 }
 0x28c   : > { %12503 = vmatmul.mubr.msk.f32.gmra.mrb[30].mxu0 %vm640_vm0, %v3412_v24 }
 0x28d   : > { %12509 = vmatprep.mubr.msk.f32.mxu0 %vm640_vm0, %v17921_v54  ;;  %v15677_v54 = vpop.f32.mrb[4].mxu1 }
 0x290   : > { %12510 = vmatmul.mubr.msk.f32.vlgmr.msra.gmra.mrb[0].mxu0 %vm640_vm0, %v17922_v55  ;;  %v15679_v55 = vpop.f32.mrb[5].mxu1 }
 0x291   : > { %12512 = vmatprep.mubr.msk.f32.mxu0 %vm640_vm0, %v17923_v56  ;;  %v15681_v56 = vpop.f32.mrb[6].mxu1 }
 0x294   : > { %12513 = vmatmul.mubr.msk.f32.gmra.mrb[2].mxu0 %vm640_vm0, %v17924_v57  ;;  %v15683_v57 = vpop.f32.mrb[7].mxu1 }
 0x295   : > { %12515 = vmatprep.mubr.msk.f32.mxu0 %vm640_vm0, %v17946_v25 }
 0x298   : > { %12516 = vmatmul.mubr.msk.f32.gmra.mrb[4].mxu0 %vm640_vm0, %v17947_v26 }
 0x299   : > { %12518 = vmatprep.mubr.msk.f32.mxu0 %vm640_vm0, %v17948_v33 }
 0x29c   : > { %12519 = vmatmul.mubr.msk.f32.gmra.mrb[6].mxu0 %vm640_vm0, %v17949_v35 }
 0x29d   : > { %12521 = vmatprep.mubr.msk.f32.mxu0 %vm640_vm0, %v17950_v10 }
 0x2a0   : > { %12522 = vmatmul.mubr.msk.f32.gmra.mrb[8].mxu0 %vm640_vm0, %v17951_v38 }
 0x2a1   : > { %12524 = vmatprep.mubr.msk.f32.mxu0 %vm640_vm0, %v17952_v11 }
 0x2a4   : > { %12525 = vmatmul.mubr.msk.f32.gmra.mrb[10].mxu0 %vm640_vm0, %v17953_v44 }
 0x2a5   : > { %12527 = vmatprep.mubr.msk.f32.mxu0 %vm640_vm0, %v17954_v58 }
 0x2a8   : > { %12528 = vmatmul.mubr.msk.f32.gmra.mrb[12].mxu0 %vm640_vm0, %v17955_v59 }
 0x2a9   : > { %12530 = vmatprep.mubr.msk.f32.mxu0 %vm640_vm0, %v17956_v61 }
 0x2ac   : > { %12531 = vmatmul.mubr.msk.f32.gmra.mrb[14].mxu0 %vm640_vm0, %v17957_v29 }
 0x2ad   : > { %12533 = vmatprep.mubr.msk.f32.mxu0 %vm640_vm0, %v17958_v31 }
 0x2b0   : > { %12534 = vmatmul.mubr.msk.f32.gmra.mrb[16].mxu0 %vm640_vm0, %v17938_v49  ;;  %v4423_v49 = vld [vmem:[#allocation9 + $0x18] sm:$0xff] }
 0x2b1   : > { %12536 = vmatprep.mubr.msk.f32.mxu0 %vm640_vm0, %v17939_v50 }
 0x2b4   : > { %12537 = vmatmul.mubr.msk.f32.gmra.mrb[18].mxu0 %vm640_vm0, %v17959_v32 }
 0x2b5   : > { %12539 = vmatprep.mubr.msk.f32.mxu0 %vm640_vm0, %v17941_v63  ;;  %v15685_v63 = vpop.f32.mrb[8].mxu1 }
 0x2b6   : > { %v15687_v45 = vpop.f32.mrb[9].mxu1 }
 0x2b8   : > { %12540 = vmatmul.mubr.msk.f32.gmra.mrb[20].mxu0 %vm640_vm0, %v17960_v34 }
 0x2b9   : > { %12542 = vmatprep.mubr.msk.f32.mxu0 %vm640_vm0, %v17961_v36 }
 0x2bc   : > { %12543 = vmatmul.mubr.msk.f32.gmra.mrb[22].mxu0 %vm640_vm0, %v17962_v39 }
 0x2bd   : > { %12545 = vmatprep.mubr.msk.f32.mxu0 %vm640_vm0, %v17945_v48  ;;  %v4422_v48 = vld [vmem:[#allocation9 + $0x10] sm:$0xff] }
 0x2be   : > { %v13277_v50 = vpack.c.bf16 %v4423_v49, %v4422_v48 }
 0x2c0   : > { %12546 = vmatmul.mubr.msk.f32.gmra.mrb[24].mxu0 %vm640_vm0, %v17963_v40 }
 0x2c1   : > { %12548 = vmatprep.mubr.msk.f32.mxu0 %vm640_vm0, %v15168_v30  ;;  %v4425_v30 = vld [vmem:[#allocation3 + $0x9] sm:$0xff] }
 0x2c4   : > { %12549 = vmatmul.mubr.msk.f32.gmra.mrb[26].mxu0 %vm640_vm0, %v15176_v60  ;;  %v4424_v60 = vld [vmem:[#allocation3 + $0x1] sm:$0xff] }
 0x2c5   : > { %12551 = vmatprep.mubr.msk.f32.mxu0 %vm640_vm0, %v15375_v53  ;;  %12565 = vmatprep.mubr.msk.f32.mxu1 %vm4299_vm2, %v4424_v60 }
 0x2c6   : > { %12566 = vmatmul.mubr.msk.f32.vlgmr.msra.gmra.mrb[16].mxu1 %vm4299_vm2, %v4425_v30 }
 0x2c7   : > { %13276 = vmatpush3.bf16.msra.mxu1 %v13273_v27 }
 0x2c8   : > { %12552 = vmatmul.mubr.msk.f32.gmra.mrb[28].mxu0 %vm640_vm0, %v15381_v46  ;;  %v15689_v46 = vpop.f32.mrb[10].mxu1  ;;  %13278 = vmatprep.subr.bf16.mxu1 %v13277_v50 }
 0x2c9   : > { %12554 = vmatprep.mubr.msk.f32.mxu0 %vm640_vm0, %v3799_v41  ;;  %v15691_v47 = vpop.f32.mrb[11].mxu1 }
 0x2ca   : > { %v15693_v53 = vpop.f32.mrb[12].mxu1 }
 0x2cb   : > { %v15695_v2 = vpop.f32.mrb[13].mxu1  ;;  %13280 = vmatpush3.bf16.msra.mxu1 %v13277_v50 }
 0x2cc   : > { %12555 = vmatmul.mubr.msk.f32.gmra.mrb[30].mxu0 %vm640_vm0, %v3800_v43  ;;  %v15697_v3 = vpop.f32.mrb[14].mxu1  ;;  %13282 = vmatprep.subr.bf16.mxu1 %v15701_v6 }
 0x2cd   : > { %v15699_v4 = vpop.f32.mrb[15].mxu1 }
 0x363   : > { %v12511_v8 = vpop.f32.mrb[0].mxu0 }
 0x364   : > { %v4165_v12 = vadd.f32 %v12511_v8, %v15707_v7  ;;  %v3966_v13 = vpop.f32.mrb[1].mxu0 }
 0x365   : > { %v4164_v14 = vadd.f32 %v15707_v7, %v3966_v13 }
 0x366   : > { %vm4197_vm4 = vcmp.ge.f32.partialorder %v4165_v12, 0.0  ;;  %v4236_v15 = vmul.f32 %v15712_v9, %v4165_v12 }
 0x367   : > { %vm4196_vm5 = vcmp.ge.f32.partialorder %v4164_v14, 0.0  ;;  %v4235_v16 = vmul.f32 %v15712_v9, %v4164_v14  ;;  %v12514_v17 = vpop.f32.mrb[2].mxu0 }
 0x368   : > { %v4268_v18 = vsel %vm4197_vm4, %v4165_v12, %v4236_v15  ;;  %v4167_v19 = vadd.f32 %v12514_v17, %v15707_v7  ;;  %v3976_v21 = vpop.f32.mrb[3].mxu0 }
 0x369   : > { %4357 = vst.msk [vmem:[#allocation3 + $0x21] sm:$0xff] %vm4299_vm2, %v4268_v18  ;;  %v4267_v22 = vsel %vm4196_vm5, %v4164_v14, %v4235_v16  ;;  %v4166_v23 = vadd.f32 %v15707_v7, %v3976_v21 }
 0x36a   : > { %4356 = vst.msk [vmem:[#allocation3 + $0x19] sm:$0xff] %vm4299_vm2, %v4267_v22  ;;  %vm4199_vm6 = vcmp.ge.f32.partialorder %v4167_v19, 0.0  ;;  %v4238_v0 = vmul.f32 %v15712_v9, %v4167_v19 }
 0x36b   : > { %vm4198_vm7 = vcmp.ge.f32.partialorder %v4166_v23, 0.0  ;;  %v4237_v24 = vmul.f32 %v15712_v9, %v4166_v23  ;;  %v12517_v25 = vpop.f32.mrb[4].mxu0 }
 0x36c   : > { %v4270_v26 = vsel %vm4199_vm6, %v4167_v19, %v4238_v0  ;;  %v4169_v33 = vadd.f32 %v12517_v25, %v15707_v7  ;;  %v3986_v35 = vpop.f32.mrb[5].mxu0 }
 0x36d   : > { %4359 = vst.msk [vmem:[#allocation3 + $0x39] sm:$0xff] %vm4299_vm2, %v4270_v26  ;;  %v4269_v10 = vsel %vm4198_vm7, %v4166_v23, %v4237_v24  ;;  %v4168_v38 = vadd.f32 %v15707_v7, %v3986_v35 }
 0x36e   : > { %4358 = vst.msk [vmem:[#allocation3 + $0x31] sm:$0xff] %vm4299_vm2, %v4269_v10  ;;  %vm4201_vm8 = vcmp.ge.f32.partialorder %v4169_v33, 0.0  ;;  %v4240_v11 = vmul.f32 %v15712_v9, %v4169_v33 }
 0x36f   : > { %vm4200_vm9 = vcmp.ge.f32.partialorder %v4168_v38, 0.0  ;;  %v4239_v44 = vmul.f32 %v15712_v9, %v4168_v38  ;;  %v12520_v58 = vpop.f32.mrb[6].mxu0 }
 0x370   : > { %v4272_v59 = vsel %vm4201_vm8, %v4169_v33, %v4240_v11  ;;  %v4171_v61 = vadd.f32 %v12520_v58, %v15707_v7  ;;  %v3996_v29 = vpop.f32.mrb[7].mxu0  ;;  %v15739_v39 = vld [vmem:[#allocation3 + $0x21] sm:$0xff] }
 0x371   : > { %4361 = vst.msk [vmem:[#allocation3 + $0x51] sm:$0xff] %vm4299_vm2, %v4272_v59  ;;  %v4271_v31 = vsel %vm4200_vm9, %v4168_v38, %v4239_v44  ;;  %v4170_v32 = vadd.f32 %v15707_v7, %v3996_v29  ;;  %v15733_v34 = vld [vmem:[#allocation3 + $0x19] sm:$0xff] }
 0x372   : > { %4360 = vst.msk [vmem:[#allocation3 + $0x49] sm:$0xff] %vm4299_vm2, %v4271_v31  ;;  %vm4203_vm10 = vcmp.ge.f32.partialorder %v4171_v61, 0.0  ;;  %v4242_v36 = vmul.f32 %v15712_v9, %v4171_v61  ;;  %12568 = vmatprep.mubr.msk.f32.mxu1 %vm4299_vm2, %v15733_v34 }
 0x373   : > { %vm4202_vm11 = vcmp.ge.f32.partialorder %v4170_v32, 0.0  ;;  %v4241_v40 = vmul.f32 %v15712_v9, %v4170_v32  ;;  %v12523_v41 = vpop.f32.mrb[8].mxu0  ;;  %12569 = vmatmul.mubr.msk.f32.gmra.mrb[18].mxu1 %vm4299_vm2, %v15739_v39 }
 0x374   : > { %v4274_v43 = vsel %vm4203_vm10, %v4171_v61, %v4242_v36  ;;  %v4173_v60 = vadd.f32 %v12523_v41, %v15707_v7  ;;  %v4006_v30 = vpop.f32.mrb[9].mxu0  ;;  %v15753_v49 = vld [vmem:[#allocation3 + $0x39] sm:$0xff] }
 0x375   : > { %4363 = vst.msk [vmem:[#allocation3 + $0x69] sm:$0xff] %vm4299_vm2, %v4274_v43  ;;  %v4273_v1 = vsel %vm4202_vm11, %v4170_v32, %v4241_v40  ;;  %v4172_v20 = vadd.f32 %v15707_v7, %v4006_v30  ;;  %v15747_v27 = vld [vmem:[#allocation3 + $0x31] sm:$0xff] }
 0x376   : > { %4362 = vst.msk [vmem:[#allocation3 + $0x61] sm:$0xff] %vm4299_vm2, %v4273_v1  ;;  %vm4205_vm12 = vcmp.ge.f32.partialorder %v4173_v60, 0.0  ;;  %v4244_v48 = vmul.f32 %v15712_v9, %v4173_v60  ;;  %12571 = vmatprep.mubr.msk.f32.mxu1 %vm4299_vm2, %v15747_v27 }
 0x377   : > { %vm4204_vm13 = vcmp.ge.f32.partialorder %v4172_v20, 0.0  ;;  %v4243_v50 = vmul.f32 %v15712_v9, %v4172_v20  ;;  %v12526_v51 = vpop.f32.mrb[10].mxu0  ;;  %12572 = vmatmul.mubr.msk.f32.gmra.mrb[20].mxu1 %vm4299_vm2, %v15753_v49 }
 0x378   : > { %v4276_v5 = vsel %vm4205_vm12, %v4173_v60, %v4244_v48  ;;  %v4175_v8 = vadd.f32 %v12526_v51, %v15707_v7  ;;  %v4016_v12 = vpop.f32.mrb[11].mxu0  ;;  %v15767_v17 = vld [vmem:[#allocation3 + $0x51] sm:$0xff] }
 0x379   : > { %4365 = vst.msk [vmem:[#allocation3 + $0x81] sm:$0xff] %vm4299_vm2, %v4276_v5  ;;  %v4275_v13 = vsel %vm4204_vm13, %v4172_v20, %v4243_v50  ;;  %v4174_v14 = vadd.f32 %v15707_v7, %v4016_v12  ;;  %v15761_v15 = vld [vmem:[#allocation3 + $0x49] sm:$0xff] }
 0x37a   : > { %4364 = vst.msk [vmem:[#allocation3 + $0x79] sm:$0xff] %vm4299_vm2, %v4275_v13  ;;  %vm4207_vm14 = vcmp.ge.f32.partialorder %v4175_v8, 0.0  ;;  %v4246_v16 = vmul.f32 %v15712_v9, %v4175_v8  ;;  %12574 = vmatprep.mubr.msk.f32.mxu1 %vm4299_vm2, %v15761_v15 }
 0x37b   : > { %vm4206_vm15 = vcmp.ge.f32.partialorder %v4174_v14, 0.0  ;;  %v4245_v18 = vmul.f32 %v15712_v9, %v4174_v14  ;;  %v12529_v19 = vpop.f32.mrb[12].mxu0  ;;  %12575 = vmatmul.mubr.msk.f32.gmra.mrb[22].mxu1 %vm4299_vm2, %v15767_v17 }
 0x37c   : > { %v4278_v21 = vsel %vm4207_vm14, %v4175_v8, %v4246_v16  ;;  %v4177_v22 = vadd.f32 %v12529_v19, %v15707_v7  ;;  %v4026_v23 = vpop.f32.mrb[13].mxu0  ;;  %v15781_v33 = vld [vmem:[#allocation3 + $0x69] sm:$0xff] }
 0x37d   : > { %4367 = vst.msk [vmem:[#allocation3 + $0x99] sm:$0xff] %vm4299_vm2, %v4278_v21  ;;  %v4277_v0 = vsel %vm4206_vm15, %v4174_v14, %v4245_v18  ;;  %v4176_v24 = vadd.f32 %v15707_v7, %v4026_v23  ;;  %v15775_v25 = vld [vmem:[#allocation3 + $0x61] sm:$0xff] }
 0x37e   : > { %4366 = vst.msk [vmem:[#allocation3 + $0x91] sm:$0xff] %vm4299_vm2, %v4277_v0  ;;  %vm4209_vm1 = vcmp.ge.f32.partialorder %v4177_v22, 0.0  ;;  %v4248_v26 = vmul.f32 %v15712_v9, %v4177_v22  ;;  %12577 = vmatprep.mubr.msk.f32.mxu1 %vm4299_vm2, %v15775_v25 }
 0x37f   : > { %vm4208_vm3 = vcmp.ge.f32.partialorder %v4176_v24, 0.0  ;;  %v4247_v35 = vmul.f32 %v15712_v9, %v4176_v24  ;;  %v12532_v10 = vpop.f32.mrb[14].mxu0  ;;  %12578 = vmatmul.mubr.msk.f32.gmra.mrb[24].mxu1 %vm4299_vm2, %v15781_v33 }
 0x380   : > { %v4280_v38 = vsel %vm4209_vm1, %v4177_v22, %v4248_v26  ;;  %v4179_v11 = vadd.f32 %v12532_v10, %v15707_v7  ;;  %v4036_v44 = vpop.f32.mrb[15].mxu0  ;;  %v15795_v31 = vld [vmem:[#allocation3 + $0x81] sm:$0xff] }
 0x381   : > { %4369 = vst.msk [vmem:[#allocation3 + $0xb1] sm:$0xff] %vm4299_vm2, %v4280_v38  ;;  %v4279_v58 = vsel %vm4208_vm3, %v4176_v24, %v4247_v35  ;;  %v4178_v59 = vadd.f32 %v15707_v7, %v4036_v44  ;;  %v15789_v61 = vld [vmem:[#allocation3 + $0x79] sm:$0xff] }
 0x382   : > { %4368 = vst.msk [vmem:[#allocation3 + $0xa9] sm:$0xff] %vm4299_vm2, %v4279_v58  ;;  %vm4211_vm4 = vcmp.ge.f32.partialorder %v4179_v11, 0.0  ;;  %v4250_v29 = vmul.f32 %v15712_v9, %v4179_v11  ;;  %12580 = vmatprep.mubr.msk.f32.mxu1 %vm4299_vm2, %v15789_v61 }
 0x383   : > { %vm4210_vm5 = vcmp.ge.f32.partialorder %v4178_v59, 0.0  ;;  %v4249_v32 = vmul.f32 %v15712_v9, %v4178_v59  ;;  %v12535_v36 = vpop.f32.mrb[16].mxu0  ;;  %12581 = vmatmul.mubr.msk.f32.gmra.mrb[26].mxu1 %vm4299_vm2, %v15795_v31 }
 0x384   : > { %v4282_v40 = vsel %vm4211_vm4, %v4179_v11, %v4250_v29  ;;  %v13403_v41 = vadd.f32 %v12535_v36, %v15669_v28  ;;  %v4046_v43 = vpop.f32.mrb[17].mxu0  ;;  %v15809_v48 = vld [vmem:[#allocation3 + $0x99] sm:$0xff] }
 0x385   : > { %4371 = vst.msk [vmem:[#allocation3 + $0xc9] sm:$0xff] %vm4299_vm2, %v4282_v40  ;;  %v4281_v60 = vsel %vm4210_vm5, %v4178_v59, %v4249_v32  ;;  %v13404_v30 = vadd.f32 %v4046_v43, %v15671_v37  ;;  %v15803_v1 = vld [vmem:[#allocation3 + $0x91] sm:$0xff] }
 0x386   : > { %4370 = vst.msk [vmem:[#allocation3 + $0xc1] sm:$0xff] %vm4299_vm2, %v4281_v60  ;;  %v4181_v20 = vadd.f32 %v13403_v41, %v15707_v7  ;;  %12583 = vmatprep.mubr.msk.f32.mxu1 %vm4299_vm2, %v15803_v1 }
 0x387   : > { %v4180_v50 = vadd.f32 %v13404_v30, %v15707_v7  ;;  %v12538_v28 = vpop.f32.mrb[18].mxu0  ;;  %12584 = vmatmul.mubr.msk.f32.gmra.mrb[28].mxu1 %vm4299_vm2, %v15809_v48 }
 0x388   : > { %vm4213_vm6 = vcmp.ge.f32.partialorder %v4181_v20, 0.0  ;;  %v4252_v37 = vmul.f32 %v15712_v9, %v4181_v20  ;;  %v13405_v51 = vadd.f32 %v12538_v28, %v15673_v42  ;;  %v4056_v5 = vpop.f32.mrb[19].mxu0  ;;  %v15823_v18 = vld [vmem:[#allocation3 + $0xb1] sm:$0xff] }
 0x389   : > { %vm4212_vm7 = vcmp.ge.f32.partialorder %v4180_v50, 0.0  ;;  %v4251_v8 = vmul.f32 %v15712_v9, %v4180_v50  ;;  %v13406_v12 = vadd.f32 %v4056_v5, %v15675_v52  ;;  %v15818_v13 = vld [vmem:[#allocation3 + $0xa9] sm:$0xff] }
 0x38a   : > { %v4284_v14 = vsel %vm4213_vm6, %v4181_v20, %v4252_v37  ;;  %v4183_v16 = vadd.f32 %v13405_v51, %v15707_v7  ;;  %12586 = vmatprep.mubr.msk.f32.mxu1 %vm4299_vm2, %v15818_v13 }
 0x38b   : > { %4373 = vst.msk [vmem:[#allocation3 + $0xe1] sm:$0xff] %vm4299_vm2, %v4284_v14  ;;  %v4283_v19 = vsel %vm4212_vm7, %v4180_v50, %v4251_v8  ;;  %v4182_v42 = vadd.f32 %v13406_v12, %v15707_v7  ;;  %v12541_v21 = vpop.f32.mrb[20].mxu0  ;;  %12587 = vmatmul.mubr.msk.f32.gmra.mrb[30].mxu1 %vm4299_vm2, %v15823_v18 }
 0x38c   : > { %4372 = vst.msk [vmem:[#allocation3 + $0xd9] sm:$0xff] %vm4299_vm2, %v4283_v19  ;;  %vm4215_vm8 = vcmp.ge.f32.partialorder %v4183_v16, 0.0  ;;  %v4254_v52 = vmul.f32 %v15712_v9, %v4183_v16  ;;  %v13407_v22 = vadd.f32 %v12541_v21, %v15677_v54  ;;  %v4066_v23 = vpop.f32.mrb[21].mxu0  ;;  %v15839_v38 = vld [vmem:[#allocation3 + $0xc9] sm:$0xff] }
 0x38d   : > { %vm4214_vm9 = vcmp.ge.f32.partialorder %v4182_v42, 0.0  ;;  %v4253_v0 = vmul.f32 %v15712_v9, %v4182_v42  ;;  %v13408_v24 = vadd.f32 %v4066_v23, %v15679_v55  ;;  %v15834_v26 = vld [vmem:[#allocation3 + $0xc1] sm:$0xff] }
 0x38e   : > { %v4286_v35 = vsel %vm4215_vm8, %v4183_v16, %v4254_v52  ;;  %v4185_v10 = vadd.f32 %v13407_v22, %v15707_v7  ;;  %12589 = vmatprep.mubr.msk.f32.mxu1 %vm4299_vm2, %v15834_v26  ;;  %vm14253_vm8 = vmmov 0  }
 0x38f   : > { %4375 = vst.msk [vmem:[#allocation3 + $0xf9] sm:$0xff] %vm4299_vm2, %v4286_v35  ;;  %v4285_v11 = vsel %vm4214_vm9, %v4182_v42, %v4253_v0  ;;  %v4184_v54 = vadd.f32 %v13408_v24, %v15707_v7  ;;  %v12544_v44 = vpop.f32.mrb[22].mxu0  ;;  %12590 = vmatmul.mubr.msk.f32.gmra.mrb[32].mxu1 %vm4299_vm2, %v15839_v38  ;;  %vm8170_vm9 = vcmask 1041408  }
 0x390   : > { %4374 = vst.msk [vmem:[#allocation3 + $0xf1] sm:$0xff] %vm4299_vm2, %v4285_v11  ;;  %vm4217_vm10 = vcmp.ge.f32.partialorder %v4185_v10, 0.0  ;;  %v4256_v55 = vmul.f32 %v15712_v9, %v4185_v10  ;;  %v13409_v58 = vadd.f32 %v12544_v44, %v15681_v56  ;;  %v4076_v59 = vpop.f32.mrb[23].mxu0 }
 0x391   : > { %vm4216_vm11 = vcmp.ge.f32.partialorder %v4184_v54, 0.0  ;;  %v4255_v29 = vmul.f32 %v15712_v9, %v4184_v54  ;;  %v13410_v32 = vadd.f32 %v4076_v59, %v15683_v57 }
 0x392   : > { %v4288_v36 = vsel %vm4217_vm10, %v4185_v10, %v4256_v55  ;;  %v4187_v40 = vadd.f32 %v13409_v58, %v15707_v7  ;;  %v15860_v57 = vld [vmem:[#allocation3 + $0xe1] sm:$0xff]  ;;  %vm8166_vm10 = vcmask 15360  }
 0x393   : > { %4377 = vst.msk [vmem:[#allocation3 + $0x111] sm:$0xff] %vm4299_vm2, %v4288_v36  ;;  %v4287_v41 = vsel %vm4216_vm11, %v4184_v54, %v4255_v29  ;;  %v4186_v43 = vadd.f32 %v13410_v32, %v15707_v7  ;;  %v12547_v60 = vpop.f32.mrb[24].mxu0  ;;  %v15853_v30 = vld [vmem:[#allocation3 + $0xd9] sm:$0xff]  ;;  %vm8628_vm11 = vcmask 130112  }
 0x394   : > { %4376 = vst.msk [vmem:[#allocation3 + $0x109] sm:$0xff] %vm4299_vm2, %v4287_v41  ;;  %vm4219_vm12 = vcmp.ge.f32.partialorder %v4187_v40, 0.0  ;;  %v4258_v56 = vmul.f32 %v15712_v9, %v4187_v40  ;;  %v13411_v20 = vadd.f32 %v12547_v60, %v15685_v63  ;;  %v4086_v50 = vpop.f32.mrb[25].mxu0  ;;  %12592 = vmatprep.mubr.msk.f32.mxu1 %vm4299_vm2, %v15853_v30 }
 0x395   : > { %vm4218_vm13 = vcmp.ge.f32.partialorder %v4186_v43, 0.0  ;;  %v4257_v28 = vmul.f32 %v15712_v9, %v4186_v43  ;;  %v13412_v37 = vadd.f32 %v4086_v50, %v15687_v45  ;;  %12593 = vmatmul.mubr.msk.f32.gmra.mrb[34].mxu1 %vm4299_vm2, %v15860_v57 }
 0x396   : > { %v4290_v51 = vsel %vm4219_vm12, %v4187_v40, %v4258_v56  ;;  %v4189_v5 = vadd.f32 %v13411_v20, %v15707_v7  ;;  %v15876_v42 = vld [vmem:[#allocation3 + $0xf9] sm:$0xff]  ;;  %vm8765_vm12 = vcmask 1041409  }
 0x397   : > { %4379 = vst.msk [vmem:[#allocation3 + $0x129] sm:$0xff] %vm4299_vm2, %v4290_v51  ;;  %v4289_v63 = vsel %vm4218_vm13, %v4186_v43, %v4257_v28  ;;  %v4188_v8 = vadd.f32 %v13412_v37, %v15707_v7  ;;  %v12550_v12 = vpop.f32.mrb[26].mxu0  ;;  %v15869_v14 = vld [vmem:[#allocation3 + $0xf1] sm:$0xff]  ;;  %vm8767_vm13 = vcmask 1042434  }
 0x398   : > { %4378 = vst.msk [vmem:[#allocation3 + $0x121] sm:$0xff] %vm4299_vm2, %v4289_v63  ;;  %vm4221_vm14 = vcmp.ge.f32.partialorder %v4189_v5, 0.0  ;;  %v4260_v16 = vmul.f32 %v15712_v9, %v4189_v5  ;;  %v13413_v45 = vadd.f32 %v12550_v12, %v15689_v46  ;;  %v4096_v19 = vpop.f32.mrb[27].mxu0  ;;  %12595 = vmatprep.mubr.msk.f32.mxu1 %vm4299_vm2, %v15869_v14 }
 0x399   : > { %vm4220_vm15 = vcmp.ge.f32.partialorder %v4188_v8, 0.0  ;;  %v4259_v21 = vmul.f32 %v15712_v9, %v4188_v8  ;;  %v13414_v52 = vadd.f32 %v4096_v19, %v15691_v47  ;;  %12596 = vmatmul.mubr.msk.f32.gmra.mrb[36].mxu1 %vm4299_vm2, %v15876_v42  ;;  %v5138_v19 = vld [vmem:[#allocation9 + $0x50] sm:$0xff] }
 0x39a   : > { %v4292_v22 = vsel %vm4221_vm14, %v4189_v5, %v4260_v16  ;;  %v4191_v23 = vadd.f32 %v13413_v45, %v15707_v7  ;;  %v15892_v54 = vld [vmem:[#allocation3 + $0x111] sm:$0xff]  ;;  %v4388_v16 = vld [vmem:[#allocation3] sm:$0xff]  ;;  %vm8769_vm14 = vcmask 1043459  }
 0x39b   : > { %4381 = vst.msk [vmem:[#allocation3 + $0x141] sm:$0xff] %vm4299_vm2, %v4292_v22  ;;  %v4291_v46 = vsel %vm4220_vm15, %v4188_v8, %v4259_v21  ;;  %v4190_v0 = vadd.f32 %v13414_v52, %v15707_v7  ;;  %v12553_v24 = vpop.f32.mrb[28].mxu0  ;;  %v15885_v35 = vld [vmem:[#allocation3 + $0x109] sm:$0xff]  ;;  %v5139_v21 = vld [vmem:[#allocation9 + $0x58] sm:$0xff]  ;;  %vm8771_vm15 = vcmask 1044484  }
 0x39c   : > { %4380 = vst.msk [vmem:[#allocation3 + $0x139] sm:$0xff] %vm4299_vm2, %v4291_v46  ;;  %vm4223_vm1 = vcmp.ge.f32.partialorder %v4191_v23, 0.0  ;;  %v4262_v10 = vmul.f32 %v15712_v9, %v4191_v23  ;;  %v13415_v47 = vadd.f32 %v12553_v24, %v15693_v53  ;;  %v4106_v11 = vpop.f32.mrb[29].mxu0  ;;  %12598 = vmatprep.mubr.msk.f32.mxu1 %vm4299_vm2, %v15885_v35  ;;  %v4389_v52 = vld [vmem:[#allocation3 + $0x8] sm:$0xff]  ;;  %v13285_v22 = vpack.c.bf16 %v5139_v21, %v5138_v19 }
 0x39d   : > { %vm4222_vm3 = vcmp.ge.f32.partialorder %v4190_v0, 0.0  ;;  %v4261_v44 = vmul.f32 %v15712_v9, %v4190_v0  ;;  %v13416_v55 = vadd.f32 %v4106_v11, %v15695_v2  ;;  %12599 = vmatmul.mubr.msk.f32.gmra.mrb[38].mxu1 %vm4299_vm2, %v15892_v54  ;;  %v5527_v46 = vld [vmem:[#allocation9 + $0x68] sm:$0xff]  ;;  %v15964_v11 = vld [vmem:[#allocation3 + $0x38] sm:$0xff] }
 0x39e   : > { %v4294_v58 = vsel %vm4223_vm1, %v4191_v23, %v4262_v10  ;;  %v4193_v59 = vadd.f32 %v13415_v47, %v15707_v7  ;;  %v15908_v43 = vld [vmem:[#allocation3 + $0x129] sm:$0xff]  ;;  %v5526_v23 = vld [vmem:[#allocation9 + $0x60] sm:$0xff]  ;;  %vm8773_vm1 = vcmask 1045509  }
 0x39f   : > { %4383 = vst.msk [vmem:[#allocation3 + $0x159] sm:$0xff] %vm4299_vm2, %v4294_v58  ;;  %v4293_v53 = vsel %vm4222_vm3, %v4190_v0, %v4261_v44  ;;  %v4192_v29 = vadd.f32 %v13416_v55, %v15707_v7  ;;  %v12556_v32 = vpop.f32.mrb[30].mxu0  ;;  %v15901_v36 = vld [vmem:[#allocation3 + $0x121] sm:$0xff]  ;;  %17965 = vst [vmem:[#allocation44_spill] sm:$0xff] %v15908_v43  ;;  %v15948_v0 = vld [vmem:[#allocation3 + $0x18] sm:$0xff]  ;;  %v15953_v24 = vpack.c.bf16 %v5527_v46, %v5526_v23  ;;  %vm8775_vm3 = vcmask 1046534  }
 0x3a0   : > { %4382 = vst.msk [vmem:[#allocation3 + $0x151] sm:$0xff] %vm4299_vm2, %v4293_v53  ;;  %vm4225_vm4 = vcmp.ge.f32.partialorder %v4193_v59, 0.0  ;;  %v4264_v40 = vmul.f32 %v15712_v9, %v4193_v59  ;;  %v13417_v2 = vadd.f32 %v12556_v32, %v15697_v3  ;;  %v4116_v41 = vpop.f32.mrb[31].mxu0  ;;  %12601 = vmatprep.mubr.msk.f32.mxu1 %vm4299_vm2, %v15901_v36  ;;  %v15955_v10 = vld [vmem:[#allocation3 + $0x20] sm:$0xff]  ;;  %v15959_v47 = vld [vmem:[#allocation3 + $0x30] sm:$0xff]  ;;  %v15980_v58 = vld [vmem:[#allocation3 + $0x68] sm:$0xff] }
 0x3a1   : > { %vm4224_vm5 = vcmp.ge.f32.partialorder %v4192_v29, 0.0  ;;  %v4263_v60 = vmul.f32 %v15712_v9, %v4192_v29  ;;  %v13418_v56 = vadd.f32 %v4116_v41, %v15699_v4  ;;  %12602 = vmatmul.mubr.msk.f32.gmra.mrb[40].mxu1 %vm4299_vm2, %v15908_v43  ;;  %v15972_v44 = vld [vmem:[#allocation3 + $0x50] sm:$0xff]  ;;  %v15976_v55 = vld [vmem:[#allocation3 + $0x60] sm:$0xff]  ;;  %v15996_v32 = vld [vmem:[#allocation3 + $0x98] sm:$0xff] }
 0x3a2   : > { %v4296_v20 = vsel %vm4225_vm4, %v4193_v59, %v4264_v40  ;;  %v4195_v50 = vadd.f32 %v13417_v2, %v15707_v7  ;;  %v15923_v4 = vld [vmem:[#allocation3 + $0x141] sm:$0xff]  ;;  %v15984_v59 = vld [vmem:[#allocation3 + $0x78] sm:$0xff]  ;;  %v16004_v2 = vld [vmem:[#allocation3 + $0xb0] sm:$0xff]  ;;  %vm8777_vm4 = vcmask 1047559  }
 0x3a3   : > { %4385 = vst.msk [vmem:[#allocation3 + $0x171] sm:$0xff] %vm4299_vm2, %v4296_v20  ;;  %v4295_v3 = vsel %vm4224_vm5, %v4192_v29, %v4263_v60  ;;  %v4194_v28 = vadd.f32 %v13418_v56, %v15707_v7  ;;  %v15917_v37 = vld [vmem:[#allocation3 + $0x139] sm:$0xff]  ;;  %17967 = vst [vmem:[#allocation48_spill] sm:$0xff] %v15923_v4  ;;  %v15992_v29 = vld [vmem:[#allocation3 + $0x90] sm:$0xff] }
 0x3a4   : > { %17966 = vst [vmem:[#allocation46_spill] sm:$0xff] %v15917_v37  ;;  %4384 = vst.msk [vmem:[#allocation3 + $0x169] sm:$0xff] %vm4299_vm2, %v4295_v3  ;;  %vm4227_vm6 = vcmp.ge.f32.partialorder %v4195_v50, 0.0  ;;  %v4266_v51 = vmul.f32 %v15712_v9, %v4195_v50  ;;  %12604 = vmatprep.mubr.msk.f32.mxu1 %vm4299_vm2, %v15917_v37  ;;  %v15988_v53 = vld [vmem:[#allocation3 + $0x80] sm:$0xff]  ;;  %v16000_v40 = vld [vmem:[#allocation3 + $0xa8] sm:$0xff] }
 0x3a5   : > { %vm4226_vm7 = vcmp.ge.f32.partialorder %v4194_v28, 0.0  ;;  %v4265_v5 = vmul.f32 %v15712_v9, %v4194_v28  ;;  %12605 = vmatmul.mubr.msk.f32.gmra.mrb[42].mxu1 %vm4299_vm2, %v15923_v4  ;;  %v16008_v41 = vld [vmem:[#allocation3 + $0xc0] sm:$0xff]  ;;  %v16012_v60 = vld [vmem:[#allocation3 + $0xc8] sm:$0xff]  ;;  %v16016_v56 = vld [vmem:[#allocation3 + $0xd8] sm:$0xff] }
 0x3a6   : > { %v4298_v63 = vsel %vm4227_vm6, %v4195_v50, %v4266_v51  ;;  %v15934_v12 = vld [vmem:[#allocation3 + $0x159] sm:$0xff]  ;;  %v16024_v50 = vld [vmem:[#allocation3 + $0xf0] sm:$0xff]  ;;  %v16081_v43 = vld [vmem:[#allocation3 + $0x22] sm:$0xff] }
 0x3a7   : > { %4387 = vst.msk [vmem:[#allocation3 + $0x189] sm:$0xff] %vm4299_vm2, %v4298_v63  ;;  %v4297_v7 = vsel %vm4226_vm7, %v4194_v28, %v4265_v5  ;;  %v15929_v8 = vld [vmem:[#allocation3 + $0x151] sm:$0xff]  ;;  %17969 = vst [vmem:[#allocation20_spill] sm:$0xff] %v15934_v12  ;;  %v16020_v20 = vld [vmem:[#allocation3 + $0xe0] sm:$0xff] }
 0x3a8   : > { %17968 = vst [vmem:[#allocation19_spill] sm:$0xff] %v15929_v8  ;;  %4386 = vst.msk [vmem:[#allocation3 + $0x181] sm:$0xff] %vm4299_vm2, %v4297_v7  ;;  %12607 = vmatprep.mubr.msk.f32.mxu1 %vm4299_vm2, %v15929_v8  ;;  %v16028_v3 = vld [vmem:[#allocation3 + $0xf8] sm:$0xff]  ;;  %v16032_v28 = vld [vmem:[#allocation3 + $0x108] sm:$0xff] }
 0x3a9   : > { %12608 = vmatmul.mubr.msk.f32.gmra.mrb[44].mxu1 %vm4299_vm2, %v15934_v12  ;;  %v16036_v51 = vld [vmem:[#allocation3 + $0x110] sm:$0xff]  ;;  %v16040_v5 = vld [vmem:[#allocation3 + $0x120] sm:$0xff]  ;;  %v16044_v63 = vld [vmem:[#allocation3 + $0x128] sm:$0xff] }
 0x3aa   : > { %v15942_v45 = vld [vmem:[#allocation3 + $0x171] sm:$0xff]  ;;  %v5916_v12 = vld [vmem:[#allocation9 + $0x80] sm:$0xff]  ;;  %v5917_v8 = vld [vmem:[#allocation9 + $0x88] sm:$0xff] }
 0x3ab   : > { %v15938_v9 = vld [vmem:[#allocation3 + $0x169] sm:$0xff]  ;;  %17971 = vst [vmem:[#allocation22_spill] sm:$0xff] %v15942_v45  ;;  %v16048_v7 = vld [vmem:[#allocation3 + $0x138] sm:$0xff]  ;;  %v16079_v37 = vpack.c.bf16 %v5917_v8, %v5916_v12 }
 0x3ac   : > { %17970 = vst [vmem:[#allocation21_spill] sm:$0xff] %v15938_v9  ;;  %12610 = vmatprep.mubr.msk.f32.mxu1 %vm4299_vm2, %v15938_v9  ;;  %v16056_v19 = vld [vmem:[#allocation3 + $0x150] sm:$0xff]  ;;  %v16060_v21 = vld [vmem:[#allocation3 + $0x158] sm:$0xff] }
 0x3ad   : > { %12611 = vmatmul.mubr.msk.f32.gmra.mrb[46].mxu1 %vm4299_vm2, %v15942_v45  ;;  %v16068_v23 = vld [vmem:[#allocation3 + $0x170] sm:$0xff]  ;;  %v16074_v4 = vld [vmem:[#allocation3 + $0x1a] sm:$0xff] }
 0x3ae   : > { %12621 = vmatprep.mubr.msk.f32.mxu1 %vm4299_vm2, %v4388_v16  ;;  %v16052_v16 = vld [vmem:[#allocation3 + $0x140] sm:$0xff]  ;;  %v5528_v46 = vld [vmem:[#allocation9 + $0x70] sm:$0xff] }
 0x3af   : > { %v5104_v45 = vld [vmem:[#allocation3 + $0xa] sm:$0xff]  ;;  %v13293_v9 = vpack.c.bf16 %v5529_v62, %v5528_v46  ;;  %v16085_v62 = vld [vmem:[#allocation3 + $0x32] sm:$0xff]  ;;  %v16114_v46 = vld [vmem:[#allocation3 + $0x82] sm:$0xff] }
 0x3b0   : > { %17972 = vst [vmem:[#allocation23_spill] sm:$0xff] %v16085_v62  ;;  %v16094_v8 = vld [vmem:[#allocation3 + $0x4a] sm:$0xff]  ;;  %v16098_v12 = vld [vmem:[#allocation3 + $0x52] sm:$0xff]  ;;  %17979 = vst [vmem:[#allocation26_spill] sm:$0xff] %v16114_v46 }
 0x3b1   : > { %12622 = vmatmul.mubr.msk.f32.vlgmr.msra.gmra.mrb[16].mxu1 %vm4299_vm2, %v4389_v52  ;;  %v16064_v52 = vld [vmem:[#allocation3 + $0x168] sm:$0xff]  ;;  %17974 = vst [vmem:[#allocation38_spill] sm:$0xff] %v16094_v8  ;;  %17975 = vst [vmem:[#allocation39_spill] sm:$0xff] %v16098_v12 }
 0x3b2   : > { %12624 = vmatprep.mubr.msk.f32.mxu1 %vm4299_vm2, %v15948_v0  ;;  %13284 = vmatpush3.bf16.msra.mxu1 %v15701_v6  ;;  %v15968_v6 = vld [vmem:[#allocation3 + $0x48] sm:$0xff] }
 0x3b3   : > { %13286 = vmatprep.subr.bf16.mxu1 %v13285_v22 }
 0x3b5   : > { %12625 = vmatmul.mubr.msk.f32.gmra.mrb[18].mxu1 %vm4299_vm2, %v15955_v10 }
 0x3b6   : > { %12627 = vmatprep.mubr.msk.f32.mxu1 %vm4299_vm2, %v15959_v47  ;;  %13288 = vmatpush3.bf16.msra.mxu1 %v13285_v22  ;;  %v5103_v22 = vld [vmem:[#allocation3 + $0x2] sm:$0xff] }
 0x3b7   : > { %13290 = vmatprep.subr.bf16.mxu1 %v15953_v24 }
 0x3b9   : > { %12628 = vmatmul.mubr.msk.f32.gmra.mrb[20].mxu1 %vm4299_vm2, %v15964_v11 }
 0x3ba   : > { %12630 = vmatprep.mubr.msk.f32.mxu1 %vm4299_vm2, %v15968_v6 }
 0x3bd   : > { %12631 = vmatmul.mubr.msk.f32.gmra.mrb[22].mxu1 %vm4299_vm2, %v15972_v44 }
 0x3be   : > { %12633 = vmatprep.mubr.msk.f32.mxu1 %vm4299_vm2, %v15976_v55 }
 0x3c1   : > { %12634 = vmatmul.mubr.msk.f32.gmra.mrb[24].mxu1 %vm4299_vm2, %v15980_v58 }
 0x3c2   : > { %12636 = vmatprep.mubr.msk.f32.mxu1 %vm4299_vm2, %v15984_v59 }
 0x3c5   : > { %12637 = vmatmul.mubr.msk.f32.gmra.mrb[26].mxu1 %vm4299_vm2, %v15988_v53 }
 0x3c6   : > { %12639 = vmatprep.mubr.msk.f32.mxu1 %vm4299_vm2, %v15992_v29 }
 0x3c9   : > { %12640 = vmatmul.mubr.msk.f32.gmra.mrb[28].mxu1 %vm4299_vm2, %v15996_v32 }
 0x3ca   : > { %12642 = vmatprep.mubr.msk.f32.mxu1 %vm4299_vm2, %v16000_v40 }
 0x3cd   : > { %12643 = vmatmul.mubr.msk.f32.gmra.mrb[30].mxu1 %vm4299_vm2, %v16004_v2 }
 0x3ce   : > { %12645 = vmatprep.mubr.msk.f32.mxu1 %vm4299_vm2, %v16008_v41 }
 0x3d1   : > { %12646 = vmatmul.mubr.msk.f32.gmra.mrb[32].mxu1 %vm4299_vm2, %v16012_v60 }
 0x3d2   : > { %12648 = vmatprep.mubr.msk.f32.mxu1 %vm4299_vm2, %v16016_v56 }
 0x3d5   : > { %12649 = vmatmul.mubr.msk.f32.gmra.mrb[34].mxu1 %vm4299_vm2, %v16020_v20 }
 0x3d6   : > { %12651 = vmatprep.mubr.msk.f32.mxu1 %vm4299_vm2, %v16024_v50 }
 0x3d9   : > { %12652 = vmatmul.mubr.msk.f32.gmra.mrb[36].mxu1 %vm4299_vm2, %v16028_v3 }
 0x3da   : > { %12654 = vmatprep.mubr.msk.f32.mxu1 %vm4299_vm2, %v16032_v28 }
 0x3dd   : > { %12655 = vmatmul.mubr.msk.f32.gmra.mrb[38].mxu1 %vm4299_vm2, %v16036_v51 }
 0x3de   : > { %12657 = vmatprep.mubr.msk.f32.mxu1 %vm4299_vm2, %v16040_v5 }
 0x3e1   : > { %12658 = vmatmul.mubr.msk.f32.gmra.mrb[40].mxu1 %vm4299_vm2, %v16044_v63 }
 0x3e2   : > { %12660 = vmatprep.mubr.msk.f32.mxu1 %vm4299_vm2, %v16048_v7 }
 0x3e5   : > { %12661 = vmatmul.mubr.msk.f32.gmra.mrb[42].mxu1 %vm4299_vm2, %v16052_v16 }
 0x3e6   : > { %12663 = vmatprep.mubr.msk.f32.mxu1 %vm4299_vm2, %v16056_v19 }
 0x3e9   : > { %12664 = vmatmul.mubr.msk.f32.gmra.mrb[44].mxu1 %vm4299_vm2, %v16060_v21 }
 0x3ea   : > { %12666 = vmatprep.mubr.msk.f32.mxu1 %vm4299_vm2, %v16064_v52 }
 0x3ed   : > { %12667 = vmatmul.mubr.msk.f32.gmra.mrb[46].mxu1 %vm4299_vm2, %v16068_v23 }
 0x3ee   : > { %12677 = vmatprep.mubr.msk.f32.mxu1 %vm4299_vm2, %v5103_v22  ;;  %v16110_v22 = vld [vmem:[#allocation3 + $0x7a] sm:$0xff] }
 0x3ef   : > { %17978 = vst [vmem:[#allocation25_spill] sm:$0xff] %v16110_v22 }
 0x3f1   : > { %12678 = vmatmul.mubr.msk.f32.vlgmr.msra.gmra.mrb[16].mxu1 %vm4299_vm2, %v5104_v45  ;;  %v16090_v45 = vld [vmem:[#allocation3 + $0x3a] sm:$0xff] }
 0x3f2   : > { %12680 = vmatprep.mubr.msk.f32.mxu1 %vm4299_vm2, %v16074_v4  ;;  %13292 = vmatpush3.bf16.msra.mxu1 %v15953_v24  ;;  %17973 = vst [vmem:[#allocation24_spill] sm:$0xff] %v16090_v45  ;;  %v16102_v24 = vld [vmem:[#allocation3 + $0x62] sm:$0xff] }
 0x3f3   : > { %13294 = vmatprep.subr.bf16.mxu1 %v13293_v9  ;;  %17976 = vst [vmem:[#allocation41_spill] sm:$0xff] %v16102_v24 }
 0x3f5   : > { %12681 = vmatmul.mubr.msk.f32.gmra.mrb[18].mxu1 %vm4299_vm2, %v16081_v43 }
 0x3f6   : > { %12683 = vmatprep.mubr.msk.f32.mxu1 %vm4299_vm2, %v16085_v62  ;;  %13296 = vmatpush3.bf16.msra.mxu1 %v13293_v9  ;;  %v16106_v9 = vld [vmem:[#allocation3 + $0x6a] sm:$0xff] }
 0x3f7   : > { %13298 = vmatprep.subr.bf16.mxu1 %v16079_v37  ;;  %17977 = vst [vmem:[#allocation47_spill] sm:$0xff] %v16106_v9  ;;  %v6307_v62 = vld [vmem:[#allocation9 + $0xa8] sm:$0xff] }
 0x3f9   : > { %12684 = vmatmul.mubr.msk.f32.gmra.mrb[20].mxu1 %vm4299_vm2, %v16090_v45  ;;  %v5919_v45 = vld [vmem:[#allocation9 + $0x98] sm:$0xff] }
 0x3fa   : > { %12686 = vmatprep.mubr.msk.f32.mxu1 %vm4299_vm2, %v16094_v8  ;;  %v5918_v8 = vld [vmem:[#allocation9 + $0x90] sm:$0xff] }
 0x3fd   : > { %12687 = vmatmul.mubr.msk.f32.gmra.mrb[22].mxu1 %vm4299_vm2, %v16098_v12  ;;  %v16118_v12 = vld [vmem:[#allocation3 + $0x92] sm:$0xff] }
 0x3fe   : > { %12689 = vmatprep.mubr.msk.f32.mxu1 %vm4299_vm2, %v16102_v24  ;;  %17980 = vst [vmem:[#allocation27_spill] sm:$0xff] %v16118_v12  ;;  %v16122_v24 = vld [vmem:[#allocation3 + $0x9a] sm:$0xff] }
 0x3ff   : > { %17981 = vst [vmem:[#allocation28_spill] sm:$0xff] %v16122_v24 }
 0x401   : > { %12690 = vmatmul.mubr.msk.f32.gmra.mrb[24].mxu1 %vm4299_vm2, %v16106_v9  ;;  %v16126_v9 = vld [vmem:[#allocation3 + $0xaa] sm:$0xff] }
 0x402   : > { %12692 = vmatprep.mubr.msk.f32.mxu1 %vm4299_vm2, %v16110_v22  ;;  %17982 = vst [vmem:[#allocation29_spill] sm:$0xff] %v16126_v9  ;;  %v16130_v22 = vld [vmem:[#allocation3 + $0xb2] sm:$0xff] }
 0x403   : > { %17983 = vst [vmem:[#allocation30_spill] sm:$0xff] %v16130_v22 }
 0x405   : > { %12693 = vmatmul.mubr.msk.f32.gmra.mrb[26].mxu1 %vm4299_vm2, %v16114_v46  ;;  %v16134_v46 = vld [vmem:[#allocation3 + $0xc2] sm:$0xff] }
 0x406   : > { %12695 = vmatprep.mubr.msk.f32.mxu1 %vm4299_vm2, %v16118_v12  ;;  %17984 = vst [vmem:[#allocation31_spill] sm:$0xff] %v16134_v46  ;;  %v16138_v12 = vld [vmem:[#allocation3 + $0xca] sm:$0xff] }
 0x407   : > { %17985 = vst [vmem:[#allocation32_spill] sm:$0xff] %v16138_v12 }
 0x409   : > { %12696 = vmatmul.mubr.msk.f32.gmra.mrb[28].mxu1 %vm4299_vm2, %v16122_v24  ;;  %v16142_v24 = vld [vmem:[#allocation3 + $0xda] sm:$0xff] }
 0x40a   : > { %12698 = vmatprep.mubr.msk.f32.mxu1 %vm4299_vm2, %v16126_v9  ;;  %17986 = vst [vmem:[#allocation33_spill] sm:$0xff] %v16142_v24  ;;  %v16146_v9 = vld [vmem:[#allocation3 + $0xe2] sm:$0xff] }
 0x40b   : > { %17987 = vst [vmem:[#allocation34_spill] sm:$0xff] %v16146_v9 }
 0x40d   : > { %12699 = vmatmul.mubr.msk.f32.gmra.mrb[30].mxu1 %vm4299_vm2, %v16130_v22  ;;  %v16150_v22 = vld [vmem:[#allocation3 + $0xf2] sm:$0xff] }
 0x40e   : > { %12701 = vmatprep.mubr.msk.f32.mxu1 %vm4299_vm2, %v16134_v46  ;;  %17988 = vst [vmem:[#allocation35_spill] sm:$0xff] %v16150_v22  ;;  %v16154_v46 = vld [vmem:[#allocation3 + $0xfa] sm:$0xff] }
 0x40f   : > { %17989 = vst [vmem:[#allocation36_spill] sm:$0xff] %v16154_v46 }
 0x411   : > { %12702 = vmatmul.mubr.msk.f32.gmra.mrb[32].mxu1 %vm4299_vm2, %v16138_v12  ;;  %v16158_v12 = vld [vmem:[#allocation3 + $0x10a] sm:$0xff] }
 0x412   : > { %12704 = vmatprep.mubr.msk.f32.mxu1 %vm4299_vm2, %v16142_v24  ;;  %17990 = vst [vmem:[#allocation37_spill] sm:$0xff] %v16158_v12  ;;  %v16162_v24 = vld [vmem:[#allocation3 + $0x112] sm:$0xff] }
 0x413   : > { %17991 = vst [vmem:[#allocation40_spill] sm:$0xff] %v16162_v24 }
 0x415   : > { %12705 = vmatmul.mubr.msk.f32.gmra.mrb[34].mxu1 %vm4299_vm2, %v16146_v9  ;;  %v16166_v9 = vld [vmem:[#allocation3 + $0x122] sm:$0xff] }
 0x416   : > { %12707 = vmatprep.mubr.msk.f32.mxu1 %vm4299_vm2, %v16150_v22  ;;  %17992 = vst [vmem:[#allocation42_spill] sm:$0xff] %v16166_v9  ;;  %v16170_v22 = vld [vmem:[#allocation3 + $0x12a] sm:$0xff] }
 0x417   : > { %17993 = vst [vmem:[#allocation43_spill] sm:$0xff] %v16170_v22 }
 0x419   : > { %12708 = vmatmul.mubr.msk.f32.gmra.mrb[36].mxu1 %vm4299_vm2, %v16154_v46  ;;  %v16174_v46 = vld [vmem:[#allocation3 + $0x13a] sm:$0xff] }
 0x41a   : > { %12710 = vmatprep.mubr.msk.f32.mxu1 %vm4299_vm2, %v16158_v12  ;;  %17994 = vst [vmem:[#allocation45_spill] sm:$0xff] %v16174_v46  ;;  %v16178_v12 = vld [vmem:[#allocation3 + $0x142] sm:$0xff] }
 0x41b   : > { %17995 = vst [vmem:[#allocation49_spill] sm:$0xff] %v16178_v12 }
 0x41d   : > { %12711 = vmatmul.mubr.msk.f32.gmra.mrb[38].mxu1 %vm4299_vm2, %v16162_v24  ;;  %v16182_v24 = vld [vmem:[#allocation3 + $0x152] sm:$0xff] }
 0x41e   : > { %12713 = vmatprep.mubr.msk.f32.mxu1 %vm4299_vm2, %v16166_v9  ;;  %17996 = vst [vmem:[#allocation50_spill] sm:$0xff] %v16182_v24  ;;  %v16186_v9 = vld [vmem:[#allocation3 + $0x15a] sm:$0xff] }
 0x41f   : > { %17997 = vst [vmem:[#allocation51_spill] sm:$0xff] %v16186_v9 }
 0x421   : > { %12714 = vmatmul.mubr.msk.f32.gmra.mrb[40].mxu1 %vm4299_vm2, %v16170_v22  ;;  %v16190_v22 = vld [vmem:[#allocation3 + $0x16a] sm:$0xff] }
 0x422   : > { %12716 = vmatprep.mubr.msk.f32.mxu1 %vm4299_vm2, %v16174_v46  ;;  %17998 = vst [vmem:[#allocation52_spill] sm:$0xff] %v16190_v22  ;;  %v16194_v46 = vld [vmem:[#allocation3 + $0x172] sm:$0xff] }
 0x425   : > { %12717 = vmatmul.mubr.msk.f32.gmra.mrb[42].mxu1 %vm4299_vm2, %v16178_v12  ;;  %v6306_v12 = vld [vmem:[#allocation9 + $0xa0] sm:$0xff] }
 0x426   : > { %12719 = vmatprep.mubr.msk.f32.mxu1 %vm4299_vm2, %v16182_v24  ;;  %v13301_v24 = vpack.c.bf16 %v5919_v45, %v5918_v8  ;;  %v6697_v8 = vld [vmem:[#allocation9 + $0xc0] sm:$0xff] }
 0x429   : > { %12720 = vmatmul.mubr.msk.f32.gmra.mrb[44].mxu1 %vm4299_vm2, %v16186_v9 }
 0x42a   : > { %12722 = vmatprep.mubr.msk.f32.mxu1 %vm4299_vm2, %v16190_v22  ;;  %v13305_v22 = vpack.c.bf16 %v6307_v62, %v6306_v12  ;;  %v6309_v62 = vld [vmem:[#allocation9 + $0xb8] sm:$0xff]  ;;  %v6698_v12 = vld [vmem:[#allocation9 + $0xc8] sm:$0xff] }
 0x42d   : > { %12723 = vmatmul.mubr.msk.f32.gmra.mrb[46].mxu1 %vm4299_vm2, %v16194_v46 }
 0x42e   : > { %12733 = vmatprep.mubr.msk.f32.mxu1 %vm4299_vm2, %v15948_v0  ;;  %v16263_v0 = vld [vmem:[#allocation3 + $0x188] sm:$0xff] }
 0x431   : > { %12734 = vmatmul.mubr.msk.f32.vlgmr.msra.gmra.mrb[16].mxu1 %vm4299_vm2, %v15955_v10  ;;  %v6308_v10 = vld [vmem:[#allocation9 + $0xb0] sm:$0xff] }
 0x432   : > { %12736 = vmatprep.mubr.msk.f32.mxu1 %vm4299_vm2, %v15959_v47  ;;  %13300 = vmatpush3.bf16.msra.mxu1 %v16079_v37  ;;  %v16259_v37 = vld [vmem:[#allocation3 + $0x180] sm:$0xff]  ;;  %v13309_v45 = vpack.c.bf16 %v6309_v62, %v6308_v10  ;;  %v18016_v10 = vld [vmem:[#allocation29_spill] sm:$0xff]  ;;  %v18017_v62 = vld [vmem:[#allocation30_spill] sm:$0xff] }
 0x433   : > { %13302 = vmatprep.subr.bf16.mxu1 %v13301_v24 }
 0x435   : > { %12737 = vmatmul.mubr.msk.f32.gmra.mrb[18].mxu1 %vm4299_vm2, %v15964_v11 }
 0x436   : > { %12739 = vmatprep.mubr.msk.f32.mxu1 %vm4299_vm2, %v15968_v6  ;;  %13304 = vmatpush3.bf16.msra.mxu1 %v13301_v24  ;;  %v13313_v24 = vpack.c.bf16 %v6698_v12, %v6697_v8  ;;  %v18019_v8 = vld [vmem:[#allocation32_spill] sm:$0xff]  ;;  %v18020_v12 = vld [vmem:[#allocation33_spill] sm:$0xff] }
 0x437   : > { %13306 = vmatprep.subr.bf16.mxu1 %v13305_v22 }
 0x439   : > { %12740 = vmatmul.mubr.msk.f32.gmra.mrb[20].mxu1 %vm4299_vm2, %v15972_v44 }
 0x43a   : > { %12742 = vmatprep.mubr.msk.f32.mxu1 %vm4299_vm2, %v15976_v55 }
 0x43d   : > { %12743 = vmatmul.mubr.msk.f32.gmra.mrb[22].mxu1 %vm4299_vm2, %v15980_v58 }
 0x43e   : > { %12745 = vmatprep.mubr.msk.f32.mxu1 %vm4299_vm2, %v15984_v59 }
 0x441   : > { %12746 = vmatmul.mubr.msk.f32.gmra.mrb[24].mxu1 %vm4299_vm2, %v15988_v53 }
 0x442   : > { %12748 = vmatprep.mubr.msk.f32.mxu1 %vm4299_vm2, %v15992_v29 }
 0x445   : > { %12749 = vmatmul.mubr.msk.f32.gmra.mrb[26].mxu1 %vm4299_vm2, %v15996_v32 }
 0x446   : > { %12751 = vmatprep.mubr.msk.f32.mxu1 %vm4299_vm2, %v16000_v40 }
 0x449   : > { %12752 = vmatmul.mubr.msk.f32.gmra.mrb[28].mxu1 %vm4299_vm2, %v16004_v2 }
 0x44a   : > { %12754 = vmatprep.mubr.msk.f32.mxu1 %vm4299_vm2, %v16008_v41 }
 0x44d   : > { %12755 = vmatmul.mubr.msk.f32.gmra.mrb[30].mxu1 %vm4299_vm2, %v16012_v60 }
 0x44e   : > { %12757 = vmatprep.mubr.msk.f32.mxu1 %vm4299_vm2, %v16016_v56 }
 0x451   : > { %12758 = vmatmul.mubr.msk.f32.gmra.mrb[32].mxu1 %vm4299_vm2, %v16020_v20 }
 0x452   : > { %12760 = vmatprep.mubr.msk.f32.mxu1 %vm4299_vm2, %v16024_v50 }
 0x455   : > { %12761 = vmatmul.mubr.msk.f32.gmra.mrb[34].mxu1 %vm4299_vm2, %v16028_v3 }
 0x456   : > { %12763 = vmatprep.mubr.msk.f32.mxu1 %vm4299_vm2, %v16032_v28 }
 0x459   : > { %12764 = vmatmul.mubr.msk.f32.gmra.mrb[36].mxu1 %vm4299_vm2, %v16036_v51 }
 0x45a   : > { %12766 = vmatprep.mubr.msk.f32.mxu1 %vm4299_vm2, %v16040_v5 }
 0x45d   : > { %12767 = vmatmul.mubr.msk.f32.gmra.mrb[38].mxu1 %vm4299_vm2, %v16044_v63 }
 0x45e   : > { %12769 = vmatprep.mubr.msk.f32.mxu1 %vm4299_vm2, %v16048_v7 }
 0x461   : > { %12770 = vmatmul.mubr.msk.f32.gmra.mrb[40].mxu1 %vm4299_vm2, %v16052_v16 }
 0x462   : > { %12772 = vmatprep.mubr.msk.f32.mxu1 %vm4299_vm2, %v16056_v19 }
 0x465   : > { %12773 = vmatmul.mubr.msk.f32.gmra.mrb[42].mxu1 %vm4299_vm2, %v16060_v21 }
 0x466   : > { %12775 = vmatprep.mubr.msk.f32.mxu1 %vm4299_vm2, %v16064_v52 }
 0x469   : > { %12776 = vmatmul.mubr.msk.f32.gmra.mrb[44].mxu1 %vm4299_vm2, %v16068_v23 }
 0x46a   : > { %12778 = vmatprep.mubr.msk.f32.mxu1 %vm4299_vm2, %v16259_v37 }
 0x46d   : > { %12779 = vmatmul.mubr.msk.f32.gmra.mrb[46].mxu1 %vm4299_vm2, %v16263_v0 }
 0x46e   : > { %12789 = vmatprep.mubr.msk.f32.mxu1 %vm4299_vm2, %v15733_v34  ;;  %v17999_v34 = vld [vmem:[#allocation44_spill] sm:$0xff] }
 0x471   : > { %12790 = vmatmul.mubr.msk.f32.vlgmr.msra.gmra.mrb[16].mxu1 %vm4299_vm2, %v15739_v39  ;;  %v18000_v39 = vld [vmem:[#allocation46_spill] sm:$0xff] }
 0x472   : > { %12792 = vmatprep.mubr.msk.f32.mxu1 %vm4299_vm2, %v15747_v27  ;;  %13308 = vmatpush3.bf16.msra.mxu1 %v13305_v22  ;;  %v18001_v27 = vld [vmem:[#allocation48_spill] sm:$0xff] }
 0x473   : > { %13310 = vmatprep.subr.bf16.mxu1 %v13309_v45  ;;  %v18015_v22 = vld [vmem:[#allocation28_spill] sm:$0xff] }
 0x475   : > { %12793 = vmatmul.mubr.msk.f32.gmra.mrb[18].mxu1 %vm4299_vm2, %v15753_v49  ;;  %v18002_v49 = vld [vmem:[#allocation19_spill] sm:$0xff] }
 0x476   : > { %12795 = vmatprep.mubr.msk.f32.mxu1 %vm4299_vm2, %v15761_v15  ;;  %13312 = vmatpush3.bf16.msra.mxu1 %v13309_v45  ;;  %v18003_v15 = vld [vmem:[#allocation20_spill] sm:$0xff]  ;;  %v18018_v45 = vld [vmem:[#allocation31_spill] sm:$0xff] }
 0x477   : > { %13314 = vmatprep.subr.bf16.mxu1 %v13313_v24 }
 0x479   : > { %12796 = vmatmul.mubr.msk.f32.gmra.mrb[20].mxu1 %vm4299_vm2, %v15767_v17  ;;  %v18004_v17 = vld [vmem:[#allocation21_spill] sm:$0xff] }
 0x47a   : > { %12798 = vmatprep.mubr.msk.f32.mxu1 %vm4299_vm2, %v15775_v25  ;;  %v18005_v25 = vld [vmem:[#allocation22_spill] sm:$0xff] }
 0x47d   : > { %12799 = vmatmul.mubr.msk.f32.gmra.mrb[22].mxu1 %vm4299_vm2, %v15781_v33  ;;  %v16327_v33 = vld [vmem:[#allocation3 + $0x181] sm:$0xff] }
 0x47e   : > { %12801 = vmatprep.mubr.msk.f32.mxu1 %vm4299_vm2, %v15789_v61  ;;  %v16331_v61 = vld [vmem:[#allocation3 + $0x189] sm:$0xff] }
 0x481   : > { %12802 = vmatmul.mubr.msk.f32.gmra.mrb[24].mxu1 %vm4299_vm2, %v15795_v31  ;;  %v6699_v31 = vld [vmem:[#allocation9 + $0xd0] sm:$0xff] }
 0x482   : > { %12804 = vmatprep.mubr.msk.f32.mxu1 %vm4299_vm2, %v15803_v1  ;;  %v6700_v1 = vld [vmem:[#allocation9 + $0xd8] sm:$0xff] }
 0x485   : > { %12805 = vmatmul.mubr.msk.f32.gmra.mrb[26].mxu1 %vm4299_vm2, %v15809_v48  ;;  %v13317_v48 = vpack.c.bf16 %v6700_v1, %v6699_v31  ;;  %v18022_v31 = vld [vmem:[#allocation35_spill] sm:$0xff]  ;;  %v18023_v1 = vld [vmem:[#allocation36_spill] sm:$0xff] }
 0x486   : > { %12807 = vmatprep.mubr.msk.f32.mxu1 %vm4299_vm2, %v15818_v13  ;;  %v7087_v13 = vld [vmem:[#allocation9 + $0xe0] sm:$0xff] }
 0x489   : > { %12808 = vmatmul.mubr.msk.f32.gmra.mrb[28].mxu1 %vm4299_vm2, %v15823_v18  ;;  %v7088_v18 = vld [vmem:[#allocation9 + $0xe8] sm:$0xff] }
 0x48a   : > { %12810 = vmatprep.mubr.msk.f32.mxu1 %vm4299_vm2, %v15834_v26  ;;  %v18006_v26 = vld [vmem:[#allocation23_spill] sm:$0xff] }
 0x48d   : > { %12811 = vmatmul.mubr.msk.f32.gmra.mrb[30].mxu1 %vm4299_vm2, %v15839_v38  ;;  %v13321_v38 = vpack.c.bf16 %v7088_v18, %v7087_v13  ;;  %v18025_v13 = vld [vmem:[#allocation40_spill] sm:$0xff]  ;;  %v18026_v18 = vld [vmem:[#allocation42_spill] sm:$0xff] }
 0x48e   : > { %12813 = vmatprep.mubr.msk.f32.mxu1 %vm4299_vm2, %v15853_v30  ;;  %v18007_v30 = vld [vmem:[#allocation24_spill] sm:$0xff] }
 0x491   : > { %12814 = vmatmul.mubr.msk.f32.gmra.mrb[32].mxu1 %vm4299_vm2, %v15860_v57  ;;  %v18008_v57 = vld [vmem:[#allocation38_spill] sm:$0xff] }
 0x492   : > { %12816 = vmatprep.mubr.msk.f32.mxu1 %vm4299_vm2, %v15869_v14  ;;  %v18009_v14 = vld [vmem:[#allocation39_spill] sm:$0xff] }
 0x495   : > { %12817 = vmatmul.mubr.msk.f32.gmra.mrb[34].mxu1 %vm4299_vm2, %v15876_v42  ;;  %v18010_v42 = vld [vmem:[#allocation41_spill] sm:$0xff] }
 0x496   : > { %12819 = vmatprep.mubr.msk.f32.mxu1 %vm4299_vm2, %v15885_v35  ;;  %v18011_v35 = vld [vmem:[#allocation47_spill] sm:$0xff] }
 0x499   : > { %12820 = vmatmul.mubr.msk.f32.gmra.mrb[36].mxu1 %vm4299_vm2, %v15892_v54  ;;  %v18012_v54 = vld [vmem:[#allocation25_spill] sm:$0xff] }
 0x49a   : > { %12822 = vmatprep.mubr.msk.f32.mxu1 %vm4299_vm2, %v15901_v36 }
 0x49d   : > { %12823 = vmatmul.mubr.msk.f32.gmra.mrb[38].mxu1 %vm4299_vm2, %v17999_v34 }
 0x49e   : > { %12825 = vmatprep.mubr.msk.f32.mxu1 %vm4299_vm2, %v18000_v39 }
 0x4a1   : > { %12826 = vmatmul.mubr.msk.f32.gmra.mrb[40].mxu1 %vm4299_vm2, %v18001_v27 }
 0x4a2   : > { %12828 = vmatprep.mubr.msk.f32.mxu1 %vm4299_vm2, %v18002_v49 }
 0x4a5   : > { %12829 = vmatmul.mubr.msk.f32.gmra.mrb[42].mxu1 %vm4299_vm2, %v18003_v15 }
 0x4a6   : > { %12831 = vmatprep.mubr.msk.f32.mxu1 %vm4299_vm2, %v18004_v17 }
 0x4a9   : > { %12832 = vmatmul.mubr.msk.f32.gmra.mrb[44].mxu1 %vm4299_vm2, %v18005_v25 }
 0x4aa   : > { %12834 = vmatprep.mubr.msk.f32.mxu1 %vm4299_vm2, %v16327_v33 }
 0x4ad   : > { %12835 = vmatmul.mubr.msk.f32.gmra.mrb[46].mxu1 %vm4299_vm2, %v16331_v61 }
 0x4ae   : > { %12845 = vmatprep.mubr.msk.f32.mxu1 %vm4299_vm2, %v16074_v4  ;;  %v18014_v4 = vld [vmem:[#allocation27_spill] sm:$0xff] }
 0x4b1   : > { %12846 = vmatmul.mubr.msk.f32.vlgmr.msra.gmra.mrb[16].mxu1 %vm4299_vm2, %v16081_v43  ;;  %v18013_v43 = vld [vmem:[#allocation26_spill] sm:$0xff] }
 0x4b2   : > { %12848 = vmatprep.mubr.msk.f32.mxu1 %vm4299_vm2, %v18006_v26  ;;  %13316 = vmatpush3.bf16.msra.mxu1 %v13313_v24  ;;  %v18021_v24 = vld [vmem:[#allocation34_spill] sm:$0xff] }
 0x4b3   : > { %13318 = vmatprep.subr.bf16.mxu1 %v13317_v48 }
 0x4b5   : > { %12849 = vmatmul.mubr.msk.f32.gmra.mrb[18].mxu1 %vm4299_vm2, %v18007_v30 }
 0x4b6   : > { %12851 = vmatprep.mubr.msk.f32.mxu1 %vm4299_vm2, %v18008_v57  ;;  %13320 = vmatpush3.bf16.msra.mxu1 %v13317_v48  ;;  %v18024_v48 = vld [vmem:[#allocation37_spill] sm:$0xff] }
 0x4b7   : > { %13322 = vmatprep.subr.bf16.mxu1 %v13321_v38 }
 0x4b9   : > { %12852 = vmatmul.mubr.msk.f32.gmra.mrb[20].mxu1 %vm4299_vm2, %v18009_v14 }
 0x4ba   : > { %12854 = vmatprep.mubr.msk.f32.mxu1 %vm4299_vm2, %v18010_v42 }
 0x4bd   : > { %12855 = vmatmul.mubr.msk.f32.gmra.mrb[22].mxu1 %vm4299_vm2, %v18011_v35 }
 0x4be   : > { %12857 = vmatprep.mubr.msk.f32.mxu1 %vm4299_vm2, %v18012_v54 }
 0x4c1   : > { %12858 = vmatmul.mubr.msk.f32.gmra.mrb[24].mxu1 %vm4299_vm2, %v18013_v43 }
 0x4c2   : > { %12860 = vmatprep.mubr.msk.f32.mxu1 %vm4299_vm2, %v18014_v4 }
 0x4c5   : > { %12861 = vmatmul.mubr.msk.f32.gmra.mrb[26].mxu1 %vm4299_vm2, %v18015_v22 }
 0x4c6   : > { %12863 = vmatprep.mubr.msk.f32.mxu1 %vm4299_vm2, %v18016_v10 }
 0x4c9   : > { %12864 = vmatmul.mubr.msk.f32.gmra.mrb[28].mxu1 %vm4299_vm2, %v18017_v62 }
 0x4ca   : > { %12866 = vmatprep.mubr.msk.f32.mxu1 %vm4299_vm2, %v18018_v45 }
 0x4cd   : > { %12867 = vmatmul.mubr.msk.f32.gmra.mrb[30].mxu1 %vm4299_vm2, %v18019_v8  ;;  %v18027_v8 = vld [vmem:[#allocation43_spill] sm:$0xff] }
 0x4ce   : > { %12869 = vmatprep.mubr.msk.f32.mxu1 %vm4299_vm2, %v18020_v12  ;;  %v18028_v12 = vld [vmem:[#allocation45_spill] sm:$0xff] }
 0x4d1   : > { %12870 = vmatmul.mubr.msk.f32.gmra.mrb[32].mxu1 %vm4299_vm2, %v18021_v24  ;;  %v18029_v24 = vld [vmem:[#allocation49_spill] sm:$0xff] }
 0x4d2   : > { %12872 = vmatprep.mubr.msk.f32.mxu1 %vm4299_vm2, %v18022_v31  ;;  %v18030_v31 = vld [vmem:[#allocation50_spill] sm:$0xff] }
 0x4d5   : > { %12873 = vmatmul.mubr.msk.f32.gmra.mrb[34].mxu1 %vm4299_vm2, %v18023_v1 }
 0x4d6   : > { %12875 = vmatprep.mubr.msk.f32.mxu1 %vm4299_vm2, %v18024_v48  ;;  %v18031_v48 = vld [vmem:[#allocation52_spill] sm:$0xff] }
 0x4d9   : > { %12876 = vmatmul.mubr.msk.f32.gmra.mrb[36].mxu1 %vm4299_vm2, %v18025_v13 }
 0x4da   : > { %12878 = vmatprep.mubr.msk.f32.mxu1 %vm4299_vm2, %v18026_v18  ;;  %v16395_v18 = vld [vmem:[#allocation3 + $0x182] sm:$0xff] }
 0x4db   : > { %18032 = vst [vmem:[#allocation44_spill] sm:$0xff] %v16395_v18 }
 0x4dd   : > { %12879 = vmatmul.mubr.msk.f32.gmra.mrb[38].mxu1 %vm4299_vm2, %v18027_v8  ;;  %v7090_v8 = vld [vmem:[#allocation9 + $0xf8] sm:$0xff] }
 0x4de   : > { %12881 = vmatprep.mubr.msk.f32.mxu1 %vm4299_vm2, %v18028_v12  ;;  %v16399_v12 = vld [vmem:[#allocation3 + $0x18a] sm:$0xff] }
 0x4e1   : > { %12882 = vmatmul.mubr.msk.f32.gmra.mrb[40].mxu1 %vm4299_vm2, %v18029_v24  ;;  %v7089_v24 = vld [vmem:[#allocation9 + $0xf0] sm:$0xff] }
 0x4e2   : > { %12884 = vmatprep.mubr.msk.f32.mxu1 %vm4299_vm2, %v18030_v31  ;;  %v7478_v31 = vld [vmem:[#allocation9 + $0x108] sm:$0xff] }
 0x4e5   : > { %12885 = vmatmul.mubr.msk.f32.gmra.mrb[42].mxu1 %vm4299_vm2, %v16186_v9  ;;  %v13325_v9 = vpack.c.bf16 %v7090_v8, %v7089_v24 }
 0x4e6   : > { %12887 = vmatprep.mubr.msk.f32.mxu1 %vm4299_vm2, %v18031_v48  ;;  %v7477_v48 = vld [vmem:[#allocation9 + $0x100] sm:$0xff] }
 0x4e9   : > { %12888 = vmatmul.mubr.msk.f32.gmra.mrb[44].mxu1 %vm4299_vm2, %v16194_v46 }
 0x4ea   : > { %12890 = vmatprep.mubr.msk.f32.mxu1 %vm4299_vm2, %v16395_v18  ;;  %v13329_v18 = vpack.c.bf16 %v7478_v31, %v7477_v48 }
 0x4ed   : > { %12891 = vmatmul.mubr.msk.f32.gmra.mrb[46].mxu1 %vm4299_vm2, %v16399_v12 }
 0x4ee   : > { %12901 = vmatprep.mubr.msk.f32.mxu1 %vm4299_vm2, %v15959_v47  ;;  %v6694_v47 = vld [vmem:[#allocation3 + $0x198] sm:$0xff] }
 0x4f1   : > { %12902 = vmatmul.mubr.msk.f32.vlgmr.msra.gmra.mrb[16].mxu1 %vm4299_vm2, %v15964_v11  ;;  %v6695_v11 = vld [vmem:[#allocation3 + $0x1a0] sm:$0xff] }
 0x4f2   : > { %12904 = vmatprep.mubr.msk.f32.mxu1 %vm4299_vm2, %v15968_v6  ;;  %13324 = vmatpush3.bf16.msra.mxu1 %v13321_v38  ;;  %v7479_v6 = vld [vmem:[#allocation9 + $0x110] sm:$0xff]  ;;  %v14252_v38 = vmov 0.0|0.0  }
 0x4f3   : > { %13326 = vmatprep.subr.bf16.mxu1 %v13325_v9  ;;  %13337 = vmatprep.subr.bf16.mxu0 %v14252_v38 }
 0x4f5   : > { %12905 = vmatmul.mubr.msk.f32.gmra.mrb[18].mxu1 %vm4299_vm2, %v15972_v44  ;;  %v7480_v44 = vld [vmem:[#allocation9 + $0x118] sm:$0xff] }
 0x4f6   : > { %12907 = vmatprep.mubr.msk.f32.mxu1 %vm4299_vm2, %v15976_v55  ;;  %13328 = vmatpush3.bf16.msra.mxu1 %v13325_v9  ;;  %v7054_v55 = vld [vmem:[#allocation3 + $0x31] sm:$0xff] }
 0x4f7   : > { %13330 = vmatprep.subr.bf16.mxu1 %v13329_v18  ;;  %v18035_v9 = vld [vmem:[#allocation34_spill] sm:$0xff] }
 0x4f9   : > { %12908 = vmatmul.mubr.msk.f32.gmra.mrb[20].mxu1 %vm4299_vm2, %v15980_v58  ;;  %v13333_v58 = vpack.c.bf16 %v7480_v44, %v7479_v6 }
 0x4fa   : > { %12910 = vmatprep.mubr.msk.f32.mxu1 %vm4299_vm2, %v15984_v59  ;;  %v7055_v59 = vld [vmem:[#allocation3 + $0x39] sm:$0xff] }
 0x4fd   : > { %12911 = vmatmul.mubr.msk.f32.gmra.mrb[22].mxu1 %vm4299_vm2, %v15988_v53  ;;  %v7056_v53 = vld [vmem:[#allocation3 + $0x49] sm:$0xff] }
 0x4fe   : > { %12913 = vmatprep.mubr.msk.f32.mxu1 %vm4299_vm2, %v15992_v29  ;;  %v7057_v29 = vld [vmem:[#allocation3 + $0x51] sm:$0xff] }
 0x501   : > { %12914 = vmatmul.mubr.msk.f32.gmra.mrb[24].mxu1 %vm4299_vm2, %v15996_v32  ;;  %v7058_v32 = vld [vmem:[#allocation3 + $0x61] sm:$0xff] }
 0x502   : > { %12916 = vmatprep.mubr.msk.f32.mxu1 %vm4299_vm2, %v16000_v40  ;;  %v7059_v40 = vld [vmem:[#allocation3 + $0x69] sm:$0xff] }
 0x505   : > { %12917 = vmatmul.mubr.msk.f32.gmra.mrb[26].mxu1 %vm4299_vm2, %v16004_v2  ;;  %v7060_v2 = vld [vmem:[#allocation3 + $0x79] sm:$0xff] }
 0x506   : > { %12919 = vmatprep.mubr.msk.f32.mxu1 %vm4299_vm2, %v16008_v41  ;;  %v7061_v41 = vld [vmem:[#allocation3 + $0x81] sm:$0xff] }
 0x509   : > { %12920 = vmatmul.mubr.msk.f32.gmra.mrb[28].mxu1 %vm4299_vm2, %v16012_v60  ;;  %v7062_v60 = vld [vmem:[#allocation3 + $0x91] sm:$0xff] }
 0x50a   : > { %12922 = vmatprep.mubr.msk.f32.mxu1 %vm4299_vm2, %v16016_v56  ;;  %v7063_v56 = vld [vmem:[#allocation3 + $0x99] sm:$0xff] }
 0x50d   : > { %12923 = vmatmul.mubr.msk.f32.gmra.mrb[30].mxu1 %vm4299_vm2, %v16020_v20  ;;  %v7064_v20 = vld [vmem:[#allocation3 + $0xa9] sm:$0xff] }
 0x50e   : > { %12925 = vmatprep.mubr.msk.f32.mxu1 %vm4299_vm2, %v16024_v50  ;;  %v7065_v50 = vld [vmem:[#allocation3 + $0xb1] sm:$0xff] }
 0x511   : > { %12926 = vmatmul.mubr.msk.f32.gmra.mrb[32].mxu1 %vm4299_vm2, %v16028_v3  ;;  %v7066_v3 = vld [vmem:[#allocation3 + $0xc1] sm:$0xff] }
 0x512   : > { %12928 = vmatprep.mubr.msk.f32.mxu1 %vm4299_vm2, %v16032_v28  ;;  %v7067_v28 = vld [vmem:[#allocation3 + $0xc9] sm:$0xff] }
 0x515   : > { %12929 = vmatmul.mubr.msk.f32.gmra.mrb[34].mxu1 %vm4299_vm2, %v16036_v51  ;;  %v7068_v51 = vld [vmem:[#allocation3 + $0xd9] sm:$0xff] }
 0x516   : > { %12931 = vmatprep.mubr.msk.f32.mxu1 %vm4299_vm2, %v16040_v5  ;;  %v7069_v5 = vld [vmem:[#allocation3 + $0xe1] sm:$0xff] }
 0x519   : > { %12932 = vmatmul.mubr.msk.f32.gmra.mrb[36].mxu1 %vm4299_vm2, %v16044_v63  ;;  %v7070_v63 = vld [vmem:[#allocation3 + $0xf1] sm:$0xff] }
 0x51a   : > { %12934 = vmatprep.mubr.msk.f32.mxu1 %vm4299_vm2, %v16048_v7  ;;  %v7071_v7 = vld [vmem:[#allocation3 + $0xf9] sm:$0xff] }
 0x51d   : > { %12935 = vmatmul.mubr.msk.f32.gmra.mrb[38].mxu1 %vm4299_vm2, %v16052_v16  ;;  %v7072_v16 = vld [vmem:[#allocation3 + $0x109] sm:$0xff] }
 0x51e   : > { %12937 = vmatprep.mubr.msk.f32.mxu1 %vm4299_vm2, %v16056_v19  ;;  %v7073_v19 = vld [vmem:[#allocation3 + $0x111] sm:$0xff] }
 0x521   : > { %12938 = vmatmul.mubr.msk.f32.gmra.mrb[40].mxu1 %vm4299_vm2, %v16060_v21  ;;  %v7085_v21 = vld [vmem:[#allocation3 + $0x1a1] sm:$0xff] }
 0x522   : > { %12940 = vmatprep.mubr.msk.f32.mxu1 %vm4299_vm2, %v16064_v52  ;;  %v18033_v52 = vld [vmem:[#allocation32_spill] sm:$0xff] }
 0x525   : > { %12941 = vmatmul.mubr.msk.f32.gmra.mrb[42].mxu1 %vm4299_vm2, %v16068_v23  ;;  %v18034_v23 = vld [vmem:[#allocation33_spill] sm:$0xff] }
 0x526   : > { %12943 = vmatprep.mubr.msk.f32.mxu1 %vm4299_vm2, %v16259_v37  ;;  %v18036_v37 = vld [vmem:[#allocation35_spill] sm:$0xff] }
 0x529   : > { %12944 = vmatmul.mubr.msk.f32.gmra.mrb[44].mxu1 %vm4299_vm2, %v16263_v0  ;;  %v18037_v0 = vld [vmem:[#allocation37_spill] sm:$0xff] }
 0x52a   : > { %12946 = vmatprep.mubr.msk.f32.mxu1 %vm4299_vm2, %v6694_v47 }
 0x52d   : > { %12947 = vmatmul.mubr.msk.f32.gmra.mrb[46].mxu1 %vm4299_vm2, %v6695_v11 }
 0x52e   : > { %12957 = vmatprep.mubr.msk.f32.mxu1 %vm4299_vm2, %v7054_v55 }
 0x531   : > { %12958 = vmatmul.mubr.msk.f32.vlgmr.msra.gmra.mrb[16].mxu1 %vm4299_vm2, %v7055_v59 }
 0x532   : > { %12960 = vmatprep.mubr.msk.f32.mxu1 %vm4299_vm2, %v7056_v53  ;;  %13332 = vmatpush3.bf16.msra.mxu1 %v13329_v18 }
 0x533   : > { %13334 = vmatprep.subr.bf16.mxu1 %v13333_v58 }
 0x535   : > { %12961 = vmatmul.mubr.msk.f32.gmra.mrb[18].mxu1 %vm4299_vm2, %v7057_v29 }
 0x536   : > { %12963 = vmatprep.mubr.msk.f32.mxu1 %vm4299_vm2, %v7058_v32  ;;  %13336 = vmatpush3.bf16.msra.mxu1 %v13333_v58 }
 0x537   : > { %13343 = vmatprep.subr.bf16.mxu1 %v14252_v38 }
 0x539   : > { %12964 = vmatmul.mubr.msk.f32.gmra.mrb[20].mxu1 %vm4299_vm2, %v7059_v40 }
 0x53a   : > { %12966 = vmatprep.mubr.msk.f32.mxu1 %vm4299_vm2, %v7060_v2 }
 0x53d   : > { %12967 = vmatmul.mubr.msk.f32.gmra.mrb[22].mxu1 %vm4299_vm2, %v7061_v41 }
 0x53e   : > { %12969 = vmatprep.mubr.msk.f32.mxu1 %vm4299_vm2, %v7062_v60 }
 0x541   : > { %12970 = vmatmul.mubr.msk.f32.gmra.mrb[24].mxu1 %vm4299_vm2, %v7063_v56 }
 0x542   : > { %12972 = vmatprep.mubr.msk.f32.mxu1 %vm4299_vm2, %v7064_v20 }
 0x545   : > { %12973 = vmatmul.mubr.msk.f32.gmra.mrb[26].mxu1 %vm4299_vm2, %v7065_v50 }
 0x546   : > { %12975 = vmatprep.mubr.msk.f32.mxu1 %vm4299_vm2, %v7066_v3 }
 0x549   : > { %12976 = vmatmul.mubr.msk.f32.gmra.mrb[28].mxu1 %vm4299_vm2, %v7067_v28 }
 0x54a   : > { %12978 = vmatprep.mubr.msk.f32.mxu1 %vm4299_vm2, %v7068_v51 }
 0x54d   : > { %12979 = vmatmul.mubr.msk.f32.gmra.mrb[30].mxu1 %vm4299_vm2, %v7069_v5 }
 0x54e   : > { %12981 = vmatprep.mubr.msk.f32.mxu1 %vm4299_vm2, %v7070_v63 }
 0x551   : > { %12982 = vmatmul.mubr.msk.f32.gmra.mrb[32].mxu1 %vm4299_vm2, %v7071_v7 }
 0x552   : > { %12984 = vmatprep.mubr.msk.f32.mxu1 %vm4299_vm2, %v7072_v16 }
 0x555   : > { %12985 = vmatmul.mubr.msk.f32.gmra.mrb[34].mxu1 %vm4299_vm2, %v7073_v19 }
 0x556   : > { %12987 = vmatprep.mubr.msk.f32.mxu1 %vm4299_vm2, %v15901_v36  ;;  %v7084_v36 = vld [vmem:[#allocation3 + $0x199] sm:$0xff] }
 0x559   : > { %12988 = vmatmul.mubr.msk.f32.gmra.mrb[36].mxu1 %vm4299_vm2, %v17999_v34  ;;  %v18038_v34 = vld [vmem:[#allocation42_spill] sm:$0xff] }
 0x55a   : > { %12990 = vmatprep.mubr.msk.f32.mxu1 %vm4299_vm2, %v18000_v39  ;;  %v18039_v39 = vld [vmem:[#allocation43_spill] sm:$0xff] }
 0x55d   : > { %12991 = vmatmul.mubr.msk.f32.gmra.mrb[38].mxu1 %vm4299_vm2, %v18001_v27  ;;  %v18040_v27 = vld [vmem:[#allocation45_spill] sm:$0xff] }
 0x55e   : > { %12993 = vmatprep.mubr.msk.f32.mxu1 %vm4299_vm2, %v18002_v49  ;;  %v18041_v49 = vld [vmem:[#allocation49_spill] sm:$0xff] }
 0x561   : > { %12994 = vmatmul.mubr.msk.f32.gmra.mrb[40].mxu1 %vm4299_vm2, %v18003_v15  ;;  %v18042_v15 = vld [vmem:[#allocation50_spill] sm:$0xff] }
 0x562   : > { %12996 = vmatprep.mubr.msk.f32.mxu1 %vm4299_vm2, %v18004_v17  ;;  %v18043_v17 = vld [vmem:[#allocation51_spill] sm:$0xff] }
 0x565   : > { %12997 = vmatmul.mubr.msk.f32.gmra.mrb[42].mxu1 %vm4299_vm2, %v18005_v25  ;;  %v18044_v25 = vld [vmem:[#allocation52_spill] sm:$0xff] }
 0x566   : > { %12999 = vmatprep.mubr.msk.f32.mxu1 %vm4299_vm2, %v16327_v33  ;;  %v18045_v33 = vld [vmem:[#allocation44_spill] sm:$0xff] }
 0x569   : > { %13000 = vmatmul.mubr.msk.f32.gmra.mrb[44].mxu1 %vm4299_vm2, %v16331_v61  ;;  %v7474_v61 = vld [vmem:[#allocation3 + $0x19a] sm:$0xff] }
 0x56a   : > { %13002 = vmatprep.mubr.msk.f32.mxu1 %vm4299_vm2, %v7084_v36 }
 0x56d   : > { %13003 = vmatmul.mubr.msk.f32.gmra.mrb[46].mxu1 %vm4299_vm2, %v7085_v21 }
 0x56e   : > { %13013 = vmatprep.mubr.msk.f32.mxu1 %vm4299_vm2, %v18006_v26  ;;  %v7475_v26 = vld [vmem:[#allocation3 + $0x1a2] sm:$0xff] }
 0x571   : > { %13014 = vmatmul.mubr.msk.f32.vlgmr.msra.gmra.mrb[16].mxu1 %vm4299_vm2, %v18007_v30  ;;  %v8013_v30 = vld [vmem:[%s17705_s8] sm:$0xff] }
 0x572   : > { %13016 = vmatprep.mubr.msk.f32.mxu1 %vm4299_vm2, %v18008_v57 }
 0x575   : > { %13017 = vmatmul.mubr.msk.f32.gmra.mrb[18].mxu1 %vm4299_vm2, %v18009_v14  ;;  %v8015_v14 = vld [vmem:[%s17705_s8 + $0x10] sm:$0xff] }
 0x576   : > { %13019 = vmatprep.mubr.msk.f32.mxu1 %vm4299_vm2, %v18010_v42  ;;  %v8016_v42 = vld [vmem:[%s17705_s8 + $0x18] sm:$0xff] }
 0x579   : > { %13020 = vmatmul.mubr.msk.f32.gmra.mrb[20].mxu1 %vm4299_vm2, %v18011_v35  ;;  %v13341_v35 = vpack.c.bf16 %v8016_v42, %v8015_v14 }
 0x57a   : > { %13022 = vmatprep.mubr.msk.f32.mxu1 %vm4299_vm2, %v18012_v54  ;;  %v18046_v54 = vmov 0.0  }
 0x57b   : > { %13069 = vmatprep.mubr.msk.f32.mxu0 %vm14253_vm8, %v18046_v54 }
 0x57d   : > { %13023 = vmatmul.mubr.msk.f32.gmra.mrb[22].mxu1 %vm4299_vm2, %v18013_v43  ;;  %v16589_v43 = vld [vmem:[%s18047_s24] ss:$0 sm:$0xff] }
 0x57e   : > { %13025 = vmatprep.mubr.msk.f32.mxu1 %vm4299_vm2, %v18014_v4 }
 0x581   : > { %13026 = vmatmul.mubr.msk.f32.gmra.mrb[24].mxu1 %vm4299_vm2, %v18015_v22 }
 0x582   : > { %13028 = vmatprep.mubr.msk.f32.mxu1 %vm4299_vm2, %v18016_v10 }
 0x585   : > { %13029 = vmatmul.mubr.msk.f32.gmra.mrb[26].mxu1 %vm4299_vm2, %v18017_v62 }
 0x586   : > { %13031 = vmatprep.mubr.msk.f32.mxu1 %vm4299_vm2, %v18018_v45 }
 0x589   : > { %13032 = vmatmul.mubr.msk.f32.gmra.mrb[28].mxu1 %vm4299_vm2, %v18033_v52 }
 0x58a   : > { %13034 = vmatprep.mubr.msk.f32.mxu1 %vm4299_vm2, %v18034_v23 }
 0x58d   : > { %13035 = vmatmul.mubr.msk.f32.gmra.mrb[30].mxu1 %vm4299_vm2, %v18035_v9 }
 0x58e   : > { %13037 = vmatprep.mubr.msk.f32.mxu1 %vm4299_vm2, %v18036_v37 }
 0x591   : > { %13038 = vmatmul.mubr.msk.f32.gmra.mrb[32].mxu1 %vm4299_vm2, %v18023_v1 }
 0x592   : > { %13040 = vmatprep.mubr.msk.f32.mxu1 %vm4299_vm2, %v18037_v0 }
 0x595   : > { %13041 = vmatmul.mubr.msk.f32.gmra.mrb[34].mxu1 %vm4299_vm2, %v18025_v13 }
 0x596   : > { %13043 = vmatprep.mubr.msk.f32.mxu1 %vm4299_vm2, %v18038_v34 }
 0x599   : > { %13044 = vmatmul.mubr.msk.f32.gmra.mrb[36].mxu1 %vm4299_vm2, %v18039_v39 }
 0x59a   : > { %13046 = vmatprep.mubr.msk.f32.mxu1 %vm4299_vm2, %v18040_v27 }
 0x59d   : > { %13047 = vmatmul.mubr.msk.f32.gmra.mrb[38].mxu1 %vm4299_vm2, %v18041_v49 }
 0x59e   : > { %13049 = vmatprep.mubr.msk.f32.mxu1 %vm4299_vm2, %v18042_v15 }
 0x5a1   : > { %13050 = vmatmul.mubr.msk.f32.gmra.mrb[40].mxu1 %vm4299_vm2, %v18043_v17 }
 0x5a2   : > { %13052 = vmatprep.mubr.msk.f32.mxu1 %vm4299_vm2, %v18044_v25 }
 0x5a5   : > { %13053 = vmatmul.mubr.msk.f32.gmra.mrb[42].mxu1 %vm4299_vm2, %v16194_v46  ;;  %v8014_v46 = vld [vmem:[%s17705_s8 + $0x8] sm:$0xff] }
 0x5a6   : > { %13055 = vmatprep.mubr.msk.f32.mxu1 %vm4299_vm2, %v18045_v33  ;;  %v13338_v57 = vpack.c.bf16 %v8014_v46, %v8013_v30 }
 0x5a8   : > { %13345 = vmatpush3.bf16.msra.mxu1 %v13338_v57  ;;  %13339 = vmatpush3.bf16.msra.mxu0 %v13338_v57 }
 0x5a9   : > { %13056 = vmatmul.mubr.msk.f32.gmra.mrb[44].mxu1 %vm4299_vm2, %v16399_v12  ;;  %13346 = vmatprep.subr.bf16.mxu1 %v14252_v38 }
 0x5aa   : > { %13058 = vmatprep.mubr.msk.f32.mxu1 %vm4299_vm2, %v7474_v61  ;;  %13340 = vmatprep.subr.bf16.mxu0 %v14252_v38 }
 0x5ac   : > { %13348 = vmatpush3.bf16.msra.mxu1 %v13341_v35  ;;  %13342 = vmatpush3.bf16.msra.mxu0 %v13341_v35 }
 0x5ad   : > { %13059 = vmatmul.mubr.msk.f32.gmra.mrb[46].mxu1 %vm4299_vm2, %v7475_v26  ;;  %13083 = vmatprep.subr.mxu0 %v18046_v54 }
 0x5ae   : > { %13080 = vmatprep.mubr.msk.f32.mxu1 %vm14253_vm8, %v18046_v54 }
 0x644   : > { %v13015_v4 = vpop.f32.mrb[16].mxu1 }
 0x645   : > { %v16592_v22 = vadd.f32 %v13015_v4, %v16589_v43  ;;  %v7643_v10 = vpop.f32.mrb[17].mxu1 }
 0x646   : > { %v16595_v62 = vadd.f32 %v16589_v43, %v7643_v10 }
 0x647   : > { %v7874_v45 = vsel %vm4299_vm2, %v16592_v22, 0.0 }
 0x648   : > { %v7873_v8 = vsel %vm4299_vm2, %v16595_v62, 0.0  ;;  %v13018_v12 = vpop.f32.mrb[18].mxu1 }
 0x649   : > { %v7653_v24 = vpop.f32.mrb[19].mxu1  ;;  %v16602_v31 = vadd.f32 %v13018_v12, %v16589_v43  ;;  %v7875_v48 = vadd.f32 %v7874_v45, %v7873_v8 }
 0x64a   : > { %v16605_v1 = vadd.f32 %v16589_v43, %v7653_v24 }
 0x64b   : > { %v7878_v6 = vsel %vm4299_vm2, %v16602_v31, 0.0 }
 0x64c   : > { %v7876_v13 = vsel %vm4299_vm2, %v16605_v1, 0.0  ;;  %v13021_v18 = vpop.f32.mrb[20].mxu1 }
 0x64d   : > { %v7877_v47 = vadd.f32 %v7876_v13, %v7875_v48  ;;  %v7663_v11 = vpop.f32.mrb[21].mxu1  ;;  %v16612_v44 = vadd.f32 %v13021_v18, %v16589_v43 }
 0x64e   : > { %v16615_v55 = vadd.f32 %v16589_v43, %v7663_v11 }
 0x64f   : > { %v7879_v58 = vadd.f32 %v7878_v6, %v7877_v47  ;;  %v7882_v40 = vsel %vm4299_vm2, %v16612_v44, 0.0 }
 0x650   : > { %v7880_v59 = vsel %vm4299_vm2, %v16615_v55, 0.0  ;;  %v13024_v53 = vpop.f32.mrb[22].mxu1 }
 0x651   : > { %v7881_v29 = vadd.f32 %v7880_v59, %v7879_v58  ;;  %v7673_v32 = vpop.f32.mrb[23].mxu1  ;;  %v16622_v2 = vadd.f32 %v13024_v53, %v16589_v43  ;;  %v7950_v59 = vsel %vm4299_vm2, %v16612_v44, -inf }
 0x652   : > { %v16625_v41 = vadd.f32 %v16589_v43, %v7673_v32  ;;  %v7945_v32 = vsel %vm4299_vm2, %v16592_v22, -inf }
 0x653   : > { %v7883_v60 = vadd.f32 %v7882_v40, %v7881_v29  ;;  %v7886_v28 = vsel %vm4299_vm2, %v16622_v2, 0.0  ;;  %v7944_v40 = vsel %vm4299_vm2, %v16595_v62, -inf }
 0x654   : > { %v7884_v56 = vsel %vm4299_vm2, %v16625_v41, 0.0  ;;  %v13027_v20 = vpop.f32.mrb[24].mxu1 }
 0x655   : > { %v7885_v50 = vadd.f32 %v7884_v56, %v7883_v60  ;;  %v7683_v3 = vpop.f32.mrb[25].mxu1  ;;  %v16632_v51 = vadd.f32 %v13027_v20, %v16589_v43  ;;  %v7948_v60 = vsel %vm4299_vm2, %v16615_v55, -inf }
 0x656   : > { %v16635_v5 = vadd.f32 %v16589_v43, %v7683_v3 }
 0x657   : > { %v7887_v63 = vadd.f32 %v7886_v28, %v7885_v50  ;;  %v7890_v21 = vsel %vm4299_vm2, %v16632_v51, 0.0  ;;  %v7954_v50 = vsel %vm4299_vm2, %v16622_v2, -inf }
 0x658   : > { %v7888_v7 = vsel %vm4299_vm2, %v16635_v5, 0.0  ;;  %v13030_v16 = vpop.f32.mrb[26].mxu1 }
 0x659   : > { %v7889_v19 = vadd.f32 %v7888_v7, %v7887_v63  ;;  %v7693_v36 = vpop.f32.mrb[27].mxu1  ;;  %v16642_v52 = vadd.f32 %v13030_v16, %v16589_v43  ;;  %v7947_v7 = vsel %vm4299_vm2, %v16602_v31, -inf  ;;  %v7946_v16 = vsel %vm4299_vm2, %v16605_v1, -inf }
 0x65a   : > { %v16645_v23 = vadd.f32 %v16589_v43, %v7693_v36 }
 0x65b   : > { %v7891_v9 = vadd.f32 %v7890_v21, %v7889_v19  ;;  %v7894_v27 = vsel %vm4299_vm2, %v16642_v52, 0.0  ;;  %v7951_v19 = vmax.f32 %v7945_v32, %v7950_v59  ;;  %v7952_v21 = vsel %vm4299_vm2, %v16625_v41, -inf }
 0x65c   : > { %v7892_v37 = vsel %vm4299_vm2, %v16645_v23, 0.0  ;;  %v13033_v0 = vpop.f32.mrb[28].mxu1 }
 0x65d   : > { %v7893_v34 = vadd.f32 %v7892_v37, %v7891_v9  ;;  %v7703_v39 = vpop.f32.mrb[29].mxu1  ;;  %v16652_v49 = vadd.f32 %v13033_v0, %v16589_v43  ;;  %v7958_v9 = vsel %vm4299_vm2, %v16632_v51, -inf  ;;  %v7956_v37 = vsel %vm4299_vm2, %v16635_v5, -inf }
 0x65e   : > { %v16655_v15 = vadd.f32 %v16589_v43, %v7703_v39  ;;  %v7949_v39 = vmax.f32 %v7944_v40, %v7948_v60 }
 0x65f   : > { %v7895_v17 = vadd.f32 %v7894_v27, %v7893_v34  ;;  %v7898_v38 = vsel %vm4299_vm2, %v16652_v49, 0.0  ;;  %v7955_v27 = vmax.f32 %v7947_v7, %v7954_v50 }
 0x660   : > { %v7896_v25 = vsel %vm4299_vm2, %v16655_v15, 0.0  ;;  %v13036_v33 = vpop.f32.mrb[30].mxu1 }
 0x661   : > { %v7897_v61 = vadd.f32 %v7896_v25, %v7895_v17  ;;  %v7713_v26 = vpop.f32.mrb[31].mxu1  ;;  %v16662_v30 = vadd.f32 %v13036_v33, %v16589_v43  ;;  %v7962_v17 = vsel %vm4299_vm2, %v16642_v52, -inf }
 0x662   : > { %v16665_v46 = vadd.f32 %v16589_v43, %v7713_v26 }
 0x663   : > { %v7899_v57 = vadd.f32 %v7898_v38, %v7897_v61  ;;  %v7902_v10 = vsel %vm4299_vm2, %v16662_v30, 0.0  ;;  %v7960_v61 = vsel %vm4299_vm2, %v16645_v23, -inf }
 0x664   : > { %v7900_v14 = vsel %vm4299_vm2, %v16665_v46, 0.0  ;;  %v13039_v42 = vpop.f32.mrb[32].mxu1 }
 0x665   : > { %v7901_v35 = vadd.f32 %v7900_v14, %v7899_v57  ;;  %v7723_v4 = vpop.f32.mrb[33].mxu1  ;;  %v16672_v45 = vadd.f32 %v13039_v42, %v16589_v43  ;;  %v7953_v14 = vmax.f32 %v7946_v16, %v7952_v21  ;;  %v7959_v42 = vmax.f32 %v7951_v19, %v7958_v9 }
 0x666   : > { %v16675_v8 = vadd.f32 %v16589_v43, %v7723_v4 }
 0x667   : > { %v7903_v12 = vadd.f32 %v7902_v10, %v7901_v35  ;;  %v7906_v47 = vsel %vm4299_vm2, %v16672_v45, 0.0  ;;  %v7957_v35 = vmax.f32 %v7949_v39, %v7956_v37  ;;  %v7966_v10 = vsel %vm4299_vm2, %v16652_v49, -inf }
 0x668   : > { %v7904_v24 = vsel %vm4299_vm2, %v16675_v8, 0.0  ;;  %v13042_v48 = vpop.f32.mrb[34].mxu1  ;;  %v7972_v16 = vsel %vm4299_vm2, %v16675_v8, -inf }
 0x669   : > { %v7905_v13 = vadd.f32 %v7904_v24, %v7903_v12  ;;  %v7733_v18 = vpop.f32.mrb[35].mxu1  ;;  %v16682_v11 = vadd.f32 %v13042_v48, %v16589_v43  ;;  %v7964_v12 = vsel %vm4299_vm2, %v16655_v15, -inf  ;;  %v7970_v24 = vsel %vm4299_vm2, %v16662_v30, -inf }
 0x66a   : > { %v16685_v6 = vadd.f32 %v16589_v43, %v7733_v18  ;;  %v7963_v18 = vmax.f32 %v7955_v27, %v7962_v17 }
 0x66b   : > { %v7907_v58 = vadd.f32 %v7906_v47, %v7905_v13  ;;  %v7910_v3 = vsel %vm4299_vm2, %v16682_v11, 0.0  ;;  %v7961_v47 = vmax.f32 %v7953_v14, %v7960_v61  ;;  %v7978_v19 = vsel %vm4299_vm2, %v16682_v11, -inf }
 0x66c   : > { %v7908_v53 = vsel %vm4299_vm2, %v16685_v6, 0.0  ;;  %v13045_v29 = vpop.f32.mrb[36].mxu1  ;;  %v7971_v50 = vmax.f32 %v7963_v18, %v7970_v24  ;;  %v7976_v37 = vsel %vm4299_vm2, %v16685_v6, -inf }
 0x66d   : > { %v7909_v56 = vadd.f32 %v7908_v53, %v7907_v58  ;;  %v7743_v20 = vpop.f32.mrb[37].mxu1  ;;  %v16702_v28 = vadd.f32 %v13045_v29, %v16589_v43  ;;  %v7968_v58 = vsel %vm4299_vm2, %v16665_v46, -inf  ;;  %v7974_v29 = vsel %vm4299_vm2, %v16672_v45, -inf }
 0x66e   : > { %v16705_v63 = vadd.f32 %v16589_v43, %v7743_v20  ;;  %v7965_v20 = vmax.f32 %v7957_v35, %v7964_v12  ;;  %v7969_v7 = vmax.f32 %v7961_v47, %v7968_v58 }
 0x66f   : > { %v7911_v36 = vadd.f32 %v7910_v3, %v7909_v56  ;;  %v7914_v26 = vsel %vm4299_vm2, %v16702_v28, 0.0  ;;  %v7967_v56 = vmax.f32 %v7959_v42, %v7966_v10 }
 0x670   : > { %v7912_v0 = vsel %vm4299_vm2, %v16705_v63, 0.0  ;;  %v13048_v34 = vpop.f32.mrb[38].mxu1  ;;  %v7980_v27 = vsel %vm4299_vm2, %v16705_v63, -inf  ;;  %v7973_v61 = vmax.f32 %v7965_v20, %v7972_v16  ;;  %v7977_v42 = vmax.f32 %v7969_v7, %v7976_v37 }
 0x671   : > { %v7913_v25 = vadd.f32 %v7912_v0, %v7911_v36  ;;  %v7753_v33 = vpop.f32.mrb[39].mxu1  ;;  %v16726_v38 = vadd.f32 %v13048_v34, %v16589_v43  ;;  %v7975_v9 = vmax.f32 %v7967_v56, %v7974_v29  ;;  %v7982_v0 = vsel %vm4299_vm2, %v16702_v28, -inf }
 0x672   : > { %v16729_v57 = vadd.f32 %v16589_v43, %v7753_v33  ;;  %v7981_v24 = vmax.f32 %v7973_v61, %v7980_v27 }
 0x673   : > { %v7915_v4 = vadd.f32 %v7914_v26, %v7913_v25  ;;  %v7918_v32 = vsel %vm4299_vm2, %v16726_v38, 0.0  ;;  %v7979_v26 = vmax.f32 %v7971_v50, %v7978_v19  ;;  %v7983_v35 = vmax.f32 %v7975_v9, %v7982_v0 }
 0x674   : > { %v7916_v48 = vsel %vm4299_vm2, %v16729_v57, 0.0  ;;  %v13051_v13 = vpop.f32.mrb[40].mxu1 }
 0x675   : > { %v7917_v59 = vadd.f32 %v7916_v48, %v7915_v4  ;;  %v7763_v53 = vpop.f32.mrb[41].mxu1  ;;  %v16746_v40 = vadd.f32 %v13051_v13, %v16589_v43  ;;  %v7986_v4 = vsel %vm4299_vm2, %v16726_v38, -inf  ;;  %v7984_v48 = vsel %vm4299_vm2, %v16729_v57, -inf }
 0x676   : > { %v16749_v60 = vadd.f32 %v16589_v43, %v7763_v53 }
 0x677   : > { %v7919_v3 = vadd.f32 %v7918_v32, %v7917_v59  ;;  %v7922_v17 = vsel %vm4299_vm2, %v16746_v40, 0.0  ;;  %v7990_v58 = vsel %vm4299_vm2, %v16746_v40, -inf  ;;  %v7987_v32 = vmax.f32 %v7979_v26, %v7986_v4 }
 0x678   : > { %v7920_v36 = vsel %vm4299_vm2, %v16749_v60, 0.0  ;;  %v13054_v21 = vpop.f32.mrb[42].mxu1  ;;  %v7988_v59 = vsel %vm4299_vm2, %v16749_v60, -inf }
 0x679   : > { %v7921_v34 = vadd.f32 %v7920_v36, %v7919_v3  ;;  %v7773_v39 = vpop.f32.mrb[43].mxu1  ;;  %v16766_v25 = vadd.f32 %v13054_v21, %v16589_v43  ;;  %v7985_v3 = vmax.f32 %v7977_v42, %v7984_v48  ;;  %v7991_v21 = vmax.f32 %v7983_v35, %v7990_v58 }
 0x67a   : > { %v16769_v33 = vadd.f32 %v16589_v43, %v7773_v39  ;;  %v7989_v9 = vmax.f32 %v7981_v24, %v7988_v59 }
 0x67b   : > { %v7923_v14 = vadd.f32 %v7922_v17, %v7921_v34  ;;  %v7926_v53 = vsel %vm4299_vm2, %v16766_v25, 0.0  ;;  %v7994_v56 = vsel %vm4299_vm2, %v16766_v25, -inf }
 0x67c   : > { %v7924_v10 = vsel %vm4299_vm2, %v16769_v33, 0.0  ;;  %v13057_v12 = vpop.f32.mrb[44].mxu1  ;;  %v7992_v20 = vsel %vm4299_vm2, %v16769_v33, -inf  ;;  %v7995_v39 = vmax.f32 %v7987_v32, %v7994_v56 }
 0x67d   : > { %v7925_v13 = vadd.f32 %v7924_v10, %v7923_v14  ;;  %v16778_v18 = vadd.f32 %v13057_v12, %v16589_v43  ;;  %v7783_v47 = vpop.f32.mrb[45].mxu1  ;;  %v7993_v27 = vmax.f32 %v7985_v3, %v7992_v20 }
 0x67e   : > { %v16787_v29 = vadd.f32 %v16589_v43, %v7783_v47 }
 0x67f   : > { %v7927_v50 = vadd.f32 %v7926_v53, %v7925_v13  ;;  %v7998_v7 = vsel %vm4299_vm2, %v16778_v18, -inf  ;;  %v7930_v17 = vsel %vm4299_vm2, %v16778_v18, 0.0 }
 0x680   : > { %v7928_v16 = vsel %vm4299_vm2, %v16787_v29, 0.0  ;;  %v7996_v19 = vsel %vm4299_vm2, %v16787_v29, -inf  ;;  %v13060_v36 = vpop.f32.mrb[46].mxu1  ;;  %v7999_v26 = vmax.f32 %v7991_v21, %v7998_v7 }
 0x681   : > { %v7929_v37 = vadd.f32 %v7928_v16, %v7927_v50  ;;  %v16800_v0 = vadd.f32 %v13060_v36, %v16589_v43  ;;  %v7793_v34 = vpop.f32.mrb[47].mxu1  ;;  %v7997_v14 = vmax.f32 %v7989_v9, %v7996_v19 }
 0x682   : > { %v16805_v61 = vadd.f32 %v16589_v43, %v7793_v34  ;;  %v8091_v34 = vld [vmem:[%s18048_s28] sm:$0x3]  ;;  %s10591_s28 = sshll.u32 %s17495_s22, 4  ;;  %s17650_s28 = int_to_ptr.vmem [resolvable:$true] %s10591_s28 }
 0x683   : > { %v8002_v42 = vsel %vm4299_vm2, %v16800_v0, -inf  ;;  %v7931_v35 = vadd.f32 %v7930_v17, %v7929_v37  ;;  %v7934_v13 = vsel %vm4299_vm2, %v16800_v0, 0.0  ;;  %v8004_v43 = vmax.f32 %v7997_v14, %v7999_v26  ;;  %s14169_s14 = scalar_lea.vmem %s17650_s28, 4096 }
 0x684   : > { %v8003_v4 = vmax.f32 %v7995_v39, %v8002_v42  ;;  %v7932_v10 = vsel %vm4299_vm2, %v16805_v61, 0.0  ;;  %v8000_v12 = vsel %vm4299_vm2, %v16805_v61, -inf  ;;  %p14170_p10 = scmp.ne.s32.totalorder %s17650_s28, %s14169_s14 }
 0x685   : > { %v7933_v24 = vadd.f32 %v7932_v10, %v7931_v35  ;;  %v8001_v48 = vmax.f32 %v7993_v27, %v8000_v12 }
 0x686   : > { %p14171_p3 = pnand %p14170_p10, %p14486_p5 }
 0x687   : > { %v7935_v47 = vadd.f32 %v7934_v13, %v7933_v24  ;;  %v8005_v58 = vmax.f32 %v8001_v48, %v8003_v4  ;;  %v8322_v13 = vlaneseq }
 0x688   : > { %p14172_p7 = pneg %p14171_p3 }
 0x689   : > { %v7936_v59 = vrot.slane %v7935_v47, 4  ;;  %v8006_v53 = vmax.f32 %v8004_v43, %v8005_v58  ;;  %v16826_v43 = vshrl.u32 %v8322_v13, 7 }
 0x68b   : > { %v7937_v32 = vadd.f32 %v7936_v59, %v7935_v47  ;;  %v8007_v56 = vrot.slane %v8006_v53, 4  ;;  %v16829_v47 = vsub.s32 0, %v16826_v43 }
 0x68d   : > { %v7938_v20 = vrot.slane %v7937_v32, 2  ;;  %v8008_v50 = vmax.f32 %v8006_v53, %v8007_v56 }
 0x68f   : > { %v7939_v3 = vadd.f32 %v7938_v20, %v7937_v32  ;;  %v8009_v7 = vrot.slane %v8008_v50, 2 }
 0x691   : > { %v7940_v16 = vrot.slane %v7939_v3, 1  ;;  %v8010_v19 = vmax.f32 %v8008_v50, %v8009_v7 }
 0x693   : > { %v7941_v36 = vadd.f32 %v7940_v16, %v7939_v3  ;;  %v8011_v21 = vrot.slane %v8010_v19, 1 }
 0x695   : > { %v7943_v9 = vmul.f32 0.00390625, %v7941_v36  ;;  %v8012_v37 = vmax.f32 %v8010_v19, %v8011_v21 }
 0x697   : > { %13070 = vmatmul.mubr.msk.f32.vlgmr.msra.gmra.mrb[32].mxu0 %vm4299_vm2, %v7943_v9  ;;  %13081 = vmatmul.mubr.msk.f32.vlgmr.msra.gmra.mrb[48].mxu1 %vm4299_vm2, %v8012_v37 }
 0x698   : > { %13085 = vmatprep.mubr.msk.f32.mxu0 %vm14253_vm8, %v18046_v54  ;;  %13084 = vmatpush3.msk.msra.mxu0 %vm8170_vm9, %v8091_v34 }
 0x699   : > { %13088 = vmatprep.subr.mxu0 %v18046_v54 }
 0x76a   : > { %v8086_v39 = vpop.f32.mrb[32].mxu0  ;;  %v8161_v27 = vpop.f32.mrb[48].mxu1 }
 0x76b   : > { %v8165_v17 = vmax.f32 %v8161_v27, 0.0  ;;  %v13071_v26 = vpop.f32.mrb[33].mxu0  ;;  %v13082_v14 = vpop.f32.mrb[49].mxu1  ;;  %v8090_v42 = vmax.f32 %v8086_v39, 0.0 }
 0x76d   : > { %13086 = vmatmul.mubr.msk.f32.vlgmr.msra.gmra.mrb[34].mxu0 %vm8166_vm10, %v8165_v17 }
 0x76e   : > { %13089 = vmatpush3.msk.msra.mxu0 %vm8170_vm9, %v8091_v34  ;;  %13090 = vmatprep.mubr.msk.f32.mxu0 %vm14253_vm8, %v18046_v54 }
 0x775   : > { %13091 = vmatmul.mubr.msk.f32.vlgmr.msra.gmra.mrb[34].mxu0 %vm8166_vm10, %v8090_v42 }
 0x848   : > { %v8313_v35 = vpop.f32.mrb[34].mxu0 }
 0x849   : > { %v8317_v4 = vsub.f32 0.0, %v8313_v35  ;;  %v13092_v10 = vpop.f32.mrb[35].mxu0 }
 0x84b   : > { %v8318_v12 = vmul.f32 1.442695, %v8317_v4 }
 0x84d   : > { %14011 = vpow2.f32 %v8318_v12 }
 0x857   : > { %v14012_v24 = vpop.eup %14011 }
 0x858   : > { %v8320_v48 = vadd.f32 1.0, %v14012_v24 }
 0x85a   : > { %14013 = vrcp.f32 %v8320_v48 }
 0x864   : > { %v14014_v58 = vpop.eup %14013 }
 0x865   : > { %v16832_v54 = vrot.slane %v14014_v58, %v16829_v47 }
 0x867   : > { %v16836_v59 = vmul.f32 %v16832_v54, %v16605_v1  ;;  %v16840_v53 = vmul.f32 %v16832_v54, %v16595_v62  ;;  %v16848_v20 = vmul.f32 %v16832_v54, %v16602_v31  ;;  %v16852_v50 = vmul.f32 %v16832_v54, %v16592_v22 }
 0x868   : > { %v16860_v3 = vmul.f32 %v16832_v54, %v16672_v45  ;;  %v16864_v31 = vmul.f32 %v16832_v54, %v16675_v8  ;;  %v16872_v16 = vmul.f32 %v16832_v54, %v16682_v11  ;;  %v16876_v45 = vmul.f32 %v16832_v54, %v16685_v6 }
 0x869   : > { %v8493_v32 = vsel %vm4299_vm2, %v16836_v59, -inf  ;;  %v8487_v56 = vsel %vm4299_vm2, %v16840_v53, -inf  ;;  %v8496_v62 = vsel %vm4299_vm2, %v16848_v20, -inf  ;;  %v8490_v1 = vsel %vm4299_vm2, %v16852_v50, -inf }
 0x86a   : > { %8494 = vmax.xlane.f32.xlu1 %v8493_v32  ;;  %8488 = vmax.xlane.f32.xlu0 %v8487_v56  ;;  %v8538_v22 = vsel %vm4299_vm2, %v16860_v3, -inf  ;;  %v8535_v7 = vsel %vm4299_vm2, %v16864_v31, -inf  ;;  %v8544_v8 = vsel %vm4299_vm2, %v16872_v16, -inf  ;;  %v8541_v19 = vsel %vm4299_vm2, %v16876_v45, -inf }
 0x86b   : > { %v16884_v36 = vmul.f32 %v16832_v54, %v16612_v44  ;;  %v16888_v11 = vmul.f32 %v16832_v54, %v16615_v55  ;;  %v16896_v9 = vmul.f32 %v16832_v54, %v16702_v28  ;;  %v16900_v44 = vmul.f32 %v16832_v54, %v16705_v63 }
 0x86c   : > { %v16908_v34 = vmul.f32 %v16832_v54, %v16622_v2  ;;  %v16912_v28 = vmul.f32 %v16832_v54, %v16625_v41  ;;  %v16920_v27 = vmul.f32 %v16832_v54, %v16726_v38  ;;  %v16924_v2 = vmul.f32 %v16832_v54, %v16729_v57 }
 0x86d   : > { %18049 = vst [vmem:[#allocation46_spill] sm:$0xff] %v16884_v36  ;;  %v8502_v6 = vsel %vm4299_vm2, %v16884_v36, -inf  ;;  %v8499_v21 = vsel %vm4299_vm2, %v16888_v11, -inf  ;;  %v8550_v55 = vsel %vm4299_vm2, %v16896_v9, -inf  ;;  %v8547_v37 = vsel %vm4299_vm2, %v16900_v44, -inf }
 0x86e   : > { %8497 = vmax.xlane.f32.xlu1 %v8496_v62  ;;  %8491 = vmax.xlane.f32.xlu0 %v8490_v1  ;;  %18050 = vst [vmem:[#allocation48_spill] sm:$0xff] %v16908_v34  ;;  %18051 = vst [vmem:[#allocation19_spill] sm:$0xff] %v16912_v28  ;;  %v8508_v63 = vsel %vm4299_vm2, %v16908_v34, -inf  ;;  %v8505_v39 = vsel %vm4299_vm2, %v16912_v28, -inf  ;;  %v8556_v41 = vsel %vm4299_vm2, %v16920_v27, -inf  ;;  %v8553_v17 = vsel %vm4299_vm2, %v16924_v2, -inf }
 0x86f   : > { %v16932_v26 = vmul.f32 %v16832_v54, %v16632_v51  ;;  %v16936_v38 = vmul.f32 %v16832_v54, %v16635_v5  ;;  %v16944_v42 = vmul.f32 %v16832_v54, %v16746_v40  ;;  %v16948_v51 = vmul.f32 %v16832_v54, %v16749_v60 }
 0x870   : > { %v16956_v4 = vmul.f32 %v16832_v54, %v16642_v52  ;;  %v16960_v40 = vmul.f32 %v16832_v54, %v16645_v23  ;;  %v16968_v12 = vmul.f32 %v16832_v54, %v16766_v25  ;;  %v16972_v52 = vmul.f32 %v16832_v54, %v16769_v33 }
 0x871   : > { %18052 = vst [vmem:[#allocation20_spill] sm:$0xff] %v16932_v26  ;;  %18053 = vst [vmem:[#allocation21_spill] sm:$0xff] %v16936_v38  ;;  %v8514_v57 = vsel %vm4299_vm2, %v16932_v26, -inf  ;;  %v8511_v14 = vsel %vm4299_vm2, %v16936_v38, -inf  ;;  %v8562_v5 = vsel %vm4299_vm2, %v16944_v42, -inf  ;;  %v8559_v35 = vsel %vm4299_vm2, %v16948_v51, -inf }
 0x872   : > { %8539 = vmax.xlane.f32.xlu1 %v8538_v22  ;;  %8536 = vmax.xlane.f32.xlu0 %v8535_v7  ;;  %18054 = vst [vmem:[#allocation22_spill] sm:$0xff] %v16956_v4  ;;  %18055 = vst [vmem:[#allocation23_spill] sm:$0xff] %v16960_v40  ;;  %v8520_v60 = vsel %vm4299_vm2, %v16956_v4, -inf  ;;  %v8517_v10 = vsel %vm4299_vm2, %v16960_v40, -inf  ;;  %v8568_v23 = vsel %vm4299_vm2, %v16968_v12, -inf  ;;  %v8565_v24 = vsel %vm4299_vm2, %v16972_v52, -inf }
 0x873   : > { %v16980_v48 = vmul.f32 %v16832_v54, %v16652_v49  ;;  %v16984_v25 = vmul.f32 %v16832_v54, %v16655_v15  ;;  %v16992_v32 = vmul.f32 %v16832_v54, %v16778_v18  ;;  %v16996_v49 = vmul.f32 %v16832_v54, %v16787_v29 }
 0x874   : > { %v8361_v62 = vsel %vm4299_vm2, %v16852_v50, 0.0  ;;  %v8358_v18 = vsel %vm4299_vm2, %v16840_v53, 0.0  ;;  %v8367_v29 = vsel %vm4299_vm2, %v16848_v20, 0.0  ;;  %v8364_v1 = vsel %vm4299_vm2, %v16836_v59, 0.0 }
 0x875   : > { %18056 = vst [vmem:[#allocation24_spill] sm:$0xff] %v16980_v48  ;;  %18057 = vst [vmem:[#allocation38_spill] sm:$0xff] %v16984_v25  ;;  %v8526_v33 = vsel %vm4299_vm2, %v16980_v48, -inf  ;;  %v8523_v58 = vsel %vm4299_vm2, %v16984_v25, -inf  ;;  %v8574_v15 = vsel %vm4299_vm2, %v16992_v32, -inf  ;;  %v8571_v56 = vsel %vm4299_vm2, %v16996_v49, -inf }
 0x876   : > { %8545 = vmax.xlane.f32.xlu1 %v8544_v8  ;;  %8542 = vmax.xlane.f32.xlu0 %v8541_v19  ;;  %v8409_v22 = vsel %vm4299_vm2, %v16860_v3, 0.0  ;;  %v8406_v7 = vsel %vm4299_vm2, %v16864_v31, 0.0  ;;  %v8415_v8 = vsel %vm4299_vm2, %v16872_v16, 0.0  ;;  %v8412_v19 = vsel %vm4299_vm2, %v16876_v45, 0.0 }
 0x87a   : > { %8503 = vmax.xlane.f32.xlu1 %v8502_v6  ;;  %8500 = vmax.xlane.f32.xlu0 %v8499_v21  ;;  %v17020_v6 = vmul.f32 %v16832_v54, %v16662_v30  ;;  %v17024_v21 = vmul.f32 %v16832_v54, %v16665_v46  ;;  %v17036_v30 = vmul.f32 %v16832_v54, %v16805_v61  ;;  %v8421_v61 = vsel %vm4299_vm2, %v16896_v9, 0.0 }
 0x87c   : > { %18058 = vst [vmem:[#allocation39_spill] sm:$0xff] %v17020_v6  ;;  %18059 = vst [vmem:[#allocation41_spill] sm:$0xff] %v17024_v21 }
 0x87d   : > { %18061 = vst [vmem:[#allocation25_spill] sm:$0xff] %v17036_v30 }
 0x87e   : > { %8551 = vmax.xlane.f32.xlu1 %v8550_v55  ;;  %8548 = vmax.xlane.f32.xlu0 %v8547_v37  ;;  %v8532_v55 = vsel %vm4299_vm2, %v17020_v6, -inf  ;;  %v8529_v37 = vsel %vm4299_vm2, %v17024_v21, -inf }
 0x882   : > { %8509 = vmax.xlane.f32.xlu1 %v8508_v63  ;;  %8506 = vmax.xlane.f32.xlu0 %v8505_v39  ;;  %v17032_v63 = vmul.f32 %v16832_v54, %v16800_v0  ;;  %v8577_v39 = vsel %vm4299_vm2, %v17036_v30, -inf  ;;  %v8370_v0 = vsel %vm4299_vm2, %v16888_v11, 0.0  ;;  %v8418_v54 = vsel %vm4299_vm2, %v16900_v44, 0.0 }
 0x884   : > { %18060 = vst [vmem:[#allocation47_spill] sm:$0xff] %v17032_v63  ;;  %v8580_v46 = vsel %vm4299_vm2, %v17032_v63, -inf }
 0x886   : > { %8557 = vmax.xlane.f32.xlu1 %v8556_v41  ;;  %8554 = vmax.xlane.f32.xlu0 %v8553_v17  ;;  %v8373_v41 = vsel %vm4299_vm2, %v16884_v36, 0.0  ;;  %v8379_v17 = vsel %vm4299_vm2, %v16908_v34, 0.0 }
 0x88a   : > { %8515 = vmax.xlane.f32.xlu1 %v8514_v57  ;;  %8512 = vmax.xlane.f32.xlu0 %v8511_v14  ;;  %v8376_v57 = vsel %vm4299_vm2, %v16912_v28, 0.0  ;;  %v8427_v14 = vsel %vm4299_vm2, %v16920_v27, 0.0 }
 0x88e   : > { %8563 = vmax.xlane.f32.xlu1 %v8562_v5  ;;  %8560 = vmax.xlane.f32.xlu0 %v8559_v35  ;;  %v8424_v5 = vsel %vm4299_vm2, %v16924_v2, 0.0  ;;  %v8385_v35 = vsel %vm4299_vm2, %v16932_v26, 0.0 }
 0x892   : > { %8521 = vmax.xlane.f32.xlu1 %v8520_v60  ;;  %8518 = vmax.xlane.f32.xlu0 %v8517_v10  ;;  %v8382_v60 = vsel %vm4299_vm2, %v16936_v38, 0.0  ;;  %v8433_v10 = vsel %vm4299_vm2, %v16944_v42, 0.0 }
 0x896   : > { %8569 = vmax.xlane.f32.xlu1 %v8568_v23  ;;  %8566 = vmax.xlane.f32.xlu0 %v8565_v24  ;;  %v8430_v23 = vsel %vm4299_vm2, %v16948_v51, 0.0  ;;  %v8391_v24 = vsel %vm4299_vm2, %v16956_v4, 0.0 }
 0x89a   : > { %8527 = vmax.xlane.f32.xlu1 %v8526_v33  ;;  %8524 = vmax.xlane.f32.xlu0 %v8523_v58  ;;  %v8388_v33 = vsel %vm4299_vm2, %v16960_v40, 0.0  ;;  %v8439_v58 = vsel %vm4299_vm2, %v16968_v12, 0.0 }
 0x89e   : > { %8575 = vmax.xlane.f32.xlu1 %v8574_v15  ;;  %8572 = vmax.xlane.f32.xlu0 %v8571_v56  ;;  %v8436_v15 = vsel %vm4299_vm2, %v16972_v52, 0.0  ;;  %v8397_v56 = vsel %vm4299_vm2, %v16980_v48, 0.0 }
 0x8a2   : > { %8362 = vadd.xlane.f32.xlu1 %v8361_v62  ;;  %8359 = vadd.xlane.f32.xlu0 %v8358_v18  ;;  %v8394_v62 = vsel %vm4299_vm2, %v16984_v25, 0.0  ;;  %v8445_v18 = vsel %vm4299_vm2, %v16992_v32, 0.0 }
 0x8a6   : > { %8368 = vadd.xlane.f32.xlu1 %v8367_v29  ;;  %8365 = vadd.xlane.f32.xlu0 %v8364_v1  ;;  %v8442_v29 = vsel %vm4299_vm2, %v16996_v49, 0.0  ;;  %v8403_v1 = vsel %vm4299_vm2, %v17020_v6, 0.0 }
 0x8aa   : > { %8410 = vadd.xlane.f32.xlu1 %v8409_v22  ;;  %8407 = vadd.xlane.f32.xlu0 %v8406_v7  ;;  %v8400_v22 = vsel %vm4299_vm2, %v17024_v21, 0.0  ;;  %v8451_v7 = vsel %vm4299_vm2, %v17032_v63, 0.0 }
 0x8ae   : > { %8416 = vadd.xlane.f32.xlu1 %v8415_v8  ;;  %8413 = vadd.xlane.f32.xlu0 %v8412_v19  ;;  %v8448_v8 = vsel %vm4299_vm2, %v17036_v30, 0.0  ;;  %v8618_v19 = vand.u32 127, %v8322_v13 }
 0x8b2   : > { %8533 = vmax.xlane.f32.xlu1 %v8532_v55  ;;  %8530 = vmax.xlane.f32.xlu0 %v8529_v37  ;;  %v8623_v55 = vadd.s32 4294967288, %v8618_v19 }
 0x8b6   : > { %8581 = vmax.xlane.f32.xlu1 %v8580_v46  ;;  %8578 = vmax.xlane.f32.xlu0 %v8577_v39  ;;  %v17092_v39 = vsub.s32 %v8618_v19, %v16826_v43 }
 0x8ba   : > { %8374 = vadd.xlane.f32.xlu1 %v8373_v41  ;;  %8371 = vadd.xlane.f32.xlu0 %v8370_v0  ;;  %v17095_v41 = vsub.s32 %v8623_v55, %v16826_v43  ;;  %v8583_v0 = vld [vmem:[%s18062_s19] sm:$0xff] }
 0x8bb   : > { %13104 = vmatprep.mubr.msk.f32.mxu0 %vm640_vm0, %v8583_v0  ;;  %13097 = vmatprep.mubr.msk.f32.mxu1 %vm640_vm0, %v8583_v0 }
 0x8be   : > { %8422 = vadd.xlane.f32.xlu1 %v8421_v61  ;;  %8419 = vadd.xlane.f32.xlu0 %v8418_v54 }
 0x8c2   : > { %8380 = vadd.xlane.f32.xlu1 %v8379_v17  ;;  %8377 = vadd.xlane.f32.xlu0 %v8376_v57 }
 0x8c6   : > { %8428 = vadd.xlane.f32.xlu1 %v8427_v14  ;;  %8425 = vadd.xlane.f32.xlu0 %v8424_v5 }
 0x8ca   : > { %8386 = vadd.xlane.f32.xlu1 %v8385_v35  ;;  %8383 = vadd.xlane.f32.xlu0 %v8382_v60 }
 0x8ce   : > { %8434 = vadd.xlane.f32.xlu1 %v8433_v10  ;;  %8431 = vadd.xlane.f32.xlu0 %v8430_v23 }
 0x8d2   : > { %8392 = vadd.xlane.f32.xlu1 %v8391_v24  ;;  %8389 = vadd.xlane.f32.xlu0 %v8388_v33 }
 0x8d6   : > { %8440 = vadd.xlane.f32.xlu1 %v8439_v58  ;;  %8437 = vadd.xlane.f32.xlu0 %v8436_v15 }
 0x8da   : > { %8398 = vadd.xlane.f32.xlu1 %v8397_v56  ;;  %8395 = vadd.xlane.f32.xlu0 %v8394_v62 }
 0x8de   : > { %8446 = vadd.xlane.f32.xlu1 %v8445_v18  ;;  %8443 = vadd.xlane.f32.xlu0 %v8442_v29 }
 0x8e2   : > { %8404 = vadd.xlane.f32.xlu1 %v8403_v1  ;;  %8401 = vadd.xlane.f32.xlu0 %v8400_v22 }
 0x8e6   : > { %8452 = vadd.xlane.f32.xlu1 %v8451_v7  ;;  %8449 = vadd.xlane.f32.xlu0 %v8448_v8 }
 0x8f7   : > { %v8495_v37 = vpop.xlane.xlu1 %8494  ;;  %v8489_v46 = vpop.xlane.xlu0 %8488 }
 0x8f8   : > { %v8913_v13 = vrot.slane %v8495_v37, %v17092_v39  ;;  %v8904_v17 = vrot.slane %v8489_v46, %v17092_v39 }
 0x8fb   : > { %v8498_v61 = vpop.xlane.xlu1 %8497  ;;  %v8492_v54 = vpop.xlane.xlu0 %8491 }
 0x8fc   : > { %v8917_v57 = vrot.slane %v8498_v61, %v17095_v41  ;;  %v8908_v14 = vrot.slane %v8492_v54, %v17095_v41 }
 0x8fe   : > { %v8918_v5 = vsel %vm8628_vm11, %v8917_v57, %v8913_v13  ;;  %v8909_v35 = vsel %vm8628_vm11, %v8908_v14, %v8904_v17 }
 0x8ff   : > { %v17109_v60 = vsel %vm8765_vm12, %v8918_v5, %v8909_v35  ;;  %v8540_v10 = vpop.xlane.xlu1 %8539  ;;  %v8537_v23 = vpop.xlane.xlu0 %8536 }
 0x900   : > { %v8980_v6 = vrot.slane %v8540_v10, %v17095_v41  ;;  %v8976_v30 = vrot.slane %v8537_v23, %v17092_v39 }
 0x903   : > { %v8546_v24 = vpop.xlane.xlu1 %8545  ;;  %v8543_v33 = vpop.xlane.xlu0 %8542 }
 0x904   : > { %v8989_v48 = vrot.slane %v8546_v24, %v17095_v41  ;;  %v8985_v21 = vrot.slane %v8543_v33, %v17092_v39  ;;  %v8981_v24 = vsel %vm8628_vm11, %v8980_v6, %v8976_v30 }
 0x906   : > { %v8990_v33 = vsel %vm8628_vm11, %v8989_v48, %v8985_v21 }
 0x907   : > { %v8504_v58 = vpop.xlane.xlu1 %8503  ;;  %v8501_v15 = vpop.xlane.xlu0 %8500 }
 0x908   : > { %v8926_v4 = vrot.slane %v8504_v58, %v17095_v41  ;;  %v8922_v25 = vrot.slane %v8501_v15, %v17092_v39 }
 0x90a   : > { %v8927_v58 = vsel %vm8628_vm11, %v8926_v4, %v8922_v25 }
 0x90b   : > { %v8552_v56 = vpop.xlane.xlu1 %8551  ;;  %v8549_v62 = vpop.xlane.xlu0 %8548 }
 0x90c   : > { %v8998_v34 = vrot.slane %v8552_v56, %v17095_v41  ;;  %v8994_v38 = vrot.slane %v8549_v62, %v17092_v39 }
 0x90e   : > { %v8999_v28 = vsel %vm8628_vm11, %v8998_v34, %v8994_v38 }
 0x90f   : > { %v8510_v18 = vpop.xlane.xlu1 %8509  ;;  %v8507_v29 = vpop.xlane.xlu0 %8506 }
 0x910   : > { %v8935_v10 = vrot.slane %v8510_v18, %v17095_v41  ;;  %v8931_v23 = vrot.slane %v8507_v29, %v17092_v39 }
 0x912   : > { %v8936_v6 = vsel %vm8628_vm11, %v8935_v10, %v8931_v23 }
 0x913   : > { %v8558_v1 = vpop.xlane.xlu1 %8557  ;;  %v8555_v22 = vpop.xlane.xlu0 %8554 }
 0x914   : > { %v9007_v62 = vrot.slane %v8558_v1, %v17095_v41  ;;  %v9003_v18 = vrot.slane %v8555_v22, %v17092_v39 }
 0x917   : > { %v8516_v7 = vpop.xlane.xlu1 %8515  ;;  %v8513_v8 = vpop.xlane.xlu0 %8512 }
 0x918   : > { %v8944_v29 = vrot.slane %v8516_v7, %v17095_v41  ;;  %v8940_v36 = vrot.slane %v8513_v8, %v17092_v39 }
 0x91b   : > { %v8564_v19 = vpop.xlane.xlu1 %8563  ;;  %v8561_v55 = vpop.xlane.xlu0 %8560 }
 0x91c   : > { %v9016_v48 = vrot.slane %v8564_v19, %v17095_v41  ;;  %v9012_v4 = vrot.slane %v8561_v55, %v17092_v39  ;;  %v9008_v55 = vsel %vm8628_vm11, %v9007_v62, %v9003_v18 }
 0x91f   : > { %v17111_v37 = vpop.xlane.xlu1 %8521  ;;  %v17113_v46 = vpop.xlane.xlu0 %8518 }
 0x920   : > { %v8953_v25 = vrot.slane %v17111_v37, %v17095_v41  ;;  %v8949_v21 = vrot.slane %v17113_v46, %v17092_v39  ;;  %v8945_v37 = vsel %vm8628_vm11, %v8944_v29, %v8940_v36 }
 0x922   : > { %v8954_v10 = vsel %vm8628_vm11, %v8953_v25, %v8949_v21 }
 0x923   : > { %v17115_v0 = vpop.xlane.xlu1 %8569  ;;  %v8567_v61 = vpop.xlane.xlu0 %8566 }
 0x924   : > { %v9025_v30 = vrot.slane %v17115_v0, %v17095_v41  ;;  %v9021_v1 = vrot.slane %v8567_v61, %v17092_v39  ;;  %v9052_v61 = vsel %vm8765_vm12, %v8990_v33, %v8981_v24 }
 0x926   : > { %v9026_v36 = vsel %vm8628_vm11, %v9025_v30, %v9021_v1 }
 0x927   : > { %v17117_v54 = vpop.xlane.xlu1 %8527  ;;  %v17119_v13 = vpop.xlane.xlu0 %8524 }
 0x928   : > { %v8962_v34 = vrot.slane %v17117_v54, %v17095_v41  ;;  %v8958_v38 = vrot.slane %v17119_v13, %v17092_v39  ;;  %v9046_v54 = vsel %vm8767_vm13, %v8927_v58, %v17109_v60  ;;  %v9017_v13 = vsel %vm8628_vm11, %v9016_v48, %v9012_v4 }
 0x92a   : > { %v8963_v24 = vsel %vm8628_vm11, %v8962_v34, %v8958_v38 }
 0x92b   : > { %v17121_v17 = vpop.xlane.xlu1 %8575  ;;  %v8573_v57 = vpop.xlane.xlu0 %8572 }
 0x92c   : > { %v9034_v22 = vrot.slane %v17121_v17, %v17095_v41  ;;  %v9030_v7 = vrot.slane %v8573_v57, %v17092_v39  ;;  %v9053_v17 = vsel %vm8767_vm13, %v8999_v28, %v9052_v61  ;;  %v9047_v57 = vsel %vm8769_vm14, %v8936_v6, %v9046_v54 }
 0x92d   : > { %v9054_v23 = vsel %vm8769_vm14, %v9008_v55, %v9053_v17  ;;  %v9048_v62 = vsel %vm8771_vm15, %v8945_v37, %v9047_v57  ;;  %v17208_v55 = vld [vmem:[%s18062_s19 + $0x8] sm:$0xff]  ;;  %v17213_v37 = vld [vmem:[%s18062_s19 + $0x10] sm:$0xff] }
 0x92e   : > { %v9035_v33 = vsel %vm8628_vm11, %v9034_v22, %v9030_v7  ;;  %v9055_v18 = vsel %vm8771_vm15, %v9017_v13, %v9054_v23  ;;  %v9049_v48 = vsel %vm8773_vm1, %v8954_v10, %v9048_v62 }
 0x92f   : > { %v17123_v14 = vpop.xlane.xlu1 %8362  ;;  %v17125_v5 = vpop.xlane.xlu0 %8359  ;;  %v9056_v4 = vsel %vm8773_vm1, %v9026_v36, %v9055_v18  ;;  %v9050_v25 = vsel %vm8775_vm3, %v8963_v24, %v9049_v48 }
 0x930   : > { %v9057_v21 = vsel %vm8775_vm3, %v9035_v33, %v9056_v4  ;;  %v8456_v62 = vmul.f32 0.03125, %v17123_v14  ;;  %v8455_v24 = vmul.f32 0.03125, %v17125_v5 }
 0x932   : > { %v8627_v14 = vrot.slane %v8456_v62, %v17095_v41  ;;  %v8622_v5 = vrot.slane %v8455_v24, %v17092_v39 }
 0x933   : > { %v17127_v35 = vpop.xlane.xlu1 %8368  ;;  %v17129_v63 = vpop.xlane.xlu0 %8365 }
 0x934   : > { %v8458_v57 = vmul.f32 0.03125, %v17127_v35  ;;  %v8457_v10 = vmul.f32 0.03125, %v17129_v63 }
 0x937   : > { %v17137_v26 = vpop.xlane.xlu1 %8410  ;;  %v17139_v40 = vpop.xlane.xlu0 %8407 }
 0x938   : > { %v8472_v35 = vmul.f32 0.03125, %v17137_v26  ;;  %v8471_v63 = vmul.f32 0.03125, %v17139_v40 }
 0x93a   : > { %v8700_v26 = vrot.slane %v8472_v35, %v17095_v41  ;;  %v8696_v40 = vrot.slane %v8471_v63, %v17092_v39 }
 0x93b   : > { %v17148_v15 = vpop.xlane.xlu1 %8416  ;;  %v17150_v56 = vpop.xlane.xlu0 %8413 }
 0x93c   : > { %v8474_v33 = vmul.f32 0.03125, %v17148_v15 }
 0x93e   : > { %v8709_v15 = vrot.slane %v8474_v33, %v17095_v41 }
 0x93f   : > { %v8534_v8 = vpop.xlane.xlu1 %8533  ;;  %v8531_v19 = vpop.xlane.xlu0 %8530 }
 0x940   : > { %v8971_v46 = vrot.slane %v8534_v8, %v17095_v41  ;;  %v8967_v0 = vrot.slane %v8531_v19, %v17092_v39 }
 0x942   : > { %v8972_v28 = vsel %vm8628_vm11, %v8971_v46, %v8967_v0 }
 0x943   : > { %v8582_v60 = vpop.xlane.xlu1 %8581  ;;  %v8579_v58 = vpop.xlane.xlu0 %8578  ;;  %v9051_v1 = vsel %vm8777_vm4, %v8972_v28, %v9050_v25  ;;  %v8637_v28 = vrot.slane %v8458_v57, %v17095_v41 }
 0x944   : > { %v9043_v29 = vrot.slane %v8582_v60, %v17095_v41  ;;  %v9039_v6 = vrot.slane %v8579_v58, %v17092_v39  ;;  %v8473_v60 = vmul.f32 0.03125, %v17150_v56 }
 0x946   : > { %v9044_v30 = vsel %vm8628_vm11, %v9043_v29, %v9039_v6  ;;  %v8633_v29 = vrot.slane %v8457_v10, %v17092_v39  ;;  %v8705_v56 = vrot.slane %v8473_v60, %v17092_v39  ;;  %v8629_v10 = vsel %vm8628_vm11, %v8627_v14, %v8622_v5 }
 0x947   : > { %v9058_v34 = vsel %vm8777_vm4, %v9044_v30, %v9057_v21  ;;  %v8375_v38 = vpop.xlane.xlu1 %8374  ;;  %v8372_v22 = vpop.xlane.xlu0 %8371  ;;  %v8701_v60 = vsel %vm8628_vm11, %v8700_v26, %v8696_v40 }
 0x948   : > { %v17201_v7 = vpack.c.bf16 %v9058_v34, %v9051_v1  ;;  %v8460_v58 = vmul.f32 0.03125, %v8375_v38  ;;  %v8459_v18 = vmul.f32 0.03125, %v8372_v22  ;;  %v8638_v21 = vsel %vm8628_vm11, %v8637_v28, %v8633_v29 }
 0x949   : > { %v8710_v62 = vsel %vm8628_vm11, %v8709_v15, %v8705_v56  ;;  %v8766_v33 = vsel %vm8765_vm12, %v8638_v21, %v8629_v10 }
 0x94a   : > { %13354 = vmatprep.subr.bf16.mxu0 %v17201_v7  ;;  %v8646_v4 = vrot.slane %v8460_v58, %v17095_v41  ;;  %v8642_v25 = vrot.slane %v8459_v18, %v17092_v39 }
 0x94b   : > { %v8423_v8 = vpop.xlane.xlu1 %8422  ;;  %13356 = vmatpush3.bf16.msra.mxu0 %v17201_v7  ;;  %v8420_v19 = vpop.xlane.xlu0 %8419 }
 0x94c   : > { %v8476_v34 = vmul.f32 0.03125, %v8423_v8  ;;  %v8475_v38 = vmul.f32 0.03125, %v8420_v19  ;;  %v8647_v24 = vsel %vm8628_vm11, %v8646_v4, %v8642_v25 }
 0x94e   : > { %13105 = vmatmul.mubr.msk.f32.vlgmr.msra.gmra.mrb[36].mxu0 %vm640_vm0, %v17208_v55  ;;  %v8718_v28 = vrot.slane %v8476_v34, %v17095_v41  ;;  %v8714_v29 = vrot.slane %v8475_v38, %v17092_v39 }
 0x94f   : > { %v8381_v46 = vpop.xlane.xlu1 %8380  ;;  %v8378_v0 = vpop.xlane.xlu0 %8377  ;;  %13125 = vmatprep.mubr.msk.f32.mxu0 %vm640_vm0, %v17213_v37 }
 0x950   : > { %v8462_v22 = vmul.f32 0.03125, %v8381_v46  ;;  %v8461_v57 = vmul.f32 0.03125, %v8378_v0  ;;  %v8779_v46 = vsel %vm8765_vm12, %v8710_v62, %v8701_v60  ;;  %v8768_v0 = vsel %vm8767_vm13, %v8647_v24, %v8766_v33 }
 0x951   : > { %v8719_v40 = vsel %vm8628_vm11, %v8718_v28, %v8714_v29 }
 0x952   : > { %v8655_v8 = vrot.slane %v8462_v22, %v17095_v41  ;;  %v8651_v19 = vrot.slane %v8461_v57, %v17092_v39 }
 0x953   : > { %v8429_v61 = vpop.xlane.xlu1 %8428  ;;  %v8426_v54 = vpop.xlane.xlu0 %8425 }
 0x954   : > { %v8478_v35 = vmul.f32 0.03125, %v8429_v61  ;;  %v8477_v63 = vmul.f32 0.03125, %v8426_v54  ;;  %v8656_v34 = vsel %vm8628_vm11, %v8655_v8, %v8651_v19 }
 0x956   : > { %v8727_v61 = vrot.slane %v8478_v35, %v17095_v41  ;;  %v8723_v54 = vrot.slane %v8477_v63, %v17092_v39 }
 0x957   : > { %v8387_v13 = vpop.xlane.xlu1 %8386  ;;  %v8384_v17 = vpop.xlane.xlu0 %8383 }
 0x958   : > { %v8464_v14 = vmul.f32 0.03125, %v8387_v13  ;;  %v8463_v5 = vmul.f32 0.03125, %v8384_v17  ;;  %v8728_v35 = vsel %vm8628_vm11, %v8727_v61, %v8723_v54 }
 0x95a   : > { %v8664_v13 = vrot.slane %v8464_v14, %v17095_v41  ;;  %v8660_v17 = vrot.slane %v8463_v5, %v17092_v39 }
 0x95b   : > { %v8435_v36 = vpop.xlane.xlu1 %8434  ;;  %v8432_v23 = vpop.xlane.xlu0 %8431 }
 0x95c   : > { %v8480_v15 = vmul.f32 0.03125, %v8435_v36  ;;  %v8479_v56 = vmul.f32 0.03125, %v8432_v23  ;;  %v8665_v63 = vsel %vm8628_vm11, %v8664_v13, %v8660_v17  ;;  %v9139_v17 = vld [vmem:[#allocation10 + $0x10] sm:$0xff] }
 0x95e   : > { %v8736_v36 = vrot.slane %v8480_v15, %v17095_v41  ;;  %v8732_v23 = vrot.slane %v8479_v56, %v17092_v39  ;;  %v8780_v15 = vsel %vm8767_vm13, %v8719_v40, %v8779_v46  ;;  %v8770_v56 = vsel %vm8769_vm14, %v8656_v34, %v8768_v0 }
 0x95f   : > { %v8393_v6 = vpop.xlane.xlu1 %8392  ;;  %v8390_v48 = vpop.xlane.xlu0 %8389 }
 0x960   : > { %v8466_v4 = vmul.f32 0.03125, %v8393_v6  ;;  %v8465_v25 = vmul.f32 0.03125, %v8390_v48 }
 0x962   : > { %v8673_v6 = vrot.slane %v8466_v4, %v17095_v41  ;;  %v8669_v48 = vrot.slane %v8465_v25, %v17092_v39  ;;  %v8737_v4 = vsel %vm8628_vm11, %v8736_v36, %v8732_v23  ;;  %v9140_v36 = vld [vmem:[#allocation10 + $0x18] sm:$0xff] }
 0x963   : > { %v8441_v30 = vpop.xlane.xlu1 %8440  ;;  %v8438_v1 = vpop.xlane.xlu0 %8437 }
 0x964   : > { %v8482_v38 = vmul.f32 0.03125, %v8441_v30  ;;  %v8481_v22 = vmul.f32 0.03125, %v8438_v1 }
 0x966   : > { %v8745_v33 = vrot.slane %v8482_v38, %v17095_v41  ;;  %v8741_v60 = vrot.slane %v8481_v22, %v17092_v39 }
 0x967   : > { %v8399_v58 = vpop.xlane.xlu1 %8398  ;;  %v8396_v18 = vpop.xlane.xlu0 %8395 }
 0x968   : > { %v8468_v57 = vmul.f32 0.03125, %v8399_v58  ;;  %v8467_v10 = vmul.f32 0.03125, %v8396_v18  ;;  %v8746_v38 = vsel %vm8628_vm11, %v8745_v33, %v8741_v60  ;;  %v11313_v60 = vld [vmem:[%s18062_s19 + $0x20] sm:$0xff] }
 0x96a   : > { %v8682_v28 = vrot.slane %v8468_v57, %v17095_v41  ;;  %v8678_v29 = vrot.slane %v8467_v10, %v17092_v39  ;;  %v8781_v10 = vsel %vm8769_vm14, %v8728_v35, %v8780_v15  ;;  %v14025_v35 = vld [vmem:[%s14543_s7 + $0x10] sm:$0xff] }
 0x96b   : > { %v8447_v21 = vpop.xlane.xlu1 %8446  ;;  %v8444_v26 = vpop.xlane.xlu0 %8443  ;;  %v8782_v0 = vsel %vm8771_vm15, %v8737_v4, %v8781_v10  ;;  %v14029_v15 = vld [vmem:[%s14543_s7 + $0x30] sm:$0xff]  ;;  %v14031_v4 = vld [vmem:[%s14543_s7 + $0x40] sm:$0xff]  ;;  %v14038_v10 = vld [vmem:[%s14543_s7 + $0x78] sm:$0xff] }
 0x96c   : > { %v8484_v62 = vmul.f32 0.03125, %v8447_v21  ;;  %v8483_v24 = vmul.f32 0.03125, %v8444_v26  ;;  %v8674_v26 = vsel %vm8628_vm11, %v8673_v6, %v8669_v48  ;;  %v8783_v13 = vsel %vm8773_vm1, %v8746_v38, %v8782_v0  ;;  %v14035_v38 = vld [vmem:[%s14543_s7 + $0x60] sm:$0xff]  ;;  %v9463_v0 = vld [vmem:[#allocation10 + $0x20] sm:$0xff] }
 0x96e   : > { %v8754_v8 = vrot.slane %v8484_v62, %v17095_v41  ;;  %v8750_v19 = vrot.slane %v8483_v24, %v17092_v39  ;;  %v8772_v62 = vsel %vm8771_vm15, %v8665_v63, %v8770_v56  ;;  %v8683_v24 = vsel %vm8628_vm11, %v8682_v28, %v8678_v29  ;;  %v10184_v29 = vld [vmem:[%s18064_s20 + $0x8] sm:$0xff]  ;;  %v14026_v63 = vld [vmem:[%s14543_s7 + $0x18] sm:$0xff] }
 0x96f   : > { %v8405_v30 = vpop.xlane.xlu1 %8404  ;;  %v8402_v1 = vpop.xlane.xlu0 %8401  ;;  %v8774_v54 = vsel %vm8773_vm1, %v8674_v26, %v8772_v62  ;;  %v14030_v56 = vld [vmem:[%s14543_s7 + $0x38] sm:$0xff]  ;;  %v14039_v62 = vld [vmem:[%s14543_s7 + $0x80] sm:$0xff] }
 0x970   : > { %v8470_v58 = vmul.f32 0.03125, %v8405_v30  ;;  %v8469_v18 = vmul.f32 0.03125, %v8402_v1  ;;  %v8755_v46 = vsel %vm8628_vm11, %v8754_v8, %v8750_v19  ;;  %v8776_v23 = vsel %vm8775_vm3, %v8683_v24, %v8774_v54  ;;  %v14024_v19 = vld [vmem:[%s14543_s7 + $0x8] sm:$0xff]  ;;  %v14034_v26 = vld [vmem:[%s14543_s7 + $0x58] sm:$0xff] }
 0x971   : > { %v8784_v6 = vsel %vm8775_vm3, %v8755_v46, %v8783_v13  ;;  %v14040_v24 = vld [vmem:[%s14543_s7 + $0x88] sm:$0xff]  ;;  %v14041_v46 = vld [vmem:[%s14543_s7 + $0x90] sm:$0xff] }
 0x972   : > { %v8691_v14 = vrot.slane %v8470_v58, %v17095_v41  ;;  %v8687_v5 = vrot.slane %v8469_v18, %v17092_v39  ;;  %v9136_v58 = vld [vmem:[#allocation10] sm:$0xff]  ;;  %v9137_v18 = vld [vmem:[#allocation10 + $0x8] sm:$0xff] }
 0x973   : > { %v8453_v25 = vpop.xlane.xlu1 %8452  ;;  %v8450_v21 = vpop.xlane.xlu0 %8449  ;;  %v13361_v28 = vpack.c.bf16 %v9137_v18, %v9136_v58  ;;  %v9550_v58 = vld [vmem:[#allocation10 + $0x38] sm:$0xff] }
 0x974   : > { %v8486_v22 = vmul.f32 0.03125, %v8453_v25  ;;  %v8485_v57 = vmul.f32 0.03125, %v8450_v21  ;;  %v8692_v40 = vsel %vm8628_vm11, %v8691_v14, %v8687_v5  ;;  %v14027_v14 = vld [vmem:[%s14543_s7 + $0x20] sm:$0xff]  ;;  %v14028_v5 = vld [vmem:[%s14543_s7 + $0x28] sm:$0xff]  ;;  %v14033_v21 = vld [vmem:[%s14543_s7 + $0x50] sm:$0xff] }
 0x975   : > { %v8778_v30 = vsel %vm8777_vm4, %v8692_v40, %v8776_v23  ;;  %v14032_v25 = vld [vmem:[%s14543_s7 + $0x48] sm:$0xff]  ;;  %v9464_v40 = vld [vmem:[#allocation10 + $0x28] sm:$0xff]  ;;  %v14045_v23 = vld [vmem:[%s14543_s7 + $0xb0] sm:$0xff] }
 0x976   : > { %v8763_v34 = vrot.slane %v8486_v22, %v17095_v41  ;;  %v8759_v61 = vrot.slane %v8485_v57, %v17092_v39  ;;  %v13357_v41 = vpack.c.bf16 %v9140_v36, %v9139_v17  ;;  %v11304_v39 = vld [vmem:[%s18062_s19 + $0x18] sm:$0xff]  ;;  %v14036_v22 = vld [vmem:[%s14543_s7 + $0x68] sm:$0xff]  ;;  %v14037_v57 = vld [vmem:[%s14543_s7 + $0x70] sm:$0xff]  ;;  %v13373_v13 = vpack.c.bf16 %v9464_v40, %v9463_v0 }
 0x977   : > { %v14043_v17 = vld [vmem:[%s14543_s7 + $0xa0] sm:$0xff]  ;;  %v14044_v36 = vld [vmem:[%s14543_s7 + $0xa8] sm:$0xff] }
 0x978   : > { %v8764_v48 = vsel %vm8628_vm11, %v8763_v34, %v8759_v61  ;;  %v14042_v61 = vld [vmem:[%s14543_s7 + $0x98] sm:$0xff] }
 0x979   : > { %v8785_v1 = vsel %vm8777_vm4, %v8764_v48, %v8784_v6  ;;  %v14046_v6 = vld [vmem:[%s14543_s7 + $0xb8] sm:$0xff]  ;;  %v14047_v48 = vld [vmem:[%s14543_s7 + $0xc0] sm:$0xff] }
 0x97a   : > { %v13349_v33 = vpack.c.bf16 %v8785_v1, %v8778_v30  ;;  %v14048_v30 = vld [vmem:[%s14543_s7 + $0xc8] sm:$0xff]  ;;  %v14049_v1 = vld [vmem:[%s14543_s7 + $0xd0] sm:$0xff] }
 0x97c   : > { %13350 = vmatprep.subr.bf16.mxu1 %v13349_v33  ;;  %13366 = vmatprep.subr.bf16.mxu0 %v13349_v33 }
 0x97d   : > { %13352 = vmatpush3.bf16.msra.mxu1 %v13349_v33  ;;  %13368 = vmatpush3.bf16.msra.mxu0 %v13349_v33 }
 0x97e   : > { %13370 = vmatprep.subr.bf16.mxu0 %v17201_v7  ;;  %13358 = vmatprep.subr.bf16.mxu1 %v13357_v41 }
 0x980   : > { %13098 = vmatmul.mubr.msk.f32.vlgmr.msra.gmra.mrb[50].mxu1 %vm640_vm0, %v17208_v55  ;;  %13126 = vmatmul.mubr.msk.f32.vlgmr.msra.gmra.mrb[38].mxu0 %vm640_vm0, %v11304_v39  ;;  %v11314_v55 = vld [vmem:[%s18062_s19 + $0x28] sm:$0xff] }
 0x981   : > { %13372 = vmatpush3.bf16.msra.mxu0 %v17201_v7  ;;  %13132 = vmatprep.mubr.msk.f32.mxu0 %vm640_vm0, %v17213_v37  ;;  %v14023_v37 = vld [vmem:[%s14543_s7] sm:$0xff] }
 0x982   : > { %13382 = vmatprep.subr.bf16.mxu0 %v13349_v33  ;;  %13360 = vmatpush3.bf16.msra.mxu1 %v13357_v41  ;;  %v14051_v41 = vld [vmem:[%s14543_s7 + $0xe0] sm:$0xff] }
 0x983   : > { %13362 = vmatprep.subr.bf16.mxu1 %v13361_v28 }
 0x984   : > { %13133 = vmatmul.mubr.msk.f32.vlgmr.msra.gmra.mrb[40].mxu0 %vm640_vm0, %v11304_v39  ;;  %v14052_v39 = vld [vmem:[%s14543_s7 + $0xe8] sm:$0xff] }
 0x985   : > { %13384 = vmatpush3.bf16.msra.mxu0 %v13349_v33  ;;  %13153 = vmatprep.mubr.msk.f32.mxu0 %vm640_vm0, %v11313_v60  ;;  %v14050_v33 = vld [vmem:[%s14543_s7 + $0xd8] sm:$0xff] }
 0x986   : > { %13386 = vmatprep.subr.bf16.mxu0 %v17201_v7 }
 0x988   : > { %13154 = vmatmul.mubr.msk.f32.vlgmr.msra.gmra.mrb[42].mxu0 %vm640_vm0, %v11314_v55 }
 0x989   : > { %13388 = vmatpush3.bf16.msra.mxu0 %v17201_v7  ;;  %13160 = vmatprep.mubr.msk.f32.mxu0 %vm640_vm0, %v11313_v60  ;;  %v10183_v7 = vld [vmem:[%s18063_s29] sm:$0xff]  ;;  %v14053_v60 = vld [vmem:[%s14543_s7 + $0xf0] sm:$0xff]  ;;  %s17648_s29 = scalar_lea.hbm %s18085_s21, %s11362_s25 }
 0x98a   : > { %v13397_v8 = vpack.c.bf16 %v10184_v29, %v10183_v7 }
 0x98c   : > { %13161 = vmatmul.mubr.msk.f32.vlgmr.msra.gmra.mrb[44].mxu0 %vm640_vm0, %v11314_v55  ;;  %13398 = vmatprep.subr.bf16.mxu0 %v13397_v8  ;;  %v14054_v55 = vld [vmem:[%s14543_s7 + $0xf8] sm:$0xff]  ;;  %s14173_s7 = sshll.u32 %s14254_s26, 4  ;;  %s14174_s7 = int_to_ptr.vmem [resolvable:$false] %s14173_s7 }
 0x98d   : > { %13181 = vmatprep.mubr.msk.f32.mxu0 %vm640_vm0, %v14023_v37  ;;  %13400 = vmatpush3.bf16.msra.mxu0 %v13397_v8  ;;  %v9549_v37 = vld [vmem:[#allocation10 + $0x30] sm:$0xff]  ;;  %s14175_s24 = scalar_lea.vmem %s14174_s7, 8192  ;;  %p14176_p12 = scmp.lt.s32.totalorder %s17650_s28, %s14174_s7 }
 0x98e   : > { %v13377_v8 = vpack.c.bf16 %v9550_v58, %v9549_v37  ;;  %p14177_p1 = scmp.lt.s32.totalorder %s14175_s24, %s14169_s14 }
 0x990   : > { %13182 = vmatmul.mubr.msk.f32.vlgmr.msra.gmra.mrb[46].mxu0 %vm640_vm0, %v14024_v19  ;;  %p14178_p2 = por %p14177_p1, %p14176_p12 }
 0x991   : > { %13184 = vmatprep.mubr.msk.f32.mxu0 %vm640_vm0, %v14025_v35 }
 0x992   : > { %p14179_p4 = pnand %p14178_p2, %p14172_p7 }
 0x994   : > { %13185 = vmatmul.mubr.msk.f32.gmra.mrb[48].mxu0 %vm640_vm0, %v14026_v63  ;;  %v9794_v63 = vld [vmem:[#allocation10 + $0x40] sm:$0xff] }
 0x995   : > { %13187 = vmatprep.mubr.msk.f32.mxu0 %vm640_vm0, %v14027_v14  ;;  %v9795_v14 = vld [vmem:[#allocation10 + $0x48] sm:$0xff] }
 0x998   : > { %13188 = vmatmul.mubr.msk.f32.gmra.mrb[50].mxu0 %vm640_vm0, %v14028_v5 }
 0x999   : > { %13190 = vmatprep.mubr.msk.f32.mxu0 %vm640_vm0, %v14029_v15  ;;  %v13389_v15 = vpack.c.bf16 %v9795_v14, %v9794_v63 }
 0x99c   : > { %13191 = vmatmul.mubr.msk.f32.gmra.mrb[52].mxu0 %vm640_vm0, %v14030_v56 }
 0x99d   : > { %13193 = vmatprep.mubr.msk.f32.mxu0 %vm640_vm0, %v14031_v4 }
 0x9a0   : > { %13194 = vmatmul.mubr.msk.f32.gmra.mrb[54].mxu0 %vm640_vm0, %v14032_v25 }
 0x9a1   : > { %13196 = vmatprep.mubr.msk.f32.mxu0 %vm640_vm0, %v14033_v21  ;;  %v9880_v21 = vld [vmem:[#allocation10 + $0x50] sm:$0xff] }
 0x9a4   : > { %13197 = vmatmul.mubr.msk.f32.gmra.mrb[56].mxu0 %vm640_vm0, %v14034_v26  ;;  %v9881_v26 = vld [vmem:[#allocation10 + $0x58] sm:$0xff] }
 0x9a5   : > { %13199 = vmatprep.mubr.msk.f32.mxu0 %vm640_vm0, %v14035_v38  ;;  %v13393_v38 = vpack.c.bf16 %v9881_v26, %v9880_v21  ;;  %v10010_v26 = vsub.s32 3, %v16826_v43 }
 0x9a8   : > { %13200 = vmatmul.mubr.msk.f32.gmra.mrb[58].mxu0 %vm640_vm0, %v14036_v22 }
 0x9a9   : > { %13202 = vmatprep.mubr.msk.f32.mxu0 %vm640_vm0, %v14037_v57 }
 0x9ac   : > { %13203 = vmatmul.mubr.msk.f32.gmra.mrb[60].mxu0 %vm640_vm0, %v14038_v10 }
 0x9ad   : > { %13205 = vmatprep.mubr.msk.f32.mxu0 %vm640_vm0, %v14039_v62 }
 0x9b0   : > { %13206 = vmatmul.mubr.msk.f32.gmra.mrb[62].mxu0 %vm640_vm0, %v14040_v24 }
 0x9b1   : > { %13208 = vmatprep.mubr.msk.f32.mxu0 %vm640_vm0, %v14041_v46 }
 0x9b4   : > { %13209 = vmatmul.mubr.msk.f32.gmra.mrb[64].mxu0 %vm640_vm0, %v14042_v61 }
 0x9b5   : > { %13211 = vmatprep.mubr.msk.f32.mxu0 %vm640_vm0, %v14043_v17 }
 0x9b8   : > { %13212 = vmatmul.mubr.msk.f32.gmra.mrb[66].mxu0 %vm640_vm0, %v14044_v36 }
 0x9b9   : > { %13214 = vmatprep.mubr.msk.f32.mxu0 %vm640_vm0, %v14045_v23 }
 0x9bc   : > { %13215 = vmatmul.mubr.msk.f32.gmra.mrb[68].mxu0 %vm640_vm0, %v14046_v6 }
 0x9bd   : > { %13217 = vmatprep.mubr.msk.f32.mxu0 %vm640_vm0, %v14047_v48 }
 0x9c0   : > { %13218 = vmatmul.mubr.msk.f32.gmra.mrb[70].mxu0 %vm640_vm0, %v14048_v30 }
 0x9c1   : > { %13220 = vmatprep.mubr.msk.f32.mxu0 %vm640_vm0, %v14049_v1 }
 0x9c4   : > { %13221 = vmatmul.mubr.msk.f32.gmra.mrb[72].mxu0 %vm640_vm0, %v14050_v33 }
 0x9c5   : > { %13223 = vmatprep.mubr.msk.f32.mxu0 %vm640_vm0, %v14051_v41 }
 0x9c8   : > { %13224 = vmatmul.mubr.msk.f32.gmra.mrb[74].mxu0 %vm640_vm0, %v14052_v39 }
 0x9c9   : > { %13226 = vmatprep.mubr.msk.f32.mxu0 %vm640_vm0, %v14053_v60 }
 0x9cc   : > { %13227 = vmatmul.mubr.msk.f32.gmra.mrb[76].mxu0 %vm640_vm0, %v14054_v55 }
 0xa21   : > { %v13106_v34 = vpop.f32.mrb[36].mxu0 }
 0xa22   : > { %v9127_v54 = vpop.f32.mrb[37].mxu0 }
 0xa23   : > { %13111 = vmatprep.mubr.msk.f32.mxu1 %vm640_vm0, %v9127_v54 }
 0xa24   : > { %13112 = vmatmul.mubr.msk.f32.vlgmr.msra.gmra.mrb[52].mxu1 %vm640_vm0, %v13106_v34 }
 0xa25   : > { %13364 = vmatpush3.bf16.msra.mxu1 %v13361_v28 }
 0xa26   : > { %13374 = vmatprep.subr.bf16.mxu1 %v13373_v13 }
 0xa53   : > { %v13099_v18 = vpop.f32.mrb[50].mxu1  ;;  %v13127_v28 = vpop.f32.mrb[38].mxu0 }
 0xa54   : > { %v8860_v7 = vpop.f32.mrb[51].mxu1  ;;  %v9378_v29 = vpop.f32.mrb[39].mxu0 }
 0xa55   : > { %13118 = vmatprep.mubr.msk.f32.mxu1 %vm640_vm0, %v8860_v7 }
 0xa56   : > { %13119 = vmatmul.mubr.msk.f32.vlgmr.msra.gmra.mrb[52].mxu1 %vm640_vm0, %v13099_v18 }
 0xa57   : > { %13376 = vmatpush3.bf16.msra.mxu1 %v13373_v13  ;;  %13139 = vmatprep.mubr.msk.f32.mxu1 %vm640_vm0, %v9378_v29  ;;  %v13134_v19 = vpop.f32.mrb[40].mxu0 }
 0xa58   : > { %13378 = vmatprep.subr.bf16.mxu1 %v13377_v8  ;;  %v9453_v35 = vpop.f32.mrb[41].mxu0 }
 0xa5b   : > { %v13155_v5 = vpop.f32.mrb[42].mxu0 }
 0xa5c   : > { %v9709_v56 = vpop.f32.mrb[43].mxu0 }
 0xa5e   : > { %13140 = vmatmul.mubr.msk.f32.vlgmr.msra.gmra.mrb[52].mxu1 %vm640_vm0, %v13127_v28 }
 0xa5f   : > { %13380 = vmatpush3.bf16.msra.mxu1 %v13377_v8  ;;  %13146 = vmatprep.mubr.msk.f32.mxu1 %vm640_vm0, %v9453_v35  ;;  %v13162_v4 = vpop.f32.mrb[44].mxu0  ;;  %v9988_v35 = vsub.s32 1, %v16826_v43 }
 0xa60   : > { %13390 = vmatprep.subr.bf16.mxu1 %v13389_v15  ;;  %v9784_v25 = vpop.f32.mrb[45].mxu0 }
 0xa63   : > { %v17394_v22 = vpop.f32.mrb[46].mxu0 }
 0xa64   : > { %v17396_v57 = vpop.f32.mrb[47].mxu0 }
 0xa66   : > { %13147 = vmatmul.mubr.msk.f32.vlgmr.msra.gmra.mrb[52].mxu1 %vm640_vm0, %v13134_v19 }
 0xa67   : > { %13392 = vmatpush3.bf16.msra.mxu1 %v13389_v15  ;;  %13167 = vmatprep.mubr.msk.f32.mxu1 %vm640_vm0, %v9709_v56  ;;  %v17398_v10 = vpop.f32.mrb[48].mxu0  ;;  %v9999_v15 = vsub.s32 2, %v16826_v43 }
 0xa68   : > { %13394 = vmatprep.subr.bf16.mxu1 %v13393_v38  ;;  %v17400_v62 = vpop.f32.mrb[49].mxu0 }
 0xa6b   : > { %v17402_v24 = vpop.f32.mrb[50].mxu0 }
 0xa6c   : > { %v17404_v46 = vpop.f32.mrb[51].mxu0 }
 0xa6e   : > { %13168 = vmatmul.mubr.msk.f32.vlgmr.msra.gmra.mrb[52].mxu1 %vm640_vm0, %v13155_v5 }
 0xa6f   : > { %13396 = vmatpush3.bf16.msra.mxu1 %v13393_v38  ;;  %13174 = vmatprep.mubr.msk.f32.mxu1 %vm640_vm0, %v9784_v25  ;;  %v17406_v0 = vpop.f32.mrb[52].mxu0 }
 0xa70   : > { %v17408_v40 = vpop.f32.mrb[53].mxu0 }
 0xa73   : > { %v17410_v34 = vpop.f32.mrb[54].mxu0 }
 0xa74   : > { %v17412_v61 = vpop.f32.mrb[55].mxu0 }
 0xa76   : > { %13175 = vmatmul.mubr.msk.f32.vlgmr.msra.gmra.mrb[52].mxu1 %vm640_vm0, %v13162_v4 }
 0xa77   : > { %v17414_v54 = vpop.f32.mrb[56].mxu0 }
 0xa78   : > { %v17416_v13 = vpop.f32.mrb[57].mxu0 }
 0xa7b   : > { %v17418_v17 = vpop.f32.mrb[58].mxu0 }
 0xa7c   : > { %18065 = vst [vmem:[#allocation26_spill] sm:$0xff] %v17418_v17  ;;  %v17420_v36 = vpop.f32.mrb[59].mxu0 }
 0xa7f   : > { %v17422_v23 = vpop.f32.mrb[60].mxu0 }
 0xa80   : > { %18066 = vst [vmem:[#allocation27_spill] sm:$0xff] %v17422_v23  ;;  %v17424_v6 = vpop.f32.mrb[61].mxu0 }
 0xa81   : > { %18067 = vst [vmem:[#allocation28_spill] sm:$0xff] %v17424_v6  ;;  %v17474_v6 = vld [vmem:[%s18068_s18] ss:$0 sm:$0xff] }
 0xa83   : > { %v17426_v48 = vpop.f32.mrb[62].mxu0 }
 0xa84   : > { %v17428_v30 = vpop.f32.mrb[63].mxu0 }
 0xa87   : > { %v17430_v58 = vpop.f32.mrb[64].mxu0 }
 0xa88   : > { %v17432_v28 = vpop.f32.mrb[65].mxu0 }
 0xa8b   : > { %v17434_v7 = vpop.f32.mrb[66].mxu0 }
 0xa8c   : > { %v17436_v29 = vpop.f32.mrb[67].mxu0 }
 0xa8f   : > { %v17443_v63 = vpop.f32.mrb[68].mxu0 }
 0xa90   : > { %v17445_v14 = vpop.f32.mrb[69].mxu0 }
 0xa93   : > { %v17449_v56 = vpop.f32.mrb[70].mxu0 }
 0xa94   : > { %v17451_v4 = vpop.f32.mrb[71].mxu0 }
 0xa97   : > { %v17455_v38 = vpop.f32.mrb[72].mxu0 }
 0xb49   : > { %v13176_v1 = vpop.f32.mrb[52].mxu1 }
 0xb4a   : > { %v9966_v33 = vsub.f32 0.0, %v13176_v1  ;;  %v9954_v41 = vpop.f32.mrb[53].mxu1  ;;  %v17457_v1 = vpop.f32.mrb[73].mxu0 }
 0xb4b   : > { %v9965_v37 = vsub.f32 0.0, %v9954_v41 }
 0xb4c   : > { %v9969_v39 = vmul.f32 1.442695, %v9966_v33 }
 0xb4d   : > { %v9967_v18 = vmul.f32 1.442695, %v9965_v37 }
 0xb4e   : > { %14015 = vpow2.f32 %v9969_v39  ;;  %v10021_v39 = vsub.s32 4, %v16826_v43 }
 0xb58   : > { %v14016_v60 = vpop.eup %14015 }
 0xb59   : > { %v9972_v55 = vadd.f32 1.0, %v14016_v60  ;;  %v17461_v60 = vpop.f32.mrb[74].mxu0 }
 0xb5b   : > { %14017 = vrcp.f32 %v9972_v55  ;;  %v17463_v55 = vpop.f32.mrb[75].mxu0 }
 0xb5c   : > { %14019 = vpow2.f32 %v9967_v18  ;;  %v10032_v18 = vsub.s32 5, %v16826_v43 }
 0xb65   : > { %v17438_v8 = vpop.eup %14017 }
 0xb66   : > { %v10066_v19 = vrot.slane %v17438_v8, %v16829_v47  ;;  %v10077_v5 = vrot.slane %v17438_v8, %v9988_v35  ;;  %v14020_v25 = vpop.eup %14019  ;;  %v10088_v21 = vrot.slane %v17438_v8, %v9999_v15  ;;  %v10099_v41 = vrot.slane %v17438_v8, %v10010_v26 }
 0xb67   : > { %v9971_v33 = vadd.f32 1.0, %v14020_v25  ;;  %v10110_v37 = vrot.slane %v17438_v8, %v10021_v39 }
 0xb68   : > { %10072 = vbcast.lane.b32.xlu1 %v10066_v19, 264  ;;  %10068 = vbcast.lane.b32.xlu0 %v10066_v19, 256  ;;  %v10121_v19 = vrot.slane %v17438_v8, %v10032_v18 }
 0xb69   : > { %14021 = vrcp.f32 %v9971_v33 }
 0xb6c   : > { %10083 = vbcast.lane.b32.xlu1 %v10077_v5, 264  ;;  %10079 = vbcast.lane.b32.xlu0 %v10077_v5, 256  ;;  %v10043_v5 = vsub.s32 6, %v16826_v43 }
 0xb6e   : > { %v10132_v25 = vrot.slane %v17438_v8, %v10043_v5 }
 0xb70   : > { %10094 = vbcast.lane.b32.xlu1 %v10088_v21, 264  ;;  %10090 = vbcast.lane.b32.xlu0 %v10088_v21, 256 }
 0xb73   : > { %v14022_v21 = vpop.eup %14021 }
 0xb74   : > { %10105 = vbcast.lane.b32.xlu1 %v10099_v41, 264  ;;  %10101 = vbcast.lane.b32.xlu0 %v10099_v41, 256  ;;  %v9978_v41 = vrot.slane %v14022_v21, %v16829_v47  ;;  %v9989_v33 = vrot.slane %v14022_v21, %v9988_v35  ;;  %v10000_v23 = vrot.slane %v14022_v21, %v9999_v15 }
 0xb75   : > { %v10022_v17 = vrot.slane %v14022_v21, %v10021_v39  ;;  %v10044_v15 = vrot.slane %v14022_v21, %v10043_v5  ;;  %v10435_v5 = vadd.f32 %v17474_v6, %v17428_v30 }
 0xb78   : > { %10116 = vbcast.lane.b32.xlu1 %v10110_v37, 264  ;;  %10112 = vbcast.lane.b32.xlu0 %v10110_v37, 256  ;;  %v10011_v37 = vrot.slane %v14022_v21, %v10010_v26  ;;  %v10054_v26 = vsub.s32 7, %v16826_v43 }
 0xb7a   : > { %v10143_v39 = vrot.slane %v17438_v8, %v10054_v26  ;;  %v10450_v8 = vadd.f32 %v17430_v58, %v17474_v6  ;;  %v10460_v58 = vadd.f32 %v17434_v7, %v17474_v6  ;;  %v10470_v7 = vadd.f32 %v17443_v63, %v17474_v6 }
 0xb7b   : > { %v10480_v63 = vadd.f32 %v17449_v56, %v17474_v6  ;;  %v10490_v56 = vadd.f32 %v17455_v38, %v17474_v6  ;;  %v10500_v38 = vadd.f32 %v17461_v60, %v17474_v6  ;;  %v10360_v60 = vadd.f32 %v17394_v22, %v17474_v6 }
 0xb7c   : > { %10127 = vbcast.lane.b32.xlu1 %v10121_v19, 264  ;;  %10123 = vbcast.lane.b32.xlu0 %v10121_v19, 256  ;;  %v10033_v19 = vrot.slane %v14022_v21, %v10032_v18  ;;  %v10440_v18 = vadd.f32 %v17426_v48, %v17474_v6  ;;  %v10365_v22 = vadd.f32 %v17474_v6, %v17400_v62 }
 0xb7d   : > { %v10370_v62 = vadd.f32 %v17398_v10, %v17474_v6  ;;  %v10380_v10 = vadd.f32 %v17402_v24, %v17474_v6  ;;  %v10390_v24 = vadd.f32 %v17406_v0, %v17474_v6  ;;  %v10400_v0 = vadd.f32 %v17410_v34, %v17474_v6 }
 0xb7e   : > { %v10410_v34 = vadd.f32 %v17414_v54, %v17474_v6 }
 0xb80   : > { %10138 = vbcast.lane.b32.xlu1 %v10132_v25, 264  ;;  %10134 = vbcast.lane.b32.xlu0 %v10132_v25, 256  ;;  %v13228_v25 = vpop.f32.mrb[76].mxu0 }
 0xb81   : > { %v17477_v47 = vadd.f32 %v13228_v25, %v17474_v6  ;;  %v17479_v35 = vpop.f32.mrb[77].mxu0 }
 0xb84   : > { %9984 = vbcast.lane.b32.xlu1 %v9978_v41, 264  ;;  %9980 = vbcast.lane.b32.xlu0 %v9978_v41, 256 }
 0xb88   : > { %9991 = vbcast.lane.b32.xlu1 %v9989_v33, 256  ;;  %10002 = vbcast.lane.b32.xlu0 %v10000_v23, 256 }
 0xb8c   : > { %9995 = vbcast.lane.b32.xlu1 %v9989_v33, 264  ;;  %10013 = vbcast.lane.b32.xlu0 %v10011_v37, 256 }
 0xb90   : > { %10006 = vbcast.lane.b32.xlu1 %v10000_v23, 264  ;;  %10024 = vbcast.lane.b32.xlu0 %v10022_v17, 256  ;;  %v10055_v23 = vrot.slane %v14022_v21, %v10054_v26 }
 0xb94   : > { %10017 = vbcast.lane.b32.xlu1 %v10011_v37, 264  ;;  %10035 = vbcast.lane.b32.xlu0 %v10033_v19, 256 }
 0xb98   : > { %10028 = vbcast.lane.b32.xlu1 %v10022_v17, 264  ;;  %10046 = vbcast.lane.b32.xlu0 %v10044_v15, 256 }
 0xb9c   : > { %10039 = vbcast.lane.b32.xlu1 %v10033_v19, 264  ;;  %10057 = vbcast.lane.b32.xlu0 %v10055_v23, 256  ;;  %v10445_v19 = vadd.f32 %v17474_v6, %v17432_v28  ;;  %v10455_v28 = vadd.f32 %v17474_v6, %v17436_v29  ;;  %v10465_v29 = vadd.f32 %v17474_v6, %v17445_v14 }
 0xb9d   : > { %v10475_v14 = vadd.f32 %v17474_v6, %v17451_v4  ;;  %v10485_v4 = vadd.f32 %v17474_v6, %v17457_v1  ;;  %v10495_v1 = vadd.f32 %v17474_v6, %v17463_v55  ;;  %v10355_v55 = vadd.f32 %v17474_v6, %v17396_v57 }
 0xb9e   : > { %v10375_v57 = vadd.f32 %v17474_v6, %v17404_v46  ;;  %v10385_v46 = vadd.f32 %v17474_v6, %v17408_v40  ;;  %v10395_v40 = vadd.f32 %v17474_v6, %v17412_v61  ;;  %v10405_v61 = vadd.f32 %v17474_v6, %v17416_v13 }
 0xb9f   : > { %v10415_v13 = vadd.f32 %v17474_v6, %v17420_v36 }
 0xba0   : > { %10050 = vbcast.lane.b32.xlu1 %v10044_v15, 264  ;;  %10145 = vbcast.lane.b32.xlu0 %v10143_v39, 256 }
 0xba4   : > { %10061 = vbcast.lane.b32.xlu1 %v10055_v23, 264 }
 0xba8   : > { %10149 = vbcast.lane.b32.xlu1 %v10143_v39, 264 }
 0xbda   : > { %v10073_v41 = vpop.permute.xlu1 %10072  ;;  %v10069_v43 = vpop.permute.xlu0 %10068 }
 0xbdb   : > { %v10168_v17 = vmul.f32 %v10073_v41, %v16860_v3  ;;  %v10167_v21 = vmul.f32 %v10069_v43, %v16864_v31 }
 0xbdd   : > { %v10530_v33 = vadd.f32 %v10440_v18, %v10168_v17  ;;  %v10529_v37 = vadd.f32 %v10435_v5, %v10167_v21 }
 0xbde   : > { %v10084_v25 = vpop.permute.xlu1 %10083  ;;  %v10080_v15 = vpop.permute.xlu0 %10079 }
 0xbdf   : > { %10562 = vst.msk [vmem:[%s17495_s22 + $0x88] sm:$0xff] %vm4299_vm2, %v10530_v33  ;;  %10561 = vst.msk [vmem:[%s17495_s22 + $0x80] sm:$0xff] %vm4299_vm2, %v10529_v37  ;;  %v10170_v3 = vmul.f32 %v10084_v25, %v16872_v16  ;;  %v10169_v31 = vmul.f32 %v10080_v15, %v16876_v45 }
 0xbe1   : > { %v10532_v48 = vadd.f32 %v10450_v8, %v10170_v3  ;;  %v10531_v30 = vadd.f32 %v10445_v19, %v10169_v31 }
 0xbe2   : > { %v10095_v26 = vpop.permute.xlu1 %10094  ;;  %v10091_v23 = vpop.permute.xlu0 %10090 }
 0xbe3   : > { %10564 = vst.msk [vmem:[%s17495_s22 + $0x98] sm:$0xff] %vm4299_vm2, %v10532_v48  ;;  %10563 = vst.msk [vmem:[%s17495_s22 + $0x90] sm:$0xff] %vm4299_vm2, %v10531_v30  ;;  %v10172_v16 = vmul.f32 %v10095_v26, %v16896_v9  ;;  %v10171_v45 = vmul.f32 %v10091_v23, %v16900_v44 }
 0xbe5   : > { %v10534_v39 = vadd.f32 %v10460_v58, %v10172_v16  ;;  %v10533_v18 = vadd.f32 %v10455_v28, %v10171_v45 }
 0xbe6   : > { %v10106_v5 = vpop.permute.xlu1 %10105  ;;  %v10102_v41 = vpop.permute.xlu0 %10101 }
 0xbe7   : > { %10566 = vst.msk [vmem:[%s17495_s22 + $0xa8] sm:$0xff] %vm4299_vm2, %v10534_v39  ;;  %10565 = vst.msk [vmem:[%s17495_s22 + $0xa0] sm:$0xff] %vm4299_vm2, %v10533_v18  ;;  %v10174_v9 = vmul.f32 %v10106_v5, %v16920_v27  ;;  %v10173_v44 = vmul.f32 %v10102_v41, %v16924_v2  ;;  %v18069_v41 = vld [vmem:[#allocation19_spill] sm:$0xff] }
 0xbe9   : > { %v10536_v43 = vadd.f32 %v10470_v7, %v10174_v9  ;;  %v10535_v17 = vadd.f32 %v10465_v29, %v10173_v44 }
 0xbea   : > { %v10117_v21 = vpop.permute.xlu1 %10116  ;;  %v10113_v33 = vpop.permute.xlu0 %10112 }
 0xbeb   : > { %10568 = vst.msk [vmem:[%s17495_s22 + $0xb8] sm:$0xff] %vm4299_vm2, %v10536_v43  ;;  %10567 = vst.msk [vmem:[%s17495_s22 + $0xb0] sm:$0xff] %vm4299_vm2, %v10535_v17  ;;  %v10176_v27 = vmul.f32 %v10117_v21, %v16944_v42  ;;  %v10175_v2 = vmul.f32 %v10113_v33, %v16948_v51 }
 0xbed   : > { %v10538_v37 = vadd.f32 %v10480_v63, %v10176_v27  ;;  %v10537_v8 = vadd.f32 %v10475_v14, %v10175_v2  ;;  %v18070_v63 = vld [vmem:[#allocation46_spill] sm:$0xff]  ;;  %v18071_v14 = vld [vmem:[#allocation21_spill] sm:$0xff] }
 0xbee   : > { %v10128_v19 = vpop.permute.xlu1 %10127  ;;  %v10124_v25 = vpop.permute.xlu0 %10123 }
 0xbef   : > { %10570 = vst.msk [vmem:[%s17495_s22 + $0xc8] sm:$0xff] %vm4299_vm2, %v10538_v37  ;;  %10569 = vst.msk [vmem:[%s17495_s22 + $0xc0] sm:$0xff] %vm4299_vm2, %v10537_v8  ;;  %v10178_v42 = vmul.f32 %v10128_v19, %v16968_v12  ;;  %v10177_v51 = vmul.f32 %v10124_v25, %v16972_v52  ;;  %v18072_v8 = vld [vmem:[#allocation48_spill] sm:$0xff] }
 0xbf1   : > { %v10540_v15 = vadd.f32 %v10490_v56, %v10178_v42  ;;  %v10539_v3 = vadd.f32 %v10485_v4, %v10177_v51  ;;  %v18073_v4 = vld [vmem:[#allocation23_spill] sm:$0xff] }
 0xbf2   : > { %v10139_v31 = vpop.permute.xlu1 %10138  ;;  %v10135_v48 = vpop.permute.xlu0 %10134 }
 0xbf3   : > { %10572 = vst.msk [vmem:[%s17495_s22 + $0xd8] sm:$0xff] %vm4299_vm2, %v10540_v15  ;;  %10571 = vst.msk [vmem:[%s17495_s22 + $0xd0] sm:$0xff] %vm4299_vm2, %v10539_v3  ;;  %v10180_v12 = vmul.f32 %v10139_v31, %v16992_v32  ;;  %v10179_v52 = vmul.f32 %v10135_v48, %v16996_v49  ;;  %v18074_v3 = vld [vmem:[#allocation20_spill] sm:$0xff] }
 0xbf5   : > { %v10542_v30 = vadd.f32 %v10500_v38, %v10180_v12  ;;  %v10541_v58 = vadd.f32 %v10495_v1, %v10179_v52  ;;  %v18075_v1 = vld [vmem:[#allocation38_spill] sm:$0xff] }
 0xbf6   : > { %v9985_v28 = vpop.permute.xlu1 %9984  ;;  %v9981_v26 = vpop.permute.xlu0 %9980 }
 0xbf7   : > { %10574 = vst.msk [vmem:[%s17495_s22 + $0xe8] sm:$0xff] %vm4299_vm2, %v10542_v30  ;;  %10573 = vst.msk [vmem:[%s17495_s22 + $0xe0] sm:$0xff] %vm4299_vm2, %v10541_v58  ;;  %v10152_v32 = vmul.f32 %v9985_v28, %v16852_v50  ;;  %v10151_v49 = vmul.f32 %v9981_v26, %v16840_v53  ;;  %v18076_v58 = vld [vmem:[#allocation28_spill] sm:$0xff]  ;;  %v18077_v28 = vld [vmem:[#allocation22_spill] sm:$0xff] }
 0xbf8   : > { %v10425_v36 = vadd.f32 %v17474_v6, %v18076_v58 }
 0xbf9   : > { %v10514_v23 = vadd.f32 %v10360_v60, %v10152_v32  ;;  %v10513_v16 = vadd.f32 %v10355_v55, %v10151_v49  ;;  %v18078_v60 = vld [vmem:[#allocation41_spill] sm:$0xff] }
 0xbfa   : > { %v9992_v45 = vpop.permute.xlu1 %9991  ;;  %v10003_v39 = vpop.permute.xlu0 %10002 }
 0xbfb   : > { %10546 = vst.msk [vmem:[%s17495_s22 + $0x8] sm:$0xff] %vm4299_vm2, %v10514_v23  ;;  %10545 = vst.msk [vmem:[%s17495_s22] sm:$0xff] %vm4299_vm2, %v10513_v16  ;;  %v10153_v50 = vmul.f32 %v9992_v45, %v16836_v59  ;;  %v10155_v53 = vmul.f32 %v10003_v39, %v16888_v11  ;;  %v10505_v23 = vadd.f32 %v17474_v6, %v17479_v35  ;;  %v18079_v45 = vld [vmem:[#allocation26_spill] sm:$0xff] }
 0xbfc   : > { %v10420_v39 = vadd.f32 %v18079_v45, %v17474_v6 }
 0xbfd   : > { %v10515_v18 = vadd.f32 %v10365_v22, %v10153_v50  ;;  %v10517_v7 = vadd.f32 %v10375_v57, %v10155_v53  ;;  %v18080_v22 = vld [vmem:[#allocation24_spill] sm:$0xff]  ;;  %v18081_v50 = vld [vmem:[#allocation25_spill] sm:$0xff] }
 0xbfe   : > { %v9996_v29 = vpop.permute.xlu1 %9995  ;;  %v10014_v5 = vpop.permute.xlu0 %10013 }
 0xbff   : > { %10547 = vst.msk [vmem:[%s17495_s22 + $0x10] sm:$0xff] %vm4299_vm2, %v10515_v18  ;;  %10549 = vst.msk [vmem:[%s17495_s22 + $0x20] sm:$0xff] %vm4299_vm2, %v10517_v7  ;;  %v10154_v59 = vmul.f32 %v9996_v29, %v16848_v20  ;;  %v10157_v11 = vmul.f32 %v10014_v5, %v18069_v41  ;;  %v18082_v29 = vld [vmem:[#allocation27_spill] sm:$0xff] }
 0xc00   : > { %v10430_v5 = vadd.f32 %v18082_v29, %v17474_v6 }
 0xc01   : > { %v10516_v9 = vadd.f32 %v10370_v62, %v10154_v59  ;;  %v10519_v44 = vadd.f32 %v10385_v46, %v10157_v11  ;;  %v18083_v62 = vld [vmem:[#allocation39_spill] sm:$0xff] }
 0xc02   : > { %v10007_v43 = vpop.permute.xlu1 %10006  ;;  %v10025_v17 = vpop.permute.xlu0 %10024  ;;  %v18084_v11 = vld [vmem:[#allocation47_spill] sm:$0xff] }
 0xc03   : > { %10548 = vst.msk [vmem:[%s17495_s22 + $0x18] sm:$0xff] %vm4299_vm2, %v10516_v9  ;;  %10551 = vst.msk [vmem:[%s17495_s22 + $0x30] sm:$0xff] %vm4299_vm2, %v10519_v44  ;;  %v10156_v20 = vmul.f32 %v10007_v43, %v18070_v63  ;;  %v10159_v21 = vmul.f32 %v10025_v17, %v18071_v14 }
 0xc05   : > { %v10518_v33 = vadd.f32 %v10380_v10, %v10156_v20  ;;  %v10521_v27 = vadd.f32 %v10395_v40, %v10159_v21 }
 0xc06   : > { %v10018_v2 = vpop.permute.xlu1 %10017  ;;  %v10036_v37 = vpop.permute.xlu0 %10035 }
 0xc07   : > { %10550 = vst.msk [vmem:[%s17495_s22 + $0x28] sm:$0xff] %vm4299_vm2, %v10518_v33  ;;  %10553 = vst.msk [vmem:[%s17495_s22 + $0x40] sm:$0xff] %vm4299_vm2, %v10521_v27  ;;  %v10158_v56 = vmul.f32 %v10018_v2, %v18072_v8  ;;  %v10161_v19 = vmul.f32 %v10036_v37, %v18073_v4 }
 0xc09   : > { %v10520_v25 = vadd.f32 %v10390_v24, %v10158_v56  ;;  %v10523_v42 = vadd.f32 %v10405_v61, %v10161_v19 }
 0xc0a   : > { %v10029_v51 = vpop.permute.xlu1 %10028  ;;  %v10047_v15 = vpop.permute.xlu0 %10046 }
 0xc0b   : > { %10552 = vst.msk [vmem:[%s17495_s22 + $0x38] sm:$0xff] %vm4299_vm2, %v10520_v25  ;;  %10555 = vst.msk [vmem:[%s17495_s22 + $0x50] sm:$0xff] %vm4299_vm2, %v10523_v42  ;;  %v10160_v38 = vmul.f32 %v10029_v51, %v18074_v3  ;;  %v10163_v31 = vmul.f32 %v10047_v15, %v18075_v1 }
 0xc0d   : > { %v10522_v48 = vadd.f32 %v10400_v0, %v10160_v38  ;;  %v10525_v12 = vadd.f32 %v10415_v13, %v10163_v31 }
 0xc0e   : > { %v10040_v52 = vpop.permute.xlu1 %10039  ;;  %v10058_v30 = vpop.permute.xlu0 %10057 }
 0xc0f   : > { %10554 = vst.msk [vmem:[%s17495_s22 + $0x48] sm:$0xff] %vm4299_vm2, %v10522_v48  ;;  %10557 = vst.msk [vmem:[%s17495_s22 + $0x60] sm:$0xff] %vm4299_vm2, %v10525_v12  ;;  %v10162_v26 = vmul.f32 %v10040_v52, %v18077_v28  ;;  %v10165_v55 = vmul.f32 %v10058_v30, %v18078_v60 }
 0xc11   : > { %v10524_v32 = vadd.f32 %v10410_v34, %v10162_v26  ;;  %v10527_v49 = vadd.f32 %v10425_v36, %v10165_v55 }
 0xc12   : > { %v10051_v54 = vpop.permute.xlu1 %10050  ;;  %v10146_v16 = vpop.permute.xlu0 %10145 }
 0xc13   : > { %10556 = vst.msk [vmem:[%s17495_s22 + $0x58] sm:$0xff] %vm4299_vm2, %v10524_v32  ;;  %10559 = vst.msk [vmem:[%s17495_s22 + $0x70] sm:$0xff] %vm4299_vm2, %v10527_v49  ;;  %v10164_v57 = vmul.f32 %v10051_v54, %v18080_v22  ;;  %v10181_v53 = vmul.f32 %v10146_v16, %v18081_v50 }
 0xc15   : > { %v10526_v18 = vadd.f32 %v10420_v39, %v10164_v57  ;;  %v10543_v7 = vadd.f32 %v10505_v23, %v10181_v53 }
 0xc16   : > { %v10062_v35 = vpop.permute.xlu1 %10061 }
 0xc17   : > { %10558 = vst.msk [vmem:[%s17495_s22 + $0x68] sm:$0xff] %vm4299_vm2, %v10526_v18  ;;  %10575 = vst.msk [vmem:[%s17495_s22 + $0xf0] sm:$0xff] %vm4299_vm2, %v10543_v7  ;;  %v10166_v46 = vmul.f32 %v10062_v35, %v18083_v62 }
 0xc19   : > { %v10528_v59 = vadd.f32 %v10430_v5, %v10166_v46 }
 0xc1a   : > { %v10150_v41 = vpop.permute.xlu1 %10149 }
 0xc1b   : > { %10560 = vst.msk [vmem:[%s17495_s22 + $0x78] sm:$0xff] %vm4299_vm2, %v10528_v59  ;;  %v10182_v9 = vmul.f32 %v10150_v41, %v18084_v11 }
 0xc1d   : > { %v10544_v6 = vadd.f32 %v17477_v47, %v10182_v9 }
 0xc1f   : > { %10576 = vst.msk [vmem:[%s17495_s22 + $0xf8] sm:$0xff] %vm4299_vm2, %v10544_v6 }
 0xc20   : > { %14182 = shalt.err (!%p14179_p4)
}
 0xc21   : > { %s14183_s18 = scalar_lea.hbm %s17648_s29, 4096  ;;  %s14187_s27 = scalar_lea.hbm %s18085_s21, 8192 }
 0xc22   : > { %p14184_p9 = scmp.ne.s32.totalorder %s17648_s29, %s14183_s18  ;;  %p14188_p8 = scmp.lt.u32.totalorder %s17648_s29, %s18085_s21 }
 0xc23   : > { %p14189_p13 = scmp.lt.u32.totalorder %s14187_s27, %s14183_s18  ;;  %p14191_p10 = scmp.lt.u32.totalorder %s14183_s18, %s17648_s29 }
 0xc24   : > { %p14185_p0 = pnand %p14184_p9, %p14486_p5 }
 0xc25   : > { %p14190_p6 = por %p14189_p13, %p14188_p8 }
 0xc26   : > { %p14186_p11 = pneg %p14185_p0 }
 0xc27   : > { %p14192_p3 = por %p14191_p10, %p14190_p6 }
 0xc29   : > { %p14193_p7 = pnand %p14192_p3, %p14186_p11 }
 0xc2b   : > { %14196 = shalt.err (!%p14193_p7)
}
 0xc2c   : > { %s14255_s14 = smov 128   ;;  %s14256_s7 = smov 8  }
 0xc2d   : > { %13941 = dma.vmem_to_hbm [thread:$0]  (%p14486_p5), %s17650_s28, 4096, %s17648_s29, %s10578_s17, %s14255_s14, %s14255_s14, %s14256_s7  }
 0xc2e PF: > { %s18086_s24 = sld [smem:[#allocation17_spill]]  ;;  %s18087_s22 = sld [smem:[#allocation18_spill]] }
 0xc2f   : > { %p18089_p1 = scmp.ge.s32.totalorder %s14243_s16, 2 }
 0xc34   : > { %s10606_s25 = sand.u32 1, %s18086_s24   ;;  %p18088_p12 = scmp.ne.s32.totalorder %s18087_s22, 0 }
 0xc35   : > { %s10607_s18 = scalar_lea.sflag [#allocation6], %s10606_s25 }
 0xc36   : > { %p13958_p2 = pnand %p18089_p1, %p18088_p12 }
 0xc38   : > { %14226 = dma.done.wait (!%p13958_p2), %s10607_s18, 4096  }
 0xc39   : > { %14228 = vsyncadd (!%p13958_p2), %s10607_s18, 4294963200  ;;  %p29_p4 = scmp.ge.s32.totalorder %s14472_s13, 4   ;;  %s18090_s29 = smov %s14235_s30 }
 0xc3a   : > { %s18091_s30 = smov %s14239_s15  ;;  %s18092_s15 = smov %s14482_s10 }
 0xc3b   : > { %s18093_s16 = smov %s14472_s13  ;;  %31 = sbr.rel (!%p29_p4) target bundleno = 14 (0xe), region = 160 }
 0xc42   :  { %10612 = vsyncpa [#allocation5], 1 }
 0xc43   :  { %10614 = vsyncpa [#allocation5 + $0x1], 1 }
 0xc44   :  { %10615 = vsyncpa [#allocation8], 1 }
 0xc45   :  { %10616 = vsyncpa [#allocation11], 1 }
 0xc46   :  { %10617 = vsyncpa [#allocation6], 1 }
 0xc47   :  { %10619 = vsyncpa [#allocation6 + $0x1], 1 }

</bundles_post_ra>
